<compile_context>
chip_gen: v6e
topology: v6e:2x2x1
jax: 0.10.0
libtpu: 0.0.40
codegen_flags: <defaults>
</compile_context>

<pallas_src>
import jax
import jax.numpy as jnp
from jax import lax
from jax.experimental import pallas as pl
from jax.experimental.pallas import tpu as pltpu

D_IN = 42   # input feature dim
H = 24      # hidden size (lc1 out, GRU hidden)


def vad1_kernel(x_ref, w1t_ref, b1_ref, wih_ref, whh_ref, c_ref,
                bhhn_ref, w2_ref, b2_ref,
                o_ref,
                gi_ref, h_ref):
    """One (batch tile, time chunk): x block (Bt, tc, 42) -> output block (tc, Bt).

    Scratch:
      gi_ref : (tc, 3H, Bt) hidden-major input-side GRU projections (biases folded)
      h_ref  : (H, Bt)      hidden state carried across time chunks
    """
    Bt, tc, Din = x_ref.shape
    G = 3 * H

    # ---- prologue: lc1 + tanh, then one fused input-side gate projection ----
    x2 = x_ref[...].reshape(Bt * tc, Din)                       # rows ordered (b, t)
    h1 = jnp.tanh(jnp.dot(x2, w1t_ref[...],
                          preferred_element_type=jnp.float32) + b1_ref[...])
    # one-time relayout (off the serial chain): (Bt, tc, H) -> (tc, Bt, H)
    h1_tm = jnp.transpose(h1.reshape(Bt, tc, H), (1, 0, 2))
    # hidden-major gates: gi[t, g, b] = sum_h wih[g, h] * h1[t, b, h]
    wih_b = jnp.broadcast_to(wih_ref[...], (tc, G, H))
    gi = lax.dot_general(wih_b, h1_tm,
                         dimension_numbers=(((2,), (2,)), ((0,), (0,))),
                         preferred_element_type=jnp.float32)     # (tc, 3H, Bt)
    gi_ref[...] = gi + c_ref[...]   # folded biases (b_ir+b_hr, b_iz+b_hz, b_in)

    # ---- hidden-state carry across time chunks ------------------------------
    @pl.when(pl.program_id(1) == 0)
    def _():
        h_ref[...] = jnp.zeros_like(h_ref)

    # loop-invariant loads hoisted out of the recurrence
    whh = whh_ref[...]       # (3H, H)  recurrent weights, gate order (r, z, n)
    bhhn = bhhn_ref[...]     # (H, 1)   b_hn stays inside r * (.)
    w2 = w2_ref[...]         # (H, 1)   lc2 weights (fused below)
    b2 = b2_ref[...]         # (1, 1)

    def step(t, h):
        gh = jnp.dot(whh, h, preferred_element_type=jnp.float32)   # (3H, Bt)
        gi_t = gi_ref[t]                                           # (3H, Bt)
        r = jax.nn.sigmoid(gi_t[0:H] + gh[0:H])
        z = jax.nn.sigmoid(gi_t[H:2 * H] + gh[H:2 * H])
        n = jnp.tanh(gi_t[2 * H:3 * H] + r * (gh[2 * H:3 * H] + bhhn))
        h_new = (1.0 - z) * n + z * h
        # fused lc2 + sigmoid: sublane reduce + lane-dense time-major row store
        logit = jnp.sum(w2 * h_new, axis=0, keepdims=True) + b2    # (1, Bt)
        o_ref[pl.ds(t, 1), :] = jax.nn.sigmoid(logit)
        return h_new

    unroll = True if tc <= 32 else 8
    h_ref[...] = lax.fori_loop(0, tc, step, h_ref[...], unroll=unroll)


def _round_up(a, m):
    return -(-a // m) * m


def vad1net_forward(x, params, *, b_tile=None, t_chunk=None):
    """x: (B, T, 42) float32 -> (B, T, 1) float32."""
    B, T, Din = x.shape
    assert Din == D_IN
    w1, b1, wih, whh, bih, bhh, w2, b2 = [jnp.asarray(p, jnp.float32) for p in params]
    G = 3 * H

    # ---- tile selection ------------------------------------------------------
    # Batch tile up to 128 so the batch fills the 128-lane axis of every per-step op.
    # With >1 batch tile the lane-dense (T, B) output needs a 128-multiple tile, so
    # small batches (B <= 128) use a single tile; megacore split kicks in for B > 128.
    if b_tile is None:
        b_tile = _round_up(B, 8) if B <= 128 else 128
    if B > b_tile and b_tile % 128 != 0:
        b_tile = 128
    B_pad = _round_up(B, b_tile)
    nb = B_pad // b_tile

    # Time chunk bounds VMEM: gi scratch and the x block scale with t_chunk, not T.
    if t_chunk is None:
        t_chunk = 64
    t_chunk = min(t_chunk, T)
    if t_chunk < T:
        t_chunk = max(8, (t_chunk // 8) * 8)
    T_pad = _round_up(T, t_chunk)
    nc = T_pad // t_chunk

    x = x.astype(jnp.float32)
    if (B_pad, T_pad) != (B, T):
        x = jnp.pad(x, ((0, B_pad - B), (0, T_pad - T), (0, 0)))

    # ---- host-side weight prep: transpose / gate-fuse / bias-fold (tiny) -----
    w1t = w1.T                                            # (42, 24)
    b1r = b1.reshape(1, H)
    wih_c = wih                                           # (3H, 24) as-is (r, z, n)
    whh_c = whh                                           # (3H, 24) as-is
    c_col = jnp.concatenate([bih[0:H] + bhh[0:H],               # r: both biases folded
                             bih[H:2 * H] + bhh[H:2 * H],       # z: both biases folded
                             bih[2 * H:3 * H]]).reshape(G, 1)   # n: input-side bias only
    bhhn_col = bhh[2 * H:3 * H].reshape(H, 1)             # stays inside r * (.)
    w2_col = w2.reshape(H, 1)
    b2r = b2.reshape(1, 1)

    args = (x, w1t, b1r, wih_c, whh_c, c_col, bhhn_col, w2_col, b2r)

    in_specs = [pl.BlockSpec((b_tile, t_chunk, D_IN), lambda i, c: (i, c, 0))]
    for a in args[1:]:
        in_specs.append(
            pl.BlockSpec(a.shape, lambda i, c, _nd=a.ndim: (0,) * _nd))
    out_specs = pl.BlockSpec((t_chunk, b_tile), lambda i, c: (c, i))

    # ---- VMEM budget (lane-padded), capped at 75% of this core's capacity ----
    lanes, fb = 128, 4
    bl = max(b_tile, lanes)
    est = (2 * b_tile * t_chunk * lanes * fb      # x block (42 -> 128 lanes), 2 bufs
           + 2 * t_chunk * bl * fb                # output block, 2 bufs
           + t_chunk * G * bl * fb                # gi scratch
           + 3 * t_chunk * b_tile * lanes * fb    # x2 / h1 / gi transients (rough)
           + t_chunk * G * lanes * fb             # broadcast wih transient
           + (2 << 20))                           # weights + headroom
    try:
        cap = int(pltpu.get_tpu_info().vmem_capacity_bytes)
    except Exception:
        cap = 64 * 2 ** 20                        # v7x per-core floor
    vmem_limit = int(min(int(0.75 * cap), max(32 * 2 ** 20, 2 * est)))

    out = pl.pallas_call(
        vad1_kernel,
        out_shape=jax.ShapeDtypeStruct((T_pad, B_pad), jnp.float32),
        grid_spec=pltpu.PrefetchScalarGridSpec(
            num_scalar_prefetch=0,
            grid=(nb, nc),
            in_specs=in_specs,
            out_specs=out_specs,
            scratch_shapes=[pltpu.VMEM((t_chunk, G, b_tile), jnp.float32),
                            pltpu.VMEM((H, b_tile), jnp.float32)]),
        compiler_params=pltpu.CompilerParams(
            dimension_semantics=("parallel", "arbitrary"),
            vmem_limit_bytes=vmem_limit),
    )(*args)

    # (T_pad, B_pad) time-major -> (B, T, 1); slicing/transpose is XLA plumbing.
    return jnp.transpose(out[:T, :B], (1, 0)).reshape(B, T, 1)


def vad1net_reference(x, params):
    """Pure-JAX reference matching PyTorch semantics (for correctness check)."""
    w1, b1, wih, whh, bih, bhh, w2, b2 = params
    h1 = jnp.tanh(x @ w1.T + b1)                      # (B, T, H)
    B, T, _ = h1.shape
    gi = h1 @ wih.T + bih                             # (B, T, 3H)

    def step(h, gi_t):
        gh = h @ whh.T + bhh
        r = jax.nn.sigmoid(gi_t[:, 0:H] + gh[:, 0:H])
        z = jax.nn.sigmoid(gi_t[:, H:2 * H] + gh[:, H:2 * H])
        n = jnp.tanh(gi_t[:, 2 * H:3 * H] + r * gh[:, 2 * H:3 * H])
        h_new = (1.0 - z) * n + z * h
        return h_new, h_new

    _, hs = lax.scan(step, jnp.zeros((B, H), jnp.float32),
                     jnp.transpose(gi, (1, 0, 2)))
    hs = jnp.transpose(hs, (1, 0, 2))                 # (B, T, H)
    return jax.nn.sigmoid(hs @ w2.T + b2)


def init_params(key):
    """Deterministic synthetic params, PyTorch-style uniform(-1/sqrt(fan), +)."""
    ks = jax.random.split(key, 8)

    def u(k, shape, fan_in):
        bound = 1.0 / jnp.sqrt(jnp.float32(fan_in))
        return jax.random.uniform(k, shape, jnp.float32, -bound, bound)

    w1 = u(ks[0], (H, D_IN), D_IN)        # lc1.weight
    b1 = u(ks[1], (H,), D_IN)             # lc1.bias
    wih = u(ks[2], (3 * H, H), H)         # rnn1.weight_ih_l0 (r,z,n)
    whh = u(ks[3], (3 * H, H), H)         # rnn1.weight_hh_l0
    bih = u(ks[4], (3 * H,), H)           # rnn1.bias_ih_l0
    bhh = u(ks[5], (3 * H,), H)           # rnn1.bias_hh_l0
    w2 = u(ks[6], (1, H), H)              # lc2.weight
    b2 = u(ks[7], (1,), H)                # lc2.bias
    return (w1, b1, wih, whh, bih, bhh, w2, b2)


if __name__ == "__main__":
    key = jax.random.PRNGKey(0)
    k_p, k_x1, k_x2 = jax.random.split(key, 3)
    params = init_params(k_p)

    # Canonical small test.
    B, T = 2, 8
    x = jax.random.normal(k_x1, (B, T, D_IN), jnp.float32)
    out = jax.block_until_ready(vad1net_forward(x, params))
    ref = jax.block_until_ready(vad1net_reference(x, params))
    assert out.shape == (B, T, 1)
    assert jnp.allclose(out, ref, atol=2e-5, rtol=2e-5), "mismatch vs JAX reference"

    # Exercises multiple batch tiles ("parallel" axis) and the time-chunk h carry.
    B2, T2 = 132, 20
    x2 = jax.random.normal(k_x2, (B2, T2, D_IN), jnp.float32)
    out2 = jax.block_until_ready(vad1net_forward(x2, params, t_chunk=8))
    ref2 = jax.block_until_ready(vad1net_reference(x2, params))
    assert out2.shape == (B2, T2, 1)
    assert jnp.allclose(out2, ref2, atol=1e-4, rtol=1e-4), "mismatch (tiled path)"

    print("KERNEL_OK")
</pallas_src>

<mosaic_0001>
module attributes {stable_mosaic.version = 11 : i64} {
  func.func @vad1_kernel(%arg0: i32, %arg1: i32, %arg2: memref<8x8x42xf32, #tpu.memory_space<vmem>>, %arg3: memref<42x24xf32, #tpu.memory_space<vmem>>, %arg4: memref<1x24xf32, #tpu.memory_space<vmem>>, %arg5: memref<72x24xf32, #tpu.memory_space<vmem>>, %arg6: memref<72x24xf32, #tpu.memory_space<vmem>>, %arg7: memref<72x1xf32, #tpu.memory_space<vmem>>, %arg8: memref<24x1xf32, #tpu.memory_space<vmem>>, %arg9: memref<24x1xf32, #tpu.memory_space<vmem>>, %arg10: memref<1x1xf32, #tpu.memory_space<vmem>>, %arg11: memref<8x8xf32, #tpu.memory_space<vmem>>, %arg12: memref<8x72x8xf32, #tpu.memory_space<vmem>>, %arg13: memref<24x8xf32, #tpu.memory_space<vmem>>) attributes {dimension_semantics = [#tpu.dimension_semantics<parallel>, #tpu.dimension_semantics<arbitrary>], iteration_bounds = array<i64: 1, 1>, scalar_prefetch = 0 : i64, scratch_operands = 2 : i64, tpu.core_type = #tpu.core_type<tc>, window_params = [{transform_indices = @transform_0, window_bounds = array<i64: 8, 8, 42>}, {pipeline_mode = #tpu.pipeline_mode<synchronous>, transform_indices = @transform_1, window_bounds = array<i64: 42, 24>}, {pipeline_mode = #tpu.pipeline_mode<synchronous>, transform_indices = @transform_2, window_bounds = array<i64: 1, 24>}, {pipeline_mode = #tpu.pipeline_mode<synchronous>, transform_indices = @transform_3, window_bounds = array<i64: 72, 24>}, {pipeline_mode = #tpu.pipeline_mode<synchronous>, transform_indices = @transform_4, window_bounds = array<i64: 72, 24>}, {pipeline_mode = #tpu.pipeline_mode<synchronous>, transform_indices = @transform_5, window_bounds = array<i64: 72, 1>}, {pipeline_mode = #tpu.pipeline_mode<synchronous>, transform_indices = @transform_6, window_bounds = array<i64: 24, 1>}, {pipeline_mode = #tpu.pipeline_mode<synchronous>, transform_indices = @transform_7, window_bounds = array<i64: 24, 1>}, {pipeline_mode = #tpu.pipeline_mode<synchronous>, transform_indices = @transform_8, window_bounds = array<i64: 1, 1>}, {transform_indices = @transform_9, window_bounds = array<i64: 8, 8>}]} {
    %c0 = arith.constant 0 : index
    %c0_0 = arith.constant 0 : index
    %c0_1 = arith.constant 0 : index
    %0 = vector.load %arg2[%c0, %c0_0, %c0_1] : memref<8x8x42xf32, #tpu.memory_space<vmem>>, vector<8x8x42xf32>
    %1 = vector.shape_cast %0 : vector<8x8x42xf32> to vector<64x42xf32>
    %c0_2 = arith.constant 0 : index
    %c0_3 = arith.constant 0 : index
    %2 = vector.load %arg3[%c0_2, %c0_3] : memref<42x24xf32, #tpu.memory_space<vmem>>, vector<42x24xf32>
    %cst = arith.constant dense<0.000000e+00> : vector<64x24xf32>
    %3 = tpu.matmul %1, %2, %cst {dimension_numbers = #tpu.dot_dimension_numbers<[1], [0], [0], [1], [0, 0, 1, 1], [], []>} : vector<64x42xf32>, vector<42x24xf32>, vector<64x24xf32> -> vector<64x24xf32>
    %c0_4 = arith.constant 0 : index
    %c0_5 = arith.constant 0 : index
    %4 = vector.load %arg4[%c0_4, %c0_5] : memref<1x24xf32, #tpu.memory_space<vmem>>, vector<1x24xf32>
    %5 = vector.broadcast %4 : vector<1x24xf32> to vector<64x24xf32>
    %6 = arith.addf %3, %5 : vector<64x24xf32>
    %7 = math.tanh %6 : vector<64x24xf32>
    %8 = vector.shape_cast %7 : vector<64x24xf32> to vector<8x8x24xf32>
    %9 = tpu.transpose %8, [1, 0, 2] : vector<8x8x24xf32> -> vector<8x8x24xf32>
    %c0_6 = arith.constant 0 : index
    %c0_7 = arith.constant 0 : index
    %10 = vector.load %arg5[%c0_6, %c0_7] : memref<72x24xf32, #tpu.memory_space<vmem>>, vector<72x24xf32>
    %11 = vector.shape_cast %10 : vector<72x24xf32> to vector<1x72x24xf32>
    %12 = vector.broadcast %11 : vector<1x72x24xf32> to vector<8x72x24xf32>
    %cst_8 = arith.constant dense<0.000000e+00> : vector<8x72x8xf32>
    %13 = tpu.matmul %12, %9, %cst_8 {dimension_numbers = #tpu.dot_dimension_numbers<[2], [2], [1], [1], [0, 0, 0, 1, 1, 1], [0], [0]>} : vector<8x72x24xf32>, vector<8x8x24xf32>, vector<8x72x8xf32> -> vector<8x72x8xf32>
    %c0_9 = arith.constant 0 : index
    %c0_10 = arith.constant 0 : index
    %14 = vector.load %arg7[%c0_9, %c0_10] : memref<72x1xf32, #tpu.memory_space<vmem>>, vector<72x1xf32>
    %15 = vector.shape_cast %14 : vector<72x1xf32> to vector<1x72x1xf32>
    %16 = vector.broadcast %15 : vector<1x72x1xf32> to vector<8x72x8xf32>
    %17 = arith.addf %13, %16 : vector<8x72x8xf32>
    %c0_11 = arith.constant 0 : index
    %c0_12 = arith.constant 0 : index
    %c0_13 = arith.constant 0 : index
    %18 = vector.load %arg12[%c0_11, %c0_12, %c0_13] : memref<8x72x8xf32, #tpu.memory_space<vmem>>, vector<8x72x8xf32>
    tpu.vector_store %arg12[%c0_11, %c0_12, %c0_13], %17 {strides = array<i32>} : memref<8x72x8xf32, #tpu.memory_space<vmem>>, vector<8x72x8xf32>,
    %c0_i32 = arith.constant 0 : i32
    %19 = arith.cmpi eq, %arg1, %c0_i32 : i32
    %20 = arith.extui %19 : i1 to i32
    %c0_i32_14 = arith.constant 0 : i32
    %21 = arith.cmpi ne, %20, %c0_i32_14 : i32
    scf.if %21 {
      %cst_100 = arith.constant 0.000000e+00 : f32
      %388 = vector.broadcast %cst_100 : f32 to vector<24x8xf32>
      %c0_101 = arith.constant 0 : index
      %c0_102 = arith.constant 0 : index
      %389 = vector.load %arg13[%c0_101, %c0_102] : memref<24x8xf32, #tpu.memory_space<vmem>>, vector<24x8xf32>
      tpu.vector_store %arg13[%c0_101, %c0_102], %388 {strides = array<i32>} : memref<24x8xf32, #tpu.memory_space<vmem>>, vector<24x8xf32>,
    } else {
    }
    %c0_15 = arith.constant 0 : index
    %c0_16 = arith.constant 0 : index
    %22 = vector.load %arg6[%c0_15, %c0_16] : memref<72x24xf32, #tpu.memory_space<vmem>>, vector<72x24xf32>
    %c0_17 = arith.constant 0 : index
    %c0_18 = arith.constant 0 : index
    %23 = vector.load %arg8[%c0_17, %c0_18] : memref<24x1xf32, #tpu.memory_space<vmem>>, vector<24x1xf32>
    %c0_19 = arith.constant 0 : index
    %c0_20 = arith.constant 0 : index
    %24 = vector.load %arg9[%c0_19, %c0_20] : memref<24x1xf32, #tpu.memory_space<vmem>>, vector<24x1xf32>
    %c0_21 = arith.constant 0 : index
    %c0_22 = arith.constant 0 : index
    %25 = vector.load %arg10[%c0_21, %c0_22] : memref<1x1xf32, #tpu.memory_space<vmem>>, vector<1x1xf32>
    %c0_23 = arith.constant 0 : index
    %c0_24 = arith.constant 0 : index
    %26 = vector.load %arg13[%c0_23, %c0_24] : memref<24x8xf32, #tpu.memory_space<vmem>>, vector<24x8xf32>
    %c0_i32_25 = arith.constant 0 : i32
    %cst_26 = arith.constant dense<0.000000e+00> : vector<72x8xf32>
    %27 = tpu.matmul %22, %26, %cst_26 {dimension_numbers = #tpu.dot_dimension_numbers<[1], [0], [0], [1], [0, 0, 1, 1], [], []>} : vector<72x24xf32>, vector<24x8xf32>, vector<72x8xf32> -> vector<72x8xf32>
    %28 = arith.index_cast %c0_i32_25 : i32 to index
    %c0_27 = arith.constant 0 : index
    %c0_28 = arith.constant 0 : index
    %29 = vector.load %arg12[%28, %c0_27, %c0_28] : memref<8x72x8xf32, #tpu.memory_space<vmem>>, vector<1x72x8xf32>
    %30 = vector.shape_cast %29 : vector<1x72x8xf32> to vector<72x8xf32>
    %31 = vector.extract_strided_slice %30 {offsets = [0, 0], sizes = [24, 8], strides = [1, 1]} : vector<72x8xf32> to vector<24x8xf32>
    %32 = vector.extract_strided_slice %27 {offsets = [0, 0], sizes = [24, 8], strides = [1, 1]} : vector<72x8xf32> to vector<24x8xf32>
    %33 = arith.addf %31, %32 : vector<24x8xf32>
    %34 = arith.negf %33 : vector<24x8xf32>
    %35 = math.exp %34 : vector<24x8xf32>
    %cst_29 = arith.constant 1.000000e+00 : f32
    %36 = vector.broadcast %cst_29 : f32 to vector<24x8xf32>
    %37 = arith.addf %36, %35 : vector<24x8xf32>
    %38 = arith.divf %36, %37 : vector<24x8xf32>
    %39 = vector.extract_strided_slice %30 {offsets = [24, 0], sizes = [24, 8], strides = [1, 1]} : vector<72x8xf32> to vector<24x8xf32>
    %40 = vector.extract_strided_slice %27 {offsets = [24, 0], sizes = [24, 8], strides = [1, 1]} : vector<72x8xf32> to vector<24x8xf32>
    %41 = arith.addf %39, %40 : vector<24x8xf32>
    %42 = arith.negf %41 : vector<24x8xf32>
    %43 = math.exp %42 : vector<24x8xf32>
    %cst_30 = arith.constant 1.000000e+00 : f32
    %44 = vector.broadcast %cst_30 : f32 to vector<24x8xf32>
    %45 = arith.addf %44, %43 : vector<24x8xf32>
    %46 = arith.divf %44, %45 : vector<24x8xf32>
    %47 = vector.extract_strided_slice %30 {offsets = [48, 0], sizes = [24, 8], strides = [1, 1]} : vector<72x8xf32> to vector<24x8xf32>
    %48 = vector.extract_strided_slice %27 {offsets = [48, 0], sizes = [24, 8], strides = [1, 1]} : vector<72x8xf32> to vector<24x8xf32>
    %49 = vector.broadcast %23 : vector<24x1xf32> to vector<24x8xf32>
    %50 = arith.addf %48, %49 : vector<24x8xf32>
    %51 = arith.mulf %38, %50 : vector<24x8xf32>
    %52 = arith.addf %47, %51 : vector<24x8xf32>
    %53 = math.tanh %52 : vector<24x8xf32>
    %cst_31 = arith.constant 1.000000e+00 : f32
    %54 = vector.broadcast %cst_31 : f32 to vector<24x8xf32>
    %55 = arith.subf %54, %46 : vector<24x8xf32>
    %56 = arith.mulf %55, %53 : vector<24x8xf32>
    %57 = arith.mulf %46, %26 : vector<24x8xf32>
    %58 = arith.addf %56, %57 : vector<24x8xf32>
    %59 = vector.broadcast %24 : vector<24x1xf32> to vector<24x8xf32>
    %60 = arith.mulf %59, %58 : vector<24x8xf32>
    %cst_32 = arith.constant dense<0.000000e+00> : vector<8xf32>
    %61 = vector.multi_reduction <add>, %60, %cst_32 [0] : vector<24x8xf32> to vector<8xf32>
    %62 = vector.shape_cast %61 : vector<8xf32> to vector<1x8xf32>
    %63 = vector.broadcast %25 : vector<1x1xf32> to vector<1x8xf32>
    %64 = arith.addf %62, %63 : vector<1x8xf32>
    %65 = arith.negf %64 : vector<1x8xf32>
    %66 = math.exp %65 : vector<1x8xf32>
    %cst_33 = arith.constant 1.000000e+00 : f32
    %67 = vector.broadcast %cst_33 : f32 to vector<1x8xf32>
    %68 = arith.addf %67, %66 : vector<1x8xf32>
    %69 = arith.divf %67, %68 : vector<1x8xf32>
    %70 = arith.index_cast %c0_i32_25 : i32 to index
    %c0_34 = arith.constant 0 : index
    %71 = vector.load %arg11[%70, %c0_34] : memref<8x8xf32, #tpu.memory_space<vmem>>, vector<1x8xf32>
    tpu.vector_store %arg11[%70, %c0_34], %69 {strides = array<i32>} : memref<8x8xf32, #tpu.memory_space<vmem>>, vector<1x8xf32>,
    %c1_i32 = arith.constant 1 : i32
    %cst_35 = arith.constant dense<0.000000e+00> : vector<72x8xf32>
    %72 = tpu.matmul %22, %58, %cst_35 {dimension_numbers = #tpu.dot_dimension_numbers<[1], [0], [0], [1], [0, 0, 1, 1], [], []>} : vector<72x24xf32>, vector<24x8xf32>, vector<72x8xf32> -> vector<72x8xf32>
    %73 = arith.index_cast %c1_i32 : i32 to index
    %c0_36 = arith.constant 0 : index
    %c0_37 = arith.constant 0 : index
    %74 = vector.load %arg12[%73, %c0_36, %c0_37] : memref<8x72x8xf32, #tpu.memory_space<vmem>>, vector<1x72x8xf32>
    %75 = vector.shape_cast %74 : vector<1x72x8xf32> to vector<72x8xf32>
    %76 = vector.extract_strided_slice %75 {offsets = [0, 0], sizes = [24, 8], strides = [1, 1]} : vector<72x8xf32> to vector<24x8xf32>
    %77 = vector.extract_strided_slice %72 {offsets = [0, 0], sizes = [24, 8], strides = [1, 1]} : vector<72x8xf32> to vector<24x8xf32>
    %78 = arith.addf %76, %77 : vector<24x8xf32>
    %79 = arith.negf %78 : vector<24x8xf32>
    %80 = math.exp %79 : vector<24x8xf32>
    %cst_38 = arith.constant 1.000000e+00 : f32
    %81 = vector.broadcast %cst_38 : f32 to vector<24x8xf32>
    %82 = arith.addf %81, %80 : vector<24x8xf32>
    %83 = arith.divf %81, %82 : vector<24x8xf32>
    %84 = vector.extract_strided_slice %75 {offsets = [24, 0], sizes = [24, 8], strides = [1, 1]} : vector<72x8xf32> to vector<24x8xf32>
    %85 = vector.extract_strided_slice %72 {offsets = [24, 0], sizes = [24, 8], strides = [1, 1]} : vector<72x8xf32> to vector<24x8xf32>
    %86 = arith.addf %84, %85 : vector<24x8xf32>
    %87 = arith.negf %86 : vector<24x8xf32>
    %88 = math.exp %87 : vector<24x8xf32>
    %cst_39 = arith.constant 1.000000e+00 : f32
    %89 = vector.broadcast %cst_39 : f32 to vector<24x8xf32>
    %90 = arith.addf %89, %88 : vector<24x8xf32>
    %91 = arith.divf %89, %90 : vector<24x8xf32>
    %92 = vector.extract_strided_slice %75 {offsets = [48, 0], sizes = [24, 8], strides = [1, 1]} : vector<72x8xf32> to vector<24x8xf32>
    %93 = vector.extract_strided_slice %72 {offsets = [48, 0], sizes = [24, 8], strides = [1, 1]} : vector<72x8xf32> to vector<24x8xf32>
    %94 = vector.broadcast %23 : vector<24x1xf32> to vector<24x8xf32>
    %95 = arith.addf %93, %94 : vector<24x8xf32>
    %96 = arith.mulf %83, %95 : vector<24x8xf32>
    %97 = arith.addf %92, %96 : vector<24x8xf32>
    %98 = math.tanh %97 : vector<24x8xf32>
    %cst_40 = arith.constant 1.000000e+00 : f32
    %99 = vector.broadcast %cst_40 : f32 to vector<24x8xf32>
    %100 = arith.subf %99, %91 : vector<24x8xf32>
    %101 = arith.mulf %100, %98 : vector<24x8xf32>
    %102 = arith.mulf %91, %58 : vector<24x8xf32>
    %103 = arith.addf %101, %102 : vector<24x8xf32>
    %104 = vector.broadcast %24 : vector<24x1xf32> to vector<24x8xf32>
    %105 = arith.mulf %104, %103 : vector<24x8xf32>
    %cst_41 = arith.constant dense<0.000000e+00> : vector<8xf32>
    %106 = vector.multi_reduction <add>, %105, %cst_41 [0] : vector<24x8xf32> to vector<8xf32>
    %107 = vector.shape_cast %106 : vector<8xf32> to vector<1x8xf32>
    %108 = vector.broadcast %25 : vector<1x1xf32> to vector<1x8xf32>
    %109 = arith.addf %107, %108 : vector<1x8xf32>
    %110 = arith.negf %109 : vector<1x8xf32>
    %111 = math.exp %110 : vector<1x8xf32>
    %cst_42 = arith.constant 1.000000e+00 : f32
    %112 = vector.broadcast %cst_42 : f32 to vector<1x8xf32>
    %113 = arith.addf %112, %111 : vector<1x8xf32>
    %114 = arith.divf %112, %113 : vector<1x8xf32>
    %115 = arith.index_cast %c1_i32 : i32 to index
    %c0_43 = arith.constant 0 : index
    %116 = vector.load %arg11[%115, %c0_43] : memref<8x8xf32, #tpu.memory_space<vmem>>, vector<1x8xf32>
    tpu.vector_store %arg11[%115, %c0_43], %114 {strides = array<i32>} : memref<8x8xf32, #tpu.memory_space<vmem>>, vector<1x8xf32>,
    %c2_i32 = arith.constant 2 : i32
    %cst_44 = arith.constant dense<0.000000e+00> : vector<72x8xf32>
    %117 = tpu.matmul %22, %103, %cst_44 {dimension_numbers = #tpu.dot_dimension_numbers<[1], [0], [0], [1], [0, 0, 1, 1], [], []>} : vector<72x24xf32>, vector<24x8xf32>, vector<72x8xf32> -> vector<72x8xf32>
    %118 = arith.index_cast %c2_i32 : i32 to index
    %c0_45 = arith.constant 0 : index
    %c0_46 = arith.constant 0 : index
    %119 = vector.load %arg12[%118, %c0_45, %c0_46] : memref<8x72x8xf32, #tpu.memory_space<vmem>>, vector<1x72x8xf32>
    %120 = vector.shape_cast %119 : vector<1x72x8xf32> to vector<72x8xf32>
    %121 = vector.extract_strided_slice %120 {offsets = [0, 0], sizes = [24, 8], strides = [1, 1]} : vector<72x8xf32> to vector<24x8xf32>
    %122 = vector.extract_strided_slice %117 {offsets = [0, 0], sizes = [24, 8], strides = [1, 1]} : vector<72x8xf32> to vector<24x8xf32>
    %123 = arith.addf %121, %122 : vector<24x8xf32>
    %124 = arith.negf %123 : vector<24x8xf32>
    %125 = math.exp %124 : vector<24x8xf32>
    %cst_47 = arith.constant 1.000000e+00 : f32
    %126 = vector.broadcast %cst_47 : f32 to vector<24x8xf32>
    %127 = arith.addf %126, %125 : vector<24x8xf32>
    %128 = arith.divf %126, %127 : vector<24x8xf32>
    %129 = vector.extract_strided_slice %120 {offsets = [24, 0], sizes = [24, 8], strides = [1, 1]} : vector<72x8xf32> to vector<24x8xf32>
    %130 = vector.extract_strided_slice %117 {offsets = [24, 0], sizes = [24, 8], strides = [1, 1]} : vector<72x8xf32> to vector<24x8xf32>
    %131 = arith.addf %129, %130 : vector<24x8xf32>
    %132 = arith.negf %131 : vector<24x8xf32>
    %133 = math.exp %132 : vector<24x8xf32>
    %cst_48 = arith.constant 1.000000e+00 : f32
    %134 = vector.broadcast %cst_48 : f32 to vector<24x8xf32>
    %135 = arith.addf %134, %133 : vector<24x8xf32>
    %136 = arith.divf %134, %135 : vector<24x8xf32>
    %137 = vector.extract_strided_slice %120 {offsets = [48, 0], sizes = [24, 8], strides = [1, 1]} : vector<72x8xf32> to vector<24x8xf32>
    %138 = vector.extract_strided_slice %117 {offsets = [48, 0], sizes = [24, 8], strides = [1, 1]} : vector<72x8xf32> to vector<24x8xf32>
    %139 = vector.broadcast %23 : vector<24x1xf32> to vector<24x8xf32>
    %140 = arith.addf %138, %139 : vector<24x8xf32>
    %141 = arith.mulf %128, %140 : vector<24x8xf32>
    %142 = arith.addf %137, %141 : vector<24x8xf32>
    %143 = math.tanh %142 : vector<24x8xf32>
    %cst_49 = arith.constant 1.000000e+00 : f32
    %144 = vector.broadcast %cst_49 : f32 to vector<24x8xf32>
    %145 = arith.subf %144, %136 : vector<24x8xf32>
    %146 = arith.mulf %145, %143 : vector<24x8xf32>
    %147 = arith.mulf %136, %103 : vector<24x8xf32>
    %148 = arith.addf %146, %147 : vector<24x8xf32>
    %149 = vector.broadcast %24 : vector<24x1xf32> to vector<24x8xf32>
    %150 = arith.mulf %149, %148 : vector<24x8xf32>
    %cst_50 = arith.constant dense<0.000000e+00> : vector<8xf32>
    %151 = vector.multi_reduction <add>, %150, %cst_50 [0] : vector<24x8xf32> to vector<8xf32>
    %152 = vector.shape_cast %151 : vector<8xf32> to vector<1x8xf32>
    %153 = vector.broadcast %25 : vector<1x1xf32> to vector<1x8xf32>
    %154 = arith.addf %152, %153 : vector<1x8xf32>
    %155 = arith.negf %154 : vector<1x8xf32>
    %156 = math.exp %155 : vector<1x8xf32>
    %cst_51 = arith.constant 1.000000e+00 : f32
    %157 = vector.broadcast %cst_51 : f32 to vector<1x8xf32>
    %158 = arith.addf %157, %156 : vector<1x8xf32>
    %159 = arith.divf %157, %158 : vector<1x8xf32>
    %160 = arith.index_cast %c2_i32 : i32 to index
    %c0_52 = arith.constant 0 : index
    %161 = vector.load %arg11[%160, %c0_52] : memref<8x8xf32, #tpu.memory_space<vmem>>, vector<1x8xf32>
    tpu.vector_store %arg11[%160, %c0_52], %159 {strides = array<i32>} : memref<8x8xf32, #tpu.memory_space<vmem>>, vector<1x8xf32>,
    %c3_i32 = arith.constant 3 : i32
    %cst_53 = arith.constant dense<0.000000e+00> : vector<72x8xf32>
    %162 = tpu.matmul %22, %148, %cst_53 {dimension_numbers = #tpu.dot_dimension_numbers<[1], [0], [0], [1], [0, 0, 1, 1], [], []>} : vector<72x24xf32>, vector<24x8xf32>, vector<72x8xf32> -> vector<72x8xf32>
    %163 = arith.index_cast %c3_i32 : i32 to index
    %c0_54 = arith.constant 0 : index
    %c0_55 = arith.constant 0 : index
    %164 = vector.load %arg12[%163, %c0_54, %c0_55] : memref<8x72x8xf32, #tpu.memory_space<vmem>>, vector<1x72x8xf32>
    %165 = vector.shape_cast %164 : vector<1x72x8xf32> to vector<72x8xf32>
    %166 = vector.extract_strided_slice %165 {offsets = [0, 0], sizes = [24, 8], strides = [1, 1]} : vector<72x8xf32> to vector<24x8xf32>
    %167 = vector.extract_strided_slice %162 {offsets = [0, 0], sizes = [24, 8], strides = [1, 1]} : vector<72x8xf32> to vector<24x8xf32>
    %168 = arith.addf %166, %167 : vector<24x8xf32>
    %169 = arith.negf %168 : vector<24x8xf32>
    %170 = math.exp %169 : vector<24x8xf32>
    %cst_56 = arith.constant 1.000000e+00 : f32
    %171 = vector.broadcast %cst_56 : f32 to vector<24x8xf32>
    %172 = arith.addf %171, %170 : vector<24x8xf32>
    %173 = arith.divf %171, %172 : vector<24x8xf32>
    %174 = vector.extract_strided_slice %165 {offsets = [24, 0], sizes = [24, 8], strides = [1, 1]} : vector<72x8xf32> to vector<24x8xf32>
    %175 = vector.extract_strided_slice %162 {offsets = [24, 0], sizes = [24, 8], strides = [1, 1]} : vector<72x8xf32> to vector<24x8xf32>
    %176 = arith.addf %174, %175 : vector<24x8xf32>
    %177 = arith.negf %176 : vector<24x8xf32>
    %178 = math.exp %177 : vector<24x8xf32>
    %cst_57 = arith.constant 1.000000e+00 : f32
    %179 = vector.broadcast %cst_57 : f32 to vector<24x8xf32>
    %180 = arith.addf %179, %178 : vector<24x8xf32>
    %181 = arith.divf %179, %180 : vector<24x8xf32>
    %182 = vector.extract_strided_slice %165 {offsets = [48, 0], sizes = [24, 8], strides = [1, 1]} : vector<72x8xf32> to vector<24x8xf32>
    %183 = vector.extract_strided_slice %162 {offsets = [48, 0], sizes = [24, 8], strides = [1, 1]} : vector<72x8xf32> to vector<24x8xf32>
    %184 = vector.broadcast %23 : vector<24x1xf32> to vector<24x8xf32>
    %185 = arith.addf %183, %184 : vector<24x8xf32>
    %186 = arith.mulf %173, %185 : vector<24x8xf32>
    %187 = arith.addf %182, %186 : vector<24x8xf32>
    %188 = math.tanh %187 : vector<24x8xf32>
    %cst_58 = arith.constant 1.000000e+00 : f32
    %189 = vector.broadcast %cst_58 : f32 to vector<24x8xf32>
    %190 = arith.subf %189, %181 : vector<24x8xf32>
    %191 = arith.mulf %190, %188 : vector<24x8xf32>
    %192 = arith.mulf %181, %148 : vector<24x8xf32>
    %193 = arith.addf %191, %192 : vector<24x8xf32>
    %194 = vector.broadcast %24 : vector<24x1xf32> to vector<24x8xf32>
    %195 = arith.mulf %194, %193 : vector<24x8xf32>
    %cst_59 = arith.constant dense<0.000000e+00> : vector<8xf32>
    %196 = vector.multi_reduction <add>, %195, %cst_59 [0] : vector<24x8xf32> to vector<8xf32>
    %197 = vector.shape_cast %196 : vector<8xf32> to vector<1x8xf32>
    %198 = vector.broadcast %25 : vector<1x1xf32> to vector<1x8xf32>
    %199 = arith.addf %197, %198 : vector<1x8xf32>
    %200 = arith.negf %199 : vector<1x8xf32>
    %201 = math.exp %200 : vector<1x8xf32>
    %cst_60 = arith.constant 1.000000e+00 : f32
    %202 = vector.broadcast %cst_60 : f32 to vector<1x8xf32>
    %203 = arith.addf %202, %201 : vector<1x8xf32>
    %204 = arith.divf %202, %203 : vector<1x8xf32>
    %205 = arith.index_cast %c3_i32 : i32 to index
    %c0_61 = arith.constant 0 : index
    %206 = vector.load %arg11[%205, %c0_61] : memref<8x8xf32, #tpu.memory_space<vmem>>, vector<1x8xf32>
    tpu.vector_store %arg11[%205, %c0_61], %204 {strides = array<i32>} : memref<8x8xf32, #tpu.memory_space<vmem>>, vector<1x8xf32>,
    %c4_i32 = arith.constant 4 : i32
    %cst_62 = arith.constant dense<0.000000e+00> : vector<72x8xf32>
    %207 = tpu.matmul %22, %193, %cst_62 {dimension_numbers = #tpu.dot_dimension_numbers<[1], [0], [0], [1], [0, 0, 1, 1], [], []>} : vector<72x24xf32>, vector<24x8xf32>, vector<72x8xf32> -> vector<72x8xf32>
    %208 = arith.index_cast %c4_i32 : i32 to index
    %c0_63 = arith.constant 0 : index
    %c0_64 = arith.constant 0 : index
    %209 = vector.load %arg12[%208, %c0_63, %c0_64] : memref<8x72x8xf32, #tpu.memory_space<vmem>>, vector<1x72x8xf32>
    %210 = vector.shape_cast %209 : vector<1x72x8xf32> to vector<72x8xf32>
    %211 = vector.extract_strided_slice %210 {offsets = [0, 0], sizes = [24, 8], strides = [1, 1]} : vector<72x8xf32> to vector<24x8xf32>
    %212 = vector.extract_strided_slice %207 {offsets = [0, 0], sizes = [24, 8], strides = [1, 1]} : vector<72x8xf32> to vector<24x8xf32>
    %213 = arith.addf %211, %212 : vector<24x8xf32>
    %214 = arith.negf %213 : vector<24x8xf32>
    %215 = math.exp %214 : vector<24x8xf32>
    %cst_65 = arith.constant 1.000000e+00 : f32
    %216 = vector.broadcast %cst_65 : f32 to vector<24x8xf32>
    %217 = arith.addf %216, %215 : vector<24x8xf32>
    %218 = arith.divf %216, %217 : vector<24x8xf32>
    %219 = vector.extract_strided_slice %210 {offsets = [24, 0], sizes = [24, 8], strides = [1, 1]} : vector<72x8xf32> to vector<24x8xf32>
    %220 = vector.extract_strided_slice %207 {offsets = [24, 0], sizes = [24, 8], strides = [1, 1]} : vector<72x8xf32> to vector<24x8xf32>
    %221 = arith.addf %219, %220 : vector<24x8xf32>
    %222 = arith.negf %221 : vector<24x8xf32>
    %223 = math.exp %222 : vector<24x8xf32>
    %cst_66 = arith.constant 1.000000e+00 : f32
    %224 = vector.broadcast %cst_66 : f32 to vector<24x8xf32>
    %225 = arith.addf %224, %223 : vector<24x8xf32>
    %226 = arith.divf %224, %225 : vector<24x8xf32>
    %227 = vector.extract_strided_slice %210 {offsets = [48, 0], sizes = [24, 8], strides = [1, 1]} : vector<72x8xf32> to vector<24x8xf32>
    %228 = vector.extract_strided_slice %207 {offsets = [48, 0], sizes = [24, 8], strides = [1, 1]} : vector<72x8xf32> to vector<24x8xf32>
    %229 = vector.broadcast %23 : vector<24x1xf32> to vector<24x8xf32>
    %230 = arith.addf %228, %229 : vector<24x8xf32>
    %231 = arith.mulf %218, %230 : vector<24x8xf32>
    %232 = arith.addf %227, %231 : vector<24x8xf32>
    %233 = math.tanh %232 : vector<24x8xf32>
    %cst_67 = arith.constant 1.000000e+00 : f32
    %234 = vector.broadcast %cst_67 : f32 to vector<24x8xf32>
    %235 = arith.subf %234, %226 : vector<24x8xf32>
    %236 = arith.mulf %235, %233 : vector<24x8xf32>
    %237 = arith.mulf %226, %193 : vector<24x8xf32>
    %238 = arith.addf %236, %237 : vector<24x8xf32>
    %239 = vector.broadcast %24 : vector<24x1xf32> to vector<24x8xf32>
    %240 = arith.mulf %239, %238 : vector<24x8xf32>
    %cst_68 = arith.constant dense<0.000000e+00> : vector<8xf32>
    %241 = vector.multi_reduction <add>, %240, %cst_68 [0] : vector<24x8xf32> to vector<8xf32>
    %242 = vector.shape_cast %241 : vector<8xf32> to vector<1x8xf32>
    %243 = vector.broadcast %25 : vector<1x1xf32> to vector<1x8xf32>
    %244 = arith.addf %242, %243 : vector<1x8xf32>
    %245 = arith.negf %244 : vector<1x8xf32>
    %246 = math.exp %245 : vector<1x8xf32>
    %cst_69 = arith.constant 1.000000e+00 : f32
    %247 = vector.broadcast %cst_69 : f32 to vector<1x8xf32>
    %248 = arith.addf %247, %246 : vector<1x8xf32>
    %249 = arith.divf %247, %248 : vector<1x8xf32>
    %250 = arith.index_cast %c4_i32 : i32 to index
    %c0_70 = arith.constant 0 : index
    %251 = vector.load %arg11[%250, %c0_70] : memref<8x8xf32, #tpu.memory_space<vmem>>, vector<1x8xf32>
    tpu.vector_store %arg11[%250, %c0_70], %249 {strides = array<i32>} : memref<8x8xf32, #tpu.memory_space<vmem>>, vector<1x8xf32>,
    %c5_i32 = arith.constant 5 : i32
    %cst_71 = arith.constant dense<0.000000e+00> : vector<72x8xf32>
    %252 = tpu.matmul %22, %238, %cst_71 {dimension_numbers = #tpu.dot_dimension_numbers<[1], [0], [0], [1], [0, 0, 1, 1], [], []>} : vector<72x24xf32>, vector<24x8xf32>, vector<72x8xf32> -> vector<72x8xf32>
    %253 = arith.index_cast %c5_i32 : i32 to index
    %c0_72 = arith.constant 0 : index
    %c0_73 = arith.constant 0 : index
    %254 = vector.load %arg12[%253, %c0_72, %c0_73] : memref<8x72x8xf32, #tpu.memory_space<vmem>>, vector<1x72x8xf32>
    %255 = vector.shape_cast %254 : vector<1x72x8xf32> to vector<72x8xf32>
    %256 = vector.extract_strided_slice %255 {offsets = [0, 0], sizes = [24, 8], strides = [1, 1]} : vector<72x8xf32> to vector<24x8xf32>
    %257 = vector.extract_strided_slice %252 {offsets = [0, 0], sizes = [24, 8], strides = [1, 1]} : vector<72x8xf32> to vector<24x8xf32>
    %258 = arith.addf %256, %257 : vector<24x8xf32>
    %259 = arith.negf %258 : vector<24x8xf32>
    %260 = math.exp %259 : vector<24x8xf32>
    %cst_74 = arith.constant 1.000000e+00 : f32
    %261 = vector.broadcast %cst_74 : f32 to vector<24x8xf32>
    %262 = arith.addf %261, %260 : vector<24x8xf32>
    %263 = arith.divf %261, %262 : vector<24x8xf32>
    %264 = vector.extract_strided_slice %255 {offsets = [24, 0], sizes = [24, 8], strides = [1, 1]} : vector<72x8xf32> to vector<24x8xf32>
    %265 = vector.extract_strided_slice %252 {offsets = [24, 0], sizes = [24, 8], strides = [1, 1]} : vector<72x8xf32> to vector<24x8xf32>
    %266 = arith.addf %264, %265 : vector<24x8xf32>
    %267 = arith.negf %266 : vector<24x8xf32>
    %268 = math.exp %267 : vector<24x8xf32>
    %cst_75 = arith.constant 1.000000e+00 : f32
    %269 = vector.broadcast %cst_75 : f32 to vector<24x8xf32>
    %270 = arith.addf %269, %268 : vector<24x8xf32>
    %271 = arith.divf %269, %270 : vector<24x8xf32>
    %272 = vector.extract_strided_slice %255 {offsets = [48, 0], sizes = [24, 8], strides = [1, 1]} : vector<72x8xf32> to vector<24x8xf32>
    %273 = vector.extract_strided_slice %252 {offsets = [48, 0], sizes = [24, 8], strides = [1, 1]} : vector<72x8xf32> to vector<24x8xf32>
    %274 = vector.broadcast %23 : vector<24x1xf32> to vector<24x8xf32>
    %275 = arith.addf %273, %274 : vector<24x8xf32>
    %276 = arith.mulf %263, %275 : vector<24x8xf32>
    %277 = arith.addf %272, %276 : vector<24x8xf32>
    %278 = math.tanh %277 : vector<24x8xf32>
    %cst_76 = arith.constant 1.000000e+00 : f32
    %279 = vector.broadcast %cst_76 : f32 to vector<24x8xf32>
    %280 = arith.subf %279, %271 : vector<24x8xf32>
    %281 = arith.mulf %280, %278 : vector<24x8xf32>
    %282 = arith.mulf %271, %238 : vector<24x8xf32>
    %283 = arith.addf %281, %282 : vector<24x8xf32>
    %284 = vector.broadcast %24 : vector<24x1xf32> to vector<24x8xf32>
    %285 = arith.mulf %284, %283 : vector<24x8xf32>
    %cst_77 = arith.constant dense<0.000000e+00> : vector<8xf32>
    %286 = vector.multi_reduction <add>, %285, %cst_77 [0] : vector<24x8xf32> to vector<8xf32>
    %287 = vector.shape_cast %286 : vector<8xf32> to vector<1x8xf32>
    %288 = vector.broadcast %25 : vector<1x1xf32> to vector<1x8xf32>
    %289 = arith.addf %287, %288 : vector<1x8xf32>
    %290 = arith.negf %289 : vector<1x8xf32>
    %291 = math.exp %290 : vector<1x8xf32>
    %cst_78 = arith.constant 1.000000e+00 : f32
    %292 = vector.broadcast %cst_78 : f32 to vector<1x8xf32>
    %293 = arith.addf %292, %291 : vector<1x8xf32>
    %294 = arith.divf %292, %293 : vector<1x8xf32>
    %295 = arith.index_cast %c5_i32 : i32 to index
    %c0_79 = arith.constant 0 : index
    %296 = vector.load %arg11[%295, %c0_79] : memref<8x8xf32, #tpu.memory_space<vmem>>, vector<1x8xf32>
    tpu.vector_store %arg11[%295, %c0_79], %294 {strides = array<i32>} : memref<8x8xf32, #tpu.memory_space<vmem>>, vector<1x8xf32>,
    %c6_i32 = arith.constant 6 : i32
    %cst_80 = arith.constant dense<0.000000e+00> : vector<72x8xf32>
    %297 = tpu.matmul %22, %283, %cst_80 {dimension_numbers = #tpu.dot_dimension_numbers<[1], [0], [0], [1], [0, 0, 1, 1], [], []>} : vector<72x24xf32>, vector<24x8xf32>, vector<72x8xf32> -> vector<72x8xf32>
    %298 = arith.index_cast %c6_i32 : i32 to index
    %c0_81 = arith.constant 0 : index
    %c0_82 = arith.constant 0 : index
    %299 = vector.load %arg12[%298, %c0_81, %c0_82] : memref<8x72x8xf32, #tpu.memory_space<vmem>>, vector<1x72x8xf32>
    %300 = vector.shape_cast %299 : vector<1x72x8xf32> to vector<72x8xf32>
    %301 = vector.extract_strided_slice %300 {offsets = [0, 0], sizes = [24, 8], strides = [1, 1]} : vector<72x8xf32> to vector<24x8xf32>
    %302 = vector.extract_strided_slice %297 {offsets = [0, 0], sizes = [24, 8], strides = [1, 1]} : vector<72x8xf32> to vector<24x8xf32>
    %303 = arith.addf %301, %302 : vector<24x8xf32>
    %304 = arith.negf %303 : vector<24x8xf32>
    %305 = math.exp %304 : vector<24x8xf32>
    %cst_83 = arith.constant 1.000000e+00 : f32
    %306 = vector.broadcast %cst_83 : f32 to vector<24x8xf32>
    %307 = arith.addf %306, %305 : vector<24x8xf32>
    %308 = arith.divf %306, %307 : vector<24x8xf32>
    %309 = vector.extract_strided_slice %300 {offsets = [24, 0], sizes = [24, 8], strides = [1, 1]} : vector<72x8xf32> to vector<24x8xf32>
    %310 = vector.extract_strided_slice %297 {offsets = [24, 0], sizes = [24, 8], strides = [1, 1]} : vector<72x8xf32> to vector<24x8xf32>
    %311 = arith.addf %309, %310 : vector<24x8xf32>
    %312 = arith.negf %311 : vector<24x8xf32>
    %313 = math.exp %312 : vector<24x8xf32>
    %cst_84 = arith.constant 1.000000e+00 : f32
    %314 = vector.broadcast %cst_84 : f32 to vector<24x8xf32>
    %315 = arith.addf %314, %313 : vector<24x8xf32>
    %316 = arith.divf %314, %315 : vector<24x8xf32>
    %317 = vector.extract_strided_slice %300 {offsets = [48, 0], sizes = [24, 8], strides = [1, 1]} : vector<72x8xf32> to vector<24x8xf32>
    %318 = vector.extract_strided_slice %297 {offsets = [48, 0], sizes = [24, 8], strides = [1, 1]} : vector<72x8xf32> to vector<24x8xf32>
    %319 = vector.broadcast %23 : vector<24x1xf32> to vector<24x8xf32>
    %320 = arith.addf %318, %319 : vector<24x8xf32>
    %321 = arith.mulf %308, %320 : vector<24x8xf32>
    %322 = arith.addf %317, %321 : vector<24x8xf32>
    %323 = math.tanh %322 : vector<24x8xf32>
    %cst_85 = arith.constant 1.000000e+00 : f32
    %324 = vector.broadcast %cst_85 : f32 to vector<24x8xf32>
    %325 = arith.subf %324, %316 : vector<24x8xf32>
    %326 = arith.mulf %325, %323 : vector<24x8xf32>
    %327 = arith.mulf %316, %283 : vector<24x8xf32>
    %328 = arith.addf %326, %327 : vector<24x8xf32>
    %329 = vector.broadcast %24 : vector<24x1xf32> to vector<24x8xf32>
    %330 = arith.mulf %329, %328 : vector<24x8xf32>
    %cst_86 = arith.constant dense<0.000000e+00> : vector<8xf32>
    %331 = vector.multi_reduction <add>, %330, %cst_86 [0] : vector<24x8xf32> to vector<8xf32>
    %332 = vector.shape_cast %331 : vector<8xf32> to vector<1x8xf32>
    %333 = vector.broadcast %25 : vector<1x1xf32> to vector<1x8xf32>
    %334 = arith.addf %332, %333 : vector<1x8xf32>
    %335 = arith.negf %334 : vector<1x8xf32>
    %336 = math.exp %335 : vector<1x8xf32>
    %cst_87 = arith.constant 1.000000e+00 : f32
    %337 = vector.broadcast %cst_87 : f32 to vector<1x8xf32>
    %338 = arith.addf %337, %336 : vector<1x8xf32>
    %339 = arith.divf %337, %338 : vector<1x8xf32>
    %340 = arith.index_cast %c6_i32 : i32 to index
    %c0_88 = arith.constant 0 : index
    %341 = vector.load %arg11[%340, %c0_88] : memref<8x8xf32, #tpu.memory_space<vmem>>, vector<1x8xf32>
    tpu.vector_store %arg11[%340, %c0_88], %339 {strides = array<i32>} : memref<8x8xf32, #tpu.memory_space<vmem>>, vector<1x8xf32>,
    %c7_i32 = arith.constant 7 : i32
    %cst_89 = arith.constant dense<0.000000e+00> : vector<72x8xf32>
    %342 = tpu.matmul %22, %328, %cst_89 {dimension_numbers = #tpu.dot_dimension_numbers<[1], [0], [0], [1], [0, 0, 1, 1], [], []>} : vector<72x24xf32>, vector<24x8xf32>, vector<72x8xf32> -> vector<72x8xf32>
    %343 = arith.index_cast %c7_i32 : i32 to index
    %c0_90 = arith.constant 0 : index
    %c0_91 = arith.constant 0 : index
    %344 = vector.load %arg12[%343, %c0_90, %c0_91] : memref<8x72x8xf32, #tpu.memory_space<vmem>>, vector<1x72x8xf32>
    %345 = vector.shape_cast %344 : vector<1x72x8xf32> to vector<72x8xf32>
    %346 = vector.extract_strided_slice %345 {offsets = [0, 0], sizes = [24, 8], strides = [1, 1]} : vector<72x8xf32> to vector<24x8xf32>
    %347 = vector.extract_strided_slice %342 {offsets = [0, 0], sizes = [24, 8], strides = [1, 1]} : vector<72x8xf32> to vector<24x8xf32>
    %348 = arith.addf %346, %347 : vector<24x8xf32>
    %349 = arith.negf %348 : vector<24x8xf32>
    %350 = math.exp %349 : vector<24x8xf32>
    %cst_92 = arith.constant 1.000000e+00 : f32
    %351 = vector.broadcast %cst_92 : f32 to vector<24x8xf32>
    %352 = arith.addf %351, %350 : vector<24x8xf32>
    %353 = arith.divf %351, %352 : vector<24x8xf32>
    %354 = vector.extract_strided_slice %345 {offsets = [24, 0], sizes = [24, 8], strides = [1, 1]} : vector<72x8xf32> to vector<24x8xf32>
    %355 = vector.extract_strided_slice %342 {offsets = [24, 0], sizes = [24, 8], strides = [1, 1]} : vector<72x8xf32> to vector<24x8xf32>
    %356 = arith.addf %354, %355 : vector<24x8xf32>
    %357 = arith.negf %356 : vector<24x8xf32>
    %358 = math.exp %357 : vector<24x8xf32>
    %cst_93 = arith.constant 1.000000e+00 : f32
    %359 = vector.broadcast %cst_93 : f32 to vector<24x8xf32>
    %360 = arith.addf %359, %358 : vector<24x8xf32>
    %361 = arith.divf %359, %360 : vector<24x8xf32>
    %362 = vector.extract_strided_slice %345 {offsets = [48, 0], sizes = [24, 8], strides = [1, 1]} : vector<72x8xf32> to vector<24x8xf32>
    %363 = vector.extract_strided_slice %342 {offsets = [48, 0], sizes = [24, 8], strides = [1, 1]} : vector<72x8xf32> to vector<24x8xf32>
    %364 = vector.broadcast %23 : vector<24x1xf32> to vector<24x8xf32>
    %365 = arith.addf %363, %364 : vector<24x8xf32>
    %366 = arith.mulf %353, %365 : vector<24x8xf32>
    %367 = arith.addf %362, %366 : vector<24x8xf32>
    %368 = math.tanh %367 : vector<24x8xf32>
    %cst_94 = arith.constant 1.000000e+00 : f32
    %369 = vector.broadcast %cst_94 : f32 to vector<24x8xf32>
    %370 = arith.subf %369, %361 : vector<24x8xf32>
    %371 = arith.mulf %370, %368 : vector<24x8xf32>
    %372 = arith.mulf %361, %328 : vector<24x8xf32>
    %373 = arith.addf %371, %372 : vector<24x8xf32>
    %374 = vector.broadcast %24 : vector<24x1xf32> to vector<24x8xf32>
    %375 = arith.mulf %374, %373 : vector<24x8xf32>
    %cst_95 = arith.constant dense<0.000000e+00> : vector<8xf32>
    %376 = vector.multi_reduction <add>, %375, %cst_95 [0] : vector<24x8xf32> to vector<8xf32>
    %377 = vector.shape_cast %376 : vector<8xf32> to vector<1x8xf32>
    %378 = vector.broadcast %25 : vector<1x1xf32> to vector<1x8xf32>
    %379 = arith.addf %377, %378 : vector<1x8xf32>
    %380 = arith.negf %379 : vector<1x8xf32>
    %381 = math.exp %380 : vector<1x8xf32>
    %cst_96 = arith.constant 1.000000e+00 : f32
    %382 = vector.broadcast %cst_96 : f32 to vector<1x8xf32>
    %383 = arith.addf %382, %381 : vector<1x8xf32>
    %384 = arith.divf %382, %383 : vector<1x8xf32>
    %385 = arith.index_cast %c7_i32 : i32 to index
    %c0_97 = arith.constant 0 : index
    %386 = vector.load %arg11[%385, %c0_97] : memref<8x8xf32, #tpu.memory_space<vmem>>, vector<1x8xf32>
    tpu.vector_store %arg11[%385, %c0_97], %384 {strides = array<i32>} : memref<8x8xf32, #tpu.memory_space<vmem>>, vector<1x8xf32>,
    %c8_i32 = arith.constant 8 : i32
    %c0_98 = arith.constant 0 : index
    %c0_99 = arith.constant 0 : index
    %387 = vector.load %arg13[%c0_98, %c0_99] : memref<24x8xf32, #tpu.memory_space<vmem>>, vector<24x8xf32>
    tpu.vector_store %arg13[%c0_98, %c0_99], %373 {strides = array<i32>} : memref<24x8xf32, #tpu.memory_space<vmem>>, vector<24x8xf32>,
    return
  }
  func.func @transform_0(%arg0: i32, %arg1: i32) -> (i32, i32, i32) {
    %c0_i32 = arith.constant 0 : i32
    %c0_i32_0 = arith.constant 0 : i32
    return %arg0, %arg1, %c0_i32 : i32, i32, i32
  }
  func.func @transform_1(%arg0: i32, %arg1: i32) -> (i32, i32) {
    %c0_i32 = arith.constant 0 : i32
    %c0_i32_0 = arith.constant 0 : i32
    %c0_i32_1 = arith.constant 0 : i32
    return %c0_i32, %c0_i32_0 : i32, i32
  }
  func.func @transform_2(%arg0: i32, %arg1: i32) -> (i32, i32) {
    %c0_i32 = arith.constant 0 : i32
    %c0_i32_0 = arith.constant 0 : i32
    %c0_i32_1 = arith.constant 0 : i32
    return %c0_i32, %c0_i32_0 : i32, i32
  }
  func.func @transform_3(%arg0: i32, %arg1: i32) -> (i32, i32) {
    %c0_i32 = arith.constant 0 : i32
    %c0_i32_0 = arith.constant 0 : i32
    %c0_i32_1 = arith.constant 0 : i32
    return %c0_i32, %c0_i32_0 : i32, i32
  }
  func.func @transform_4(%arg0: i32, %arg1: i32) -> (i32, i32) {
    %c0_i32 = arith.constant 0 : i32
    %c0_i32_0 = arith.constant 0 : i32
    %c0_i32_1 = arith.constant 0 : i32
    return %c0_i32, %c0_i32_0 : i32, i32
  }
  func.func @transform_5(%arg0: i32, %arg1: i32) -> (i32, i32) {
    %c0_i32 = arith.constant 0 : i32
    %c0_i32_0 = arith.constant 0 : i32
    %c0_i32_1 = arith.constant 0 : i32
    return %c0_i32, %c0_i32_0 : i32, i32
  }
  func.func @transform_6(%arg0: i32, %arg1: i32) -> (i32, i32) {
    %c0_i32 = arith.constant 0 : i32
    %c0_i32_0 = arith.constant 0 : i32
    %c0_i32_1 = arith.constant 0 : i32
    return %c0_i32, %c0_i32_0 : i32, i32
  }
  func.func @transform_7(%arg0: i32, %arg1: i32) -> (i32, i32) {
    %c0_i32 = arith.constant 0 : i32
    %c0_i32_0 = arith.constant 0 : i32
    %c0_i32_1 = arith.constant 0 : i32
    return %c0_i32, %c0_i32_0 : i32, i32
  }
  func.func @transform_8(%arg0: i32, %arg1: i32) -> (i32, i32) {
    %c0_i32 = arith.constant 0 : i32
    %c0_i32_0 = arith.constant 0 : i32
    %c0_i32_1 = arith.constant 0 : i32
    return %c0_i32, %c0_i32_0 : i32, i32
  }
  func.func @transform_9(%arg0: i32, %arg1: i32) -> (i32, i32) {
    %c0_i32 = arith.constant 0 : i32
    return %arg1, %arg0 : i32, i32
  }
}

</mosaic_0001>

<bundles_post_ra>
// kernel: tpu_custom_call.1
= control target key start
LH: loop header
LB: loop body
LE: loop exit
PB: predicated region body
PF: predicated region fallthrough
CT: control target
= control target key end

     0   :  { %s5844_s0 = inlined_call_operand.vmem [shape: f32[8,8,42], index: 0, kind: input, shape index: {}]   ;;  %s5845_s1 = inlined_call_operand.vmem [shape: f32[42,24], index: 1, kind: input, shape index: {}]   ;;  %s5846_s2 = inlined_call_operand.vmem [shape: f32[1,24], index: 2, kind: input, shape index: {}]   ;;  %s5847_s3 = inlined_call_operand.vmem [shape: f32[72,24], index: 3, kind: input, shape index: {}]   ;;  %s5848_s4 = inlined_call_operand.vmem [shape: f32[72,24], index: 4, kind: input, shape index: {}]   ;;  %s5849_s5 = inlined_call_operand.vmem [shape: f32[72,1], index: 5, kind: input, shape index: {}]   ;;  %s5850_s6 = inlined_call_operand.vmem [shape: f32[24,1], index: 6, kind: input, shape index: {}]   ;;  %s5851_s7 = inlined_call_operand.vmem [shape: f32[24,1], index: 7, kind: input, shape index: {}]   ;;  %s5852_s8 = inlined_call_operand.<no memory space> [shape: f32[1,1], index: 8, kind: input, shape index: {}]   ;;  %s5853_s9 = inlined_call_operand.hbm [shape: f32[8,8], index: 9, kind: output, shape index: {}]  }
   0x1   :  { %v14_v0 = vstv %s5852_s8 }
   0x2   :  { %15 = vst [vmem:[#allocation4] sm:$0x1] %v14_v0 }
   0x3   :  { %v48_v1 = vld [vmem:[%s5845_s1 + $0x28] sm:$0x3]  ;;  %vm81_vm0 = vcmask 1041408   ;;  %v47_v2 = vld [vmem:[%s5845_s1 + $0x20] sm:$0xff]  ;;  %vm56_vm1 = vcmask 343040   ;;  %v46_v3 = vld [vmem:[%s5845_s1 + $0x18] sm:$0xff] }
   0x4   :  { %3583 = vmatprep.subr.msk.mxu0 %vm81_vm0, %v48_v1  ;;  %v35_v4 = vld [vmem:[%s5844_s0] sm:$0xff]  ;;  %v45_v5 = vld [vmem:[%s5845_s1 + $0x10] sm:$0xff] }
   0x5   :  { %3584 = vmatpush3.msk.msra.mxu0 %vm81_vm0, %v48_v1  ;;  %3595 = vmatprep.mubr.msk.f32.mxu0 %vm56_vm1, %v35_v4 }
   0x6   :  { %3585 = vmatprep.subr.mxu0 %v47_v2 }
   0x7   :  { %3586 = vmatpush3.msra.mxu0 %v47_v2 }
   0x8   :  { %16 = vsyncpa [#allocation6], 0  ;;  %3587 = vmatprep.subr.mxu0 %v46_v3  ;;  %v44_v6 = vld [vmem:[%s5845_s1 + $0x8] sm:$0xff]  ;;  %v43_v7 = vld [vmem:[%s5845_s1] sm:$0xff]  ;;  %v4441_v15 = vmov 0.0   ;;  %vm4442_vm2 = vmmov 0   ;;  %v203_v45 = vlaneseq }
   0x9   :  { %3588 = vmatpush3.msra.mxu0 %v46_v3  ;;  %v36_v8 = vld [vmem:[%s5844_s0 + $0x8] sm:$0xff]  ;;  %v37_v9 = vld [vmem:[%s5844_s0 + $0x10] sm:$0xff]  ;;  %v38_v10 = vld [vmem:[%s5844_s0 + $0x18] sm:$0xff]  ;;  %3607 = vmatprep.subr.mxu1 %v4441_v15  ;;  %v4443_v16 = vmov 0   ;;  %v4444_v43 = vmov 1983009808  }
   0xa   :  { %3589 = vmatprep.subr.mxu0 %v45_v5  ;;  %v39_v11 = vld [vmem:[%s5844_s0 + $0x20] sm:$0xff]  ;;  %v40_v12 = vld [vmem:[%s5844_s0 + $0x28] sm:$0xff]  ;;  %v41_v13 = vld [vmem:[%s5844_s0 + $0x30] sm:$0xff]  ;;  %3609 = vmatprep.mubr.msk.f32.mxu1 %vm4442_vm2, %v4441_v15  ;;  %v201_v44 = vunpack.c.l.s4 %v4444_v43  ;;  %v4590_v49 = vshrl.u32 %v203_v45, 7  ;;  %v4445_v52 = vmov 1934713408  }
   0xb   :  { %3590 = vmatpush3.msra.mxu0 %v45_v5  ;;  %v42_v14 = vld [vmem:[%s5844_s0 + $0x38] sm:$0xff]  ;;  %4112 = vset.pattern.permute.xlu1 %v4443_v16  ;;  %v345_v17 = vld [vmem:[%s5849_s5 + $0x10] sm:$0xff]  ;;  %v343_v18 = vld [vmem:[%s5849_s5] sm:$0xff]  ;;  %v265_v53 = vunpack.c.l.s4 %v4445_v52  ;;  %vm397_vm3 = vcmask 195584   ;;  %vm1329_vm4 = vcmask 64512   ;;  %vm1700_vm5 = vcmask 57344  }
   0xc   :  { %3591 = vmatprep.subr.mxu0 %v44_v6  ;;  %4111 = vset.pattern.permute.xlu0 %v4443_v16  ;;  %v344_v19 = vld [vmem:[%s5849_s5 + $0x8] sm:$0xff]  ;;  %v346_v21 = vld [vmem:[%s5849_s5 + $0x18] sm:$0xff]  ;;  %v347_v23 = vld [vmem:[%s5849_s5 + $0x20] sm:$0xff]  ;;  %v202_v48 = vunpack.c.0.s8 %v201_v44  ;;  %1408 = vst.msk [vmem:[#allocation3 + $0x10] sm:$0xff] %vm1329_vm4, %v4441_v15 }
   0xd   :  { %3592 = vmatpush3.msra.mxu0 %v44_v6  ;;  %364 = vperm.xlu0 %4111, %v345_v17   ;;  %v348_v20 = vld [vmem:[%s5849_s5 + $0x28] sm:$0xff]  ;;  %v351_v26 = vld [vmem:[%s5849_s5 + $0x40] sm:$0xff]  ;;  %v349_v33 = vld [vmem:[%s5849_s5 + $0x30] sm:$0xff]  ;;  %v266_v62 = vunpack.c.0.s8 %v265_v53  ;;  %1406 = vst.msk [vmem:[#allocation3] sm:$0xff] %vm1329_vm4, %v4441_v15 }
   0xe   :  { %3593 = vmatprep.subr.mxu0 %v43_v7  ;;  %354 = vperm.xlu1 %4112, %v343_v18   ;;  %v3175_v27 = vld [vmem:[%s5846_s2] ss:$0 sm:$0xff]  ;;  %v350_v39 = vld [vmem:[%s5849_s5 + $0x38] sm:$0xff]  ;;  %v205_v56 = vsub.s32 %v202_v48, %v4590_v49  ;;  %v4632_v18 = vld [vmem:[%s5847_s3 + $0x8] sm:$0xff]  ;;  %1407 = vst.msk [vmem:[#allocation3 + $0x8] sm:$0xff] %vm1329_vm4, %v4441_v15 }
   0xf   :  { %3594 = vmatpush3.msra.mxu0 %v43_v7  ;;  %v4602_v5 = vsub.s32 %v266_v62, %v4590_v49  ;;  %v1420_v48 = vld [vmem:[%s5850_s6 + $0x10] sm:$0xff]  ;;  %v1422_v53 = vld [vmem:[%s5851_s7 + $0x8] sm:$0xff]  ;;  %v5066_v62 = vld [vmem:[%s5848_s4 + $0x20] sm:$0xff] }
  0x10   :  { %3596 = vmatmul.mubr.msk.f32.vlgmr.msra.gmra.mxu0 %vm56_vm1, %v36_v8  ;;  %3636 = vmatprep.subr.mxu0 %v4441_v15  ;;  %v1423_v52 = vld [vmem:[%s5851_s7 + $0x10] sm:$0xff] }
  0x11   :  { %3598 = vmatprep.mubr.msk.f32.mxu0 %vm56_vm1, %v37_v9  ;;  %359 = vperm.xlu0 %4111, %v344_v19   ;;  %v4651_v19 = vld [vmem:[%s5847_s3 + $0x10] sm:$0xff] }
  0x12   :  { %379 = vperm.xlu1 %4112, %v348_v20  }
  0x14   :  { %3599 = vmatmul.mubr.msk.f32.gmra.mxu0 %vm56_vm1, %v38_v10 }
  0x15   :  { %3601 = vmatprep.mubr.msk.f32.mxu0 %vm56_vm1, %v39_v11  ;;  %374 = vperm.xlu0 %4111, %v347_v23   ;;  %v4666_v23 = vld [vmem:[%s5847_s3 + $0x18] sm:$0xff] }
  0x16   :  { %369 = vperm.xlu1 %4112, %v346_v21  }
  0x18   :  { %3602 = vmatmul.mubr.msk.f32.gmra.mxu0 %vm56_vm1, %v40_v12 }
  0x19   :  { %3604 = vmatprep.mubr.msk.f32.mxu0 %vm56_vm1, %v41_v13  ;;  %394 = vperm.xlu0 %4111, %v351_v26  }
  0x1a   :  { %389 = vperm.xlu1 %4112, %v350_v39  }
  0x1c   :  { %3605 = vmatmul.mubr.msk.f32.gmra.mxu0 %vm56_vm1, %v42_v14  ;;  %v4614_v14 = vld [vmem:[%s5847_s3] sm:$0xff] }
  0x1d   :  { %3638 = vmatprep.mubr.msk.f32.mxu0 %vm4442_vm2, %v4441_v15  ;;  %384 = vperm.xlu0 %4111, %v349_v33  }
  0x1e   :  { %1628 = vperm.xlu1 %4112, %v1420_v48  }
  0xd0   :  { %v3597_v22 = vpop.f32.mrf.mxu0 }
  0xd1   :  { %v157_v34 = vadd.f32 %v3597_v22, %v3175_v27 }
  0xd2   :  { %v151_v24 = vpop.f32.mrf.mxu0 }
  0xd3   :  { %v152_v28 = vadd.f32 %v3175_v27, %v151_v24 }
  0xd4   :  { %v3600_v25 = vpop.f32.mrf.mxu0 }
  0xd5   :  { %v167_v30 = vadd.f32 %v3600_v25, %v3175_v27 }
  0xd6   :  { %v161_v29 = vpop.f32.mrf.mxu0 }
  0xd7   :  { %v162_v31 = vadd.f32 %v3175_v27, %v161_v29 }
  0xd8   :  { %v3603_v32 = vpop.f32.mrf.mxu0 }
  0xd9   :  { %4113 = vtanh.f32 %v162_v31  ;;  %v177_v35 = vadd.f32 %v3603_v32, %v3175_v27  ;;  %v4710_v31 = vld [vmem:[%s5847_s3 + $0x28] sm:$0xff] }
  0xda   :  { %4115 = vtanh.f32 %v152_v28  ;;  %v171_v36 = vpop.f32.mrf.mxu0 }
  0xdb   :  { %4117 = vtanh.f32 %v167_v30  ;;  %v172_v37 = vadd.f32 %v3175_v27, %v171_v36 }
  0xdc   :  { %v3606_v38 = vpop.f32.mrf.mxu0  ;;  %4119 = vtanh.f32 %v157_v34  ;;  %v4726_v34 = vld [vmem:[%s5847_s3 + $0x30] sm:$0xff] }
  0xdd   :  { %v187_v40 = vadd.f32 %v3606_v38, %v3175_v27  ;;  %4121 = vtanh.f32 %v177_v35  ;;  %v4755_v38 = vld [vmem:[%s5847_s3 + $0x40] sm:$0xff] }
  0xde   :  { %v181_v41 = vpop.f32.mrf.mxu0 }
  0xdf   :  { %4123 = vtanh.f32 %v187_v40  ;;  %v182_v42 = vadd.f32 %v3175_v27, %v181_v41  ;;  %v4685_v27 = vld [vmem:[%s5847_s3 + $0x20] sm:$0xff] }
  0xe0   :  { %4125 = vtanh.f32 %v172_v37  ;;  %v4739_v37 = vld [vmem:[%s5847_s3 + $0x38] sm:$0xff] }
  0xe1   :  { %4127 = vtanh.f32 %v182_v42 }
  0xe6   :  { %v4586_v46 = vpop.eup %4113 }
  0xe7   :  { %v4588_v47 = vpop.eup %4115 }
  0xe8   :  { %v4592_v50 = vpop.eup %4117  ;;  %v198_v51 = vcombine.low %v4588_v47, %v4586_v46  ;;  %v199_v21 = vcombine.high %v4588_v47, %v4586_v46  ;;  %v1419_v47 = vld [vmem:[%s5850_s6 + $0x8] sm:$0xff] }
  0xe9   :  { %v4596_v54 = vpop.eup %4119  ;;  %1623 = vperm.xlu0 %4111, %v1419_v47  }
  0xea   :  { %v4122_v55 = vpop.eup %4121  ;;  %v214_v57 = vcombine.low %v4596_v54, %v4592_v50  ;;  %v206_v60 = vrot.slane %v198_v51, %v205_v56  ;;  %v215_v24 = vcombine.high %v4596_v54, %v4592_v50  ;;  %v4687_v28 = vrot.slane %v199_v21, %v205_v56  ;;  %v1421_v50 = vld [vmem:[%s5851_s7] sm:$0xff]  ;;  %v1424_v54 = vld [vmem:[#allocation4] sm:$0x1] }
  0xeb   :  { %v1418_v51 = vld [vmem:[%s5850_s6] sm:$0xff] }
  0xec   :  { %v4124_v58 = vpop.eup %4123  ;;  %v222_v0 = vrot.slane %v214_v57, %v205_v56  ;;  %v4689_v29 = vrot.slane %v215_v24, %v205_v56  ;;  %1618 = vperm.xlu1 %4112, %v1418_v51   ;;  %v4990_v57 = vld [vmem:[#allocation3] sm:$0xff] }
  0xed   :  { %v4126_v59 = vpop.eup %4125  ;;  %v246_v61 = vcombine.low %v4122_v55, %v4124_v58  ;;  %v247_v22 = vcombine.high %v4122_v55, %v4124_v58  ;;  %1657 = vperm.xlu0 %4111, %v1421_v50   ;;  %v4967_v55 = vld [vmem:[#allocation3 + $0x10] sm:$0xff]  ;;  %v5030_v58 = vld [vmem:[%s5848_s4] sm:$0xff] }
  0xee   :  { %v4128_v63 = vpop.eup %4127  ;;  %v262_v4 = vcombine.low %v206_v60, %v222_v0  ;;  %v263_v8 = vcombine.high %v206_v60, %v222_v0  ;;  %v278_v32 = vcombine.low %v4687_v28, %v4689_v29  ;;  %v279_v42 = vcombine.high %v4687_v28, %v4689_v29  ;;  %v5048_v60 = vld [vmem:[%s5848_s4 + $0x10] sm:$0xff] }
  0xef   :  { %v230_v1 = vcombine.low %v4126_v59, %v4128_v63  ;;  %v254_v3 = vrot.slane %v246_v61, %v205_v56  ;;  %v231_v20 = vcombine.high %v4126_v59, %v4128_v63  ;;  %v4676_v26 = vrot.slane %v247_v22, %v205_v56  ;;  %v5039_v59 = vld [vmem:[%s5848_s4 + $0x8] sm:$0xff]  ;;  %v5057_v61 = vld [vmem:[%s5848_s4 + $0x18] sm:$0xff]  ;;  %v5084_v0 = vld [vmem:[%s5848_s4 + $0x30] sm:$0xff] }
  0xf0   :  { %v270_v9 = vrot.slane %v262_v4, %v4602_v5  ;;  %v4617_v16 = vrot.slane %v263_v8, %v4602_v5  ;;  %v286_v35 = vrot.slane %v278_v32, %v4602_v5  ;;  %v293_v44 = vrot.slane %v279_v42, %v4602_v5  ;;  %1662 = vperm.xlu1 %4112, %v1422_v53   ;;  %v5075_v63 = vld [vmem:[%s5848_s4 + $0x28] sm:$0xff]  ;;  %v5110_v4 = vpop.permute.xlu1 %354 }
  0xf1   :  { %v238_v2 = vrot.slane %v230_v1, %v205_v56  ;;  %v4670_v25 = vrot.slane %v231_v20, %v205_v56  ;;  %1667 = vperm.xlu0 %4111, %v1423_v52   ;;  %v4979_v56 = vld [vmem:[#allocation3 + $0x8] sm:$0xff]  ;;  %v5093_v1 = vld [vmem:[%s5848_s4 + $0x38] sm:$0xff] }
  0xf3   :  { %v294_v6 = vcombine.low %v238_v2, %v254_v3  ;;  %v295_v7 = vcombine.high %v238_v2, %v254_v3  ;;  %v310_v30 = vcombine.low %v4670_v25, %v4676_v26  ;;  %v311_v41 = vcombine.high %v4670_v25, %v4676_v26  ;;  %v5102_v2 = vld [vmem:[%s5848_s4 + $0x40] sm:$0xff]  ;;  %v5104_v3 = vpop.permute.xlu0 %364 }
  0xf4   :  { %1686 = vperm.xlu1 %4112, %v1424_v54  }
  0xf5   :  { %v302_v10 = vrot.slane %v294_v6, %v4602_v5  ;;  %v4607_v13 = vrot.slane %v295_v7, %v4602_v5  ;;  %v318_v33 = vrot.slane %v310_v30, %v4602_v5  ;;  %v325_v43 = vrot.slane %v311_v41, %v4602_v5 }
  0xf7   :  { %v326_v11 = vcombine.low %v270_v9, %v302_v10  ;;  %v327_v12 = vcombine.high %v270_v9, %v302_v10  ;;  %v329_v17 = vcombine.high %v4617_v16, %v4607_v13  ;;  %v331_v36 = vcombine.high %v286_v35, %v318_v33  ;;  %v5113_v8 = vpop.permute.xlu0 %359 }
  0xf8   :  { %v328_v39 = vcombine.low %v4617_v16, %v4607_v13  ;;  %v330_v40 = vcombine.low %v286_v35, %v318_v33  ;;  %v333_v45 = vcombine.high %v293_v44, %v325_v43  ;;  %v332_v46 = vcombine.low %v293_v44, %v325_v43 }
  0xf9   :  { %3608 = vmatpush3.xpose.msk.msra.mxu1 %vm397_vm3, %v326_v11  ;;  %3637 = vmatpush3.xpose.msk.msra.mxu0 %vm397_vm3, %v327_v12 }
  0xfa   :  { %4103 = vmatprep.subr.mxu1 %v4441_v15  ;;  %3694 = vmatprep.subr.mxu0 %v4441_v15 }
  0xfb   :  { %v5127_v24 = vpop.permute.xlu0 %374 }
  0xfc   :  { %3610 = vmatmul.mubr.msk.f32.vlgmr.msra.gmra.mxu1 %vm397_vm3, %v4614_v14  ;;  %3639 = vmatmul.mubr.msk.f32.vlgmr.msra.gmra.mxu0 %vm397_vm3, %v4614_v14 }
  0xfd   :  { %4104 = vmatpush3.xpose.msk.msra.mxu1 %vm397_vm3, %v327_v12  ;;  %3695 = vmatpush3.xpose.msk.msra.mxu0 %vm397_vm3, %v329_v17  ;;  %v5117_v12 = vpop.permute.xlu1 %379 }
  0xfe   :  { %3612 = vmatprep.mubr.msk.f32.mxu1 %vm4442_vm2, %v4441_v15  ;;  %3641 = vmatprep.mubr.msk.f32.mxu0 %vm4442_vm2, %v4441_v15 }
  0xff   :  { %3752 = vmatprep.subr.mxu0 %v4441_v15  ;;  %3665 = vmatprep.subr.mxu1 %v4441_v15 }
 0x100   :  { %3613 = vmatmul.mubr.msk.f32.gmra.mxu1 %vm397_vm3, %v4632_v18  ;;  %3642 = vmatmul.mubr.msk.f32.gmra.mxu0 %vm397_vm3, %v4632_v18 }
 0x101   :  { %3615 = vmatprep.mubr.msk.f32.mxu1 %vm4442_vm2, %v4441_v15  ;;  %3644 = vmatprep.mubr.msk.f32.mxu0 %vm4442_vm2, %v4441_v15 }
 0x104   :  { %3616 = vmatmul.mubr.msk.f32.gmra.mxu1 %vm397_vm3, %v4651_v19  ;;  %3645 = vmatmul.mubr.msk.f32.gmra.mxu0 %vm397_vm3, %v4651_v19 }
 0x105   :  { %3618 = vmatprep.mubr.msk.f32.mxu1 %vm4442_vm2, %v4441_v15  ;;  %3647 = vmatprep.mubr.msk.f32.mxu0 %vm4442_vm2, %v4441_v15 }
 0x108   :  { %3619 = vmatmul.mubr.msk.f32.gmra.mxu1 %vm397_vm3, %v4666_v23  ;;  %3648 = vmatmul.mubr.msk.f32.gmra.mxu0 %vm397_vm3, %v4666_v23 }
 0x109   :  { %3621 = vmatprep.mubr.msk.f32.mxu1 %vm4442_vm2, %v4441_v15  ;;  %3650 = vmatprep.mubr.msk.f32.mxu0 %vm4442_vm2, %v4441_v15 }
 0x10c   :  { %3622 = vmatmul.mubr.msk.f32.gmra.mxu1 %vm397_vm3, %v4685_v27  ;;  %3651 = vmatmul.mubr.msk.f32.gmra.mxu0 %vm397_vm3, %v4685_v27 }
 0x10d   :  { %3624 = vmatprep.mubr.msk.f32.mxu1 %vm4442_vm2, %v4441_v15  ;;  %3653 = vmatprep.mubr.msk.f32.mxu0 %vm4442_vm2, %v4441_v15 }
 0x110   :  { %3625 = vmatmul.mubr.msk.f32.gmra.mxu1 %vm397_vm3, %v4710_v31  ;;  %3654 = vmatmul.mubr.msk.f32.gmra.mxu0 %vm397_vm3, %v4710_v31 }
 0x111   :  { %3627 = vmatprep.mubr.msk.f32.mxu1 %vm4442_vm2, %v4441_v15  ;;  %3696 = vmatprep.mubr.msk.f32.mxu0 %vm4442_vm2, %v4441_v15 }
 0x114   :  { %3628 = vmatmul.mubr.msk.f32.gmra.mxu1 %vm397_vm3, %v4726_v34  ;;  %3697 = vmatmul.mubr.msk.f32.vlgmr.msra.gmra.mxu0 %vm397_vm3, %v4614_v14 }
 0x115   :  { %3753 = vmatpush3.xpose.msk.msra.mxu0 %vm397_vm3, %v331_v36  ;;  %3630 = vmatprep.mubr.msk.f32.mxu1 %vm4442_vm2, %v4441_v15 }
 0x116   :  { %3699 = vmatprep.mubr.msk.f32.mxu0 %vm4442_vm2, %v4441_v15  ;;  %3810 = vmatprep.subr.mxu0 %v4441_v15 }
 0x118   :  { %3631 = vmatmul.mubr.msk.f32.gmra.mxu1 %vm397_vm3, %v4739_v37  ;;  %3700 = vmatmul.mubr.msk.f32.gmra.mxu0 %vm397_vm3, %v4632_v18 }
 0x119   :  { %3633 = vmatprep.mubr.msk.f32.mxu1 %vm4442_vm2, %v4441_v15  ;;  %3702 = vmatprep.mubr.msk.f32.mxu0 %vm4442_vm2, %v4441_v15 }
 0x11c   :  { %3634 = vmatmul.mubr.msk.f32.gmra.mxu1 %vm397_vm3, %v4755_v38  ;;  %3703 = vmatmul.mubr.msk.f32.gmra.mxu0 %vm397_vm3, %v4651_v19 }
 0x11d   :  { %3656 = vmatprep.mubr.msk.f32.mxu1 %vm4442_vm2, %v4441_v15  ;;  %3705 = vmatprep.mubr.msk.f32.mxu0 %vm4442_vm2, %v4441_v15 }
 0x120   :  { %3657 = vmatmul.mubr.msk.f32.vlgmr.msra.gmra.mxu1 %vm397_vm3, %v4726_v34  ;;  %3706 = vmatmul.mubr.msk.f32.gmra.mxu0 %vm397_vm3, %v4666_v23 }
 0x121   :  { %3666 = vmatpush3.xpose.msk.msra.mxu1 %vm397_vm3, %v328_v39  ;;  %3659 = vmatprep.mubr.msk.f32.mxu1 %vm4442_vm2, %v4441_v15 }
 0x122   :  { %3708 = vmatprep.mubr.msk.f32.mxu0 %vm4442_vm2, %v4441_v15  ;;  %3723 = vmatprep.subr.mxu1 %v4441_v15 }
 0x124   :  { %3660 = vmatmul.mubr.msk.f32.gmra.mxu1 %vm397_vm3, %v4739_v37  ;;  %3709 = vmatmul.mubr.msk.f32.gmra.mxu0 %vm397_vm3, %v4685_v27 }
 0x125   :  { %3662 = vmatprep.mubr.msk.f32.mxu1 %vm4442_vm2, %v4441_v15  ;;  %3711 = vmatprep.mubr.msk.f32.mxu0 %vm4442_vm2, %v4441_v15 }
 0x128   :  { %3663 = vmatmul.mubr.msk.f32.gmra.mxu1 %vm397_vm3, %v4755_v38  ;;  %3712 = vmatmul.mubr.msk.f32.gmra.mxu0 %vm397_vm3, %v4710_v31 }
 0x129   :  { %3667 = vmatprep.mubr.msk.f32.mxu1 %vm4442_vm2, %v4441_v15  ;;  %3714 = vmatprep.mubr.msk.f32.mxu0 %vm4442_vm2, %v4441_v15 }
 0x12c   :  { %3668 = vmatmul.mubr.msk.f32.vlgmr.msra.gmra.mxu1 %vm397_vm3, %v4614_v14  ;;  %3715 = vmatmul.mubr.msk.f32.gmra.mxu0 %vm397_vm3, %v4726_v34 }
 0x12d   :  { %3724 = vmatpush3.xpose.msk.msra.mxu1 %vm397_vm3, %v330_v40  ;;  %3670 = vmatprep.mubr.msk.f32.mxu1 %vm4442_vm2, %v4441_v15 }
 0x12e   :  { %3717 = vmatprep.mubr.msk.f32.mxu0 %vm4442_vm2, %v4441_v15  ;;  %3781 = vmatprep.subr.mxu1 %v4441_v15 }
 0x130   :  { %3671 = vmatmul.mubr.msk.f32.gmra.mxu1 %vm397_vm3, %v4632_v18  ;;  %3718 = vmatmul.mubr.msk.f32.gmra.mxu0 %vm397_vm3, %v4739_v37 }
 0x131   :  { %3673 = vmatprep.mubr.msk.f32.mxu1 %vm4442_vm2, %v4441_v15  ;;  %3720 = vmatprep.mubr.msk.f32.mxu0 %vm4442_vm2, %v4441_v15 }
 0x134   :  { %3674 = vmatmul.mubr.msk.f32.gmra.mxu1 %vm397_vm3, %v4651_v19  ;;  %3721 = vmatmul.mubr.msk.f32.gmra.mxu0 %vm397_vm3, %v4755_v38 }
 0x135   :  { %3676 = vmatprep.mubr.msk.f32.mxu1 %vm4442_vm2, %v4441_v15  ;;  %3754 = vmatprep.mubr.msk.f32.mxu0 %vm4442_vm2, %v4441_v15 }
 0x138   :  { %3677 = vmatmul.mubr.msk.f32.gmra.mxu1 %vm397_vm3, %v4666_v23  ;;  %3755 = vmatmul.mubr.msk.f32.vlgmr.msra.gmra.mxu0 %vm397_vm3, %v4614_v14 }
 0x139   :  { %3811 = vmatpush3.xpose.msk.msra.mxu0 %vm397_vm3, %v333_v45  ;;  %3679 = vmatprep.mubr.msk.f32.mxu1 %vm4442_vm2, %v4441_v15 }
 0x13a   :  { %3757 = vmatprep.mubr.msk.f32.mxu0 %vm4442_vm2, %v4441_v15  ;;  %3872 = vmatprep.subr.mxu0 %v4441_v15 }
 0x13c   :  { %3680 = vmatmul.mubr.msk.f32.gmra.mxu1 %vm397_vm3, %v4685_v27  ;;  %3758 = vmatmul.mubr.msk.f32.gmra.mxu0 %vm397_vm3, %v4632_v18 }
 0x13d   :  { %3682 = vmatprep.mubr.msk.f32.mxu1 %vm4442_vm2, %v4441_v15  ;;  %3760 = vmatprep.mubr.msk.f32.mxu0 %vm4442_vm2, %v4441_v15 }
 0x140   :  { %3683 = vmatmul.mubr.msk.f32.gmra.mxu1 %vm397_vm3, %v4710_v31  ;;  %3761 = vmatmul.mubr.msk.f32.gmra.mxu0 %vm397_vm3, %v4651_v19 }
 0x141   :  { %3685 = vmatprep.mubr.msk.f32.mxu1 %vm4442_vm2, %v4441_v15  ;;  %3763 = vmatprep.mubr.msk.f32.mxu0 %vm4442_vm2, %v4441_v15 }
 0x144   :  { %3686 = vmatmul.mubr.msk.f32.gmra.mxu1 %vm397_vm3, %v4726_v34  ;;  %3764 = vmatmul.mubr.msk.f32.gmra.mxu0 %vm397_vm3, %v4666_v23 }
 0x145   :  { %3688 = vmatprep.mubr.msk.f32.mxu1 %vm4442_vm2, %v4441_v15  ;;  %3766 = vmatprep.mubr.msk.f32.mxu0 %vm4442_vm2, %v4441_v15 }
 0x148   :  { %3689 = vmatmul.mubr.msk.f32.gmra.mxu1 %vm397_vm3, %v4739_v37  ;;  %3767 = vmatmul.mubr.msk.f32.gmra.mxu0 %vm397_vm3, %v4685_v27 }
 0x149   :  { %3691 = vmatprep.mubr.msk.f32.mxu1 %vm4442_vm2, %v4441_v15  ;;  %3769 = vmatprep.mubr.msk.f32.mxu0 %vm4442_vm2, %v4441_v15 }
 0x14c   :  { %3692 = vmatmul.mubr.msk.f32.gmra.mxu1 %vm397_vm3, %v4755_v38  ;;  %3770 = vmatmul.mubr.msk.f32.gmra.mxu0 %vm397_vm3, %v4710_v31 }
 0x14d   :  { %3725 = vmatprep.mubr.msk.f32.mxu1 %vm4442_vm2, %v4441_v15  ;;  %3772 = vmatprep.mubr.msk.f32.mxu0 %vm4442_vm2, %v4441_v15 }
 0x150   :  { %3726 = vmatmul.mubr.msk.f32.vlgmr.msra.gmra.mxu1 %vm397_vm3, %v4614_v14  ;;  %3773 = vmatmul.mubr.msk.f32.gmra.mxu0 %vm397_vm3, %v4726_v34 }
 0x151   :  { %3782 = vmatpush3.xpose.msk.msra.mxu1 %vm397_vm3, %v332_v46  ;;  %3728 = vmatprep.mubr.msk.f32.mxu1 %vm4442_vm2, %v4441_v15 }
 0x152   :  { %3775 = vmatprep.mubr.msk.f32.mxu0 %vm4442_vm2, %v4441_v15  ;;  %3839 = vmatprep.subr.mxu1 %v4441_v15 }
 0x154   :  { %3729 = vmatmul.mubr.msk.f32.gmra.mxu1 %vm397_vm3, %v4632_v18  ;;  %3776 = vmatmul.mubr.msk.f32.gmra.mxu0 %vm397_vm3, %v4739_v37 }
 0x155   :  { %3731 = vmatprep.mubr.msk.f32.mxu1 %vm4442_vm2, %v4441_v15  ;;  %3778 = vmatprep.mubr.msk.f32.mxu0 %vm4442_vm2, %v4441_v15 }
 0x158   :  { %3732 = vmatmul.mubr.msk.f32.gmra.mxu1 %vm397_vm3, %v4651_v19  ;;  %3779 = vmatmul.mubr.msk.f32.gmra.mxu0 %vm397_vm3, %v4755_v38 }
 0x159   :  { %3734 = vmatprep.mubr.msk.f32.mxu1 %vm4442_vm2, %v4441_v15  ;;  %3812 = vmatprep.mubr.msk.f32.mxu0 %vm4442_vm2, %v4441_v15 }
 0x15c   :  { %3735 = vmatmul.mubr.msk.f32.gmra.mxu1 %vm397_vm3, %v4666_v23  ;;  %3813 = vmatmul.mubr.msk.f32.vlgmr.msra.gmra.mxu0 %vm397_vm3, %v4614_v14 }
 0x15d   :  { %3737 = vmatprep.mubr.msk.f32.mxu1 %vm4442_vm2, %v4441_v15  ;;  %3815 = vmatprep.mubr.msk.f32.mxu0 %vm4442_vm2, %v4441_v15 }
 0x160   :  { %3738 = vmatmul.mubr.msk.f32.gmra.mxu1 %vm397_vm3, %v4685_v27  ;;  %3816 = vmatmul.mubr.msk.f32.gmra.mxu0 %vm397_vm3, %v4632_v18 }
 0x161   :  { %3740 = vmatprep.mubr.msk.f32.mxu1 %vm4442_vm2, %v4441_v15  ;;  %3818 = vmatprep.mubr.msk.f32.mxu0 %vm4442_vm2, %v4441_v15 }
 0x164   :  { %3741 = vmatmul.mubr.msk.f32.gmra.mxu1 %vm397_vm3, %v4710_v31  ;;  %3819 = vmatmul.mubr.msk.f32.gmra.mxu0 %vm397_vm3, %v4651_v19 }
 0x165   :  { %3743 = vmatprep.mubr.msk.f32.mxu1 %vm4442_vm2, %v4441_v15  ;;  %3821 = vmatprep.mubr.msk.f32.mxu0 %vm4442_vm2, %v4441_v15 }
 0x168   :  { %3744 = vmatmul.mubr.msk.f32.gmra.mxu1 %vm397_vm3, %v4726_v34  ;;  %3822 = vmatmul.mubr.msk.f32.gmra.mxu0 %vm397_vm3, %v4666_v23 }
 0x169   :  { %3746 = vmatprep.mubr.msk.f32.mxu1 %vm4442_vm2, %v4441_v15  ;;  %3824 = vmatprep.mubr.msk.f32.mxu0 %vm4442_vm2, %v4441_v15 }
 0x16c   :  { %3747 = vmatmul.mubr.msk.f32.gmra.mxu1 %vm397_vm3, %v4739_v37  ;;  %3825 = vmatmul.mubr.msk.f32.gmra.mxu0 %vm397_vm3, %v4685_v27 }
 0x16d   :  { %3749 = vmatprep.mubr.msk.f32.mxu1 %vm4442_vm2, %v4441_v15  ;;  %3827 = vmatprep.mubr.msk.f32.mxu0 %vm4442_vm2, %v4441_v15 }
 0x170   :  { %3750 = vmatmul.mubr.msk.f32.gmra.mxu1 %vm397_vm3, %v4755_v38  ;;  %3828 = vmatmul.mubr.msk.f32.gmra.mxu0 %vm397_vm3, %v4710_v31 }
 0x171   :  { %3783 = vmatprep.mubr.msk.f32.mxu1 %vm4442_vm2, %v4441_v15  ;;  %3830 = vmatprep.mubr.msk.f32.mxu0 %vm4442_vm2, %v4441_v15 }
 0x174   :  { %3784 = vmatmul.mubr.msk.f32.vlgmr.msra.gmra.mxu1 %vm397_vm3, %v4614_v14  ;;  %3831 = vmatmul.mubr.msk.f32.gmra.mxu0 %vm397_vm3, %v4726_v34 }
 0x175   :  { %3786 = vmatprep.mubr.msk.f32.mxu1 %vm4442_vm2, %v4441_v15  ;;  %3833 = vmatprep.mubr.msk.f32.mxu0 %vm4442_vm2, %v4441_v15 }
 0x176   :  { %3840 = vmatpush3.msra.mxu1 %v4967_v55 }
 0x177   :  { %3841 = vmatprep.subr.mxu1 %v4441_v15 }
 0x178   :  { %3787 = vmatmul.mubr.msk.f32.gmra.mxu1 %vm397_vm3, %v4632_v18  ;;  %3834 = vmatmul.mubr.msk.f32.gmra.mxu0 %vm397_vm3, %v4739_v37 }
 0x179   :  { %3789 = vmatprep.mubr.msk.f32.mxu1 %vm4442_vm2, %v4441_v15  ;;  %3836 = vmatprep.mubr.msk.f32.mxu0 %vm4442_vm2, %v4441_v15 }
 0x17a   :  { %3842 = vmatpush3.msra.mxu1 %v4979_v56 }
 0x17b   :  { %3843 = vmatprep.subr.mxu1 %v4441_v15 }
 0x17c   :  { %3790 = vmatmul.mubr.msk.f32.gmra.mxu1 %vm397_vm3, %v4651_v19  ;;  %3837 = vmatmul.mubr.msk.f32.gmra.mxu0 %vm397_vm3, %v4755_v38 }
 0x17d   :  { %3792 = vmatprep.mubr.msk.f32.mxu1 %vm4442_vm2, %v4441_v15  ;;  %3844 = vmatpush3.msra.mxu1 %v4990_v57 }
 0x17e   :  { %3878 = vmatprep.mubr.msk.f32.mxu0 %vm4442_vm2, %v4441_v15  ;;  %3905 = vmatprep.subr.mxu1 %v4441_v15 }
 0x180   :  { %3793 = vmatmul.mubr.msk.f32.gmra.mxu1 %vm397_vm3, %v4666_v23  ;;  %v5125_v23 = vpop.permute.xlu1 %369 }
 0x181   :  { %3795 = vmatprep.mubr.msk.f32.mxu1 %vm4442_vm2, %v4441_v15 }
 0x184   :  { %3796 = vmatmul.mubr.msk.f32.gmra.mxu1 %vm397_vm3, %v4685_v27  ;;  %v5149_v52 = vpop.permute.xlu1 %389 }
 0x185   :  { %3798 = vmatprep.mubr.msk.f32.mxu1 %vm4442_vm2, %v4441_v15 }
 0x188   :  { %3799 = vmatmul.mubr.msk.f32.gmra.mxu1 %vm397_vm3, %v4710_v31 }
 0x189   :  { %3801 = vmatprep.mubr.msk.f32.mxu1 %vm4442_vm2, %v4441_v15 }
 0x18c   :  { %3802 = vmatmul.mubr.msk.f32.gmra.mxu1 %vm397_vm3, %v4726_v34  ;;  %v5135_v34 = vpop.permute.xlu0 %394 }
 0x18d   :  { %3804 = vmatprep.mubr.msk.f32.mxu1 %vm4442_vm2, %v4441_v15 }
 0x190   :  { %3805 = vmatmul.mubr.msk.f32.gmra.mxu1 %vm397_vm3, %v4739_v37  ;;  %v5143_v44 = vpop.permute.xlu0 %384 }
 0x191   :  { %3807 = vmatprep.mubr.msk.f32.mxu1 %vm4442_vm2, %v4441_v15 }
 0x194   :  { %3808 = vmatmul.mubr.msk.f32.gmra.mxu1 %vm397_vm3, %v4755_v38 }
 0x195   :  { %3845 = vmatprep.mubr.msk.f32.mxu1 %vm4442_vm2, %v4441_v15 }
 0x198   :  { %3846 = vmatmul.mubr.msk.f32.vlgmr.msra.gmra.mxu1 %vm397_vm3, %v5030_v58 }
 0x199   :  { %3848 = vmatprep.mubr.msk.f32.mxu1 %vm4442_vm2, %v4441_v15 }
 0x19c   :  { %3849 = vmatmul.mubr.msk.f32.gmra.mxu1 %vm397_vm3, %v5039_v59 }
 0x19d   :  { %3851 = vmatprep.mubr.msk.f32.mxu1 %vm4442_vm2, %v4441_v15 }
 0x1a0   :  { %3852 = vmatmul.mubr.msk.f32.gmra.mxu1 %vm397_vm3, %v5048_v60 }
 0x1a1   :  { %3854 = vmatprep.mubr.msk.f32.mxu1 %vm4442_vm2, %v4441_v15 }
 0x1a4   :  { %3855 = vmatmul.mubr.msk.f32.gmra.mxu1 %vm397_vm3, %v5057_v61 }
 0x1a5   :  { %3857 = vmatprep.mubr.msk.f32.mxu1 %vm4442_vm2, %v4441_v15 }
 0x1a8   :  { %3858 = vmatmul.mubr.msk.f32.gmra.mxu1 %vm397_vm3, %v5066_v62 }
 0x1a9   :  { %3860 = vmatprep.mubr.msk.f32.mxu1 %vm4442_vm2, %v4441_v15 }
 0x1ac   :  { %3861 = vmatmul.mubr.msk.f32.gmra.mxu1 %vm397_vm3, %v5075_v63 }
 0x1ad   :  { %3863 = vmatprep.mubr.msk.f32.mxu1 %vm4442_vm2, %v4441_v15 }
 0x1b0   :  { %3864 = vmatmul.mubr.msk.f32.gmra.mxu1 %vm397_vm3, %v5084_v0 }
 0x1b1   :  { %3866 = vmatprep.mubr.msk.f32.mxu1 %vm4442_vm2, %v4441_v15 }
 0x1b4   :  { %3867 = vmatmul.mubr.msk.f32.gmra.mxu1 %vm397_vm3, %v5093_v1 }
 0x1b5   :  { %3869 = vmatprep.mubr.msk.f32.mxu1 %vm4442_vm2, %v4441_v15 }
 0x1b8   :  { %3870 = vmatmul.mubr.msk.f32.gmra.mxu1 %vm397_vm3, %v5102_v2 }
 0x1b9   :  { %3911 = vmatprep.mubr.msk.f32.mxu1 %vm4442_vm2, %v4441_v15 }
 0x1bc   :  { %v494_v5 = vpop.f32.mrf.mxu1  ;;  %v607_v6 = vpop.f32.mrf.mxu0 }
 0x1bd   :  { %v495_v7 = vadd.f32 %v494_v5, %v5110_v4  ;;  %v608_v9 = vadd.f32 %v607_v6, %v5110_v4 }
 0x1be   :  { %v3611_v10 = vpop.f32.mrf.mxu1  ;;  %v3640_v11 = vpop.f32.mrf.mxu0 }
 0x1bf   :  { %1330 = vst.msk [vmem:[#allocation2] sm:$0xff] %vm1329_vm4, %v495_v7  ;;  %1339 = vst.msk [vmem:[#allocation2 + $0x48] sm:$0xff] %vm1329_vm4, %v608_v9 }
 0x1c0   :  { %v499_v13 = vpop.f32.mrf.mxu1  ;;  %v612_v14 = vpop.f32.mrf.mxu0 }
 0x1c1   :  { %v500_v16 = vadd.f32 %v499_v13, %v5113_v8  ;;  %v613_v17 = vadd.f32 %v612_v14, %v5113_v8 }
 0x1c2   :  { %v3614_v18 = vpop.f32.mrf.mxu1  ;;  %v3643_v19 = vpop.f32.mrf.mxu0 }
 0x1c3   :  { %1331 = vst.msk [vmem:[#allocation2 + $0x8] sm:$0xff] %vm1329_vm4, %v500_v16  ;;  %1340 = vst.msk [vmem:[#allocation2 + $0x50] sm:$0xff] %vm1329_vm4, %v613_v17 }
 0x1c4   :  { %v504_v20 = vpop.f32.mrf.mxu1  ;;  %v617_v21 = vpop.f32.mrf.mxu0 }
 0x1c5   :  { %v505_v22 = vadd.f32 %v504_v20, %v5104_v3  ;;  %v618_v25 = vadd.f32 %v617_v21, %v5104_v3 }
 0x1c6   :  { %v3617_v26 = vpop.f32.mrf.mxu1  ;;  %v3646_v27 = vpop.f32.mrf.mxu0 }
 0x1c7   :  { %1332 = vst.msk [vmem:[#allocation2 + $0x10] sm:$0xff] %vm1329_vm4, %v505_v22  ;;  %1341 = vst.msk [vmem:[#allocation2 + $0x58] sm:$0xff] %vm1329_vm4, %v618_v25 }
 0x1c8   :  { %v509_v28 = vpop.f32.mrf.mxu1  ;;  %v622_v29 = vpop.f32.mrf.mxu0 }
 0x1c9   :  { %v510_v30 = vadd.f32 %v509_v28, %v5125_v23  ;;  %v623_v31 = vadd.f32 %v622_v29, %v5125_v23 }
 0x1ca   :  { %v3620_v32 = vpop.f32.mrf.mxu1  ;;  %v3649_v33 = vpop.f32.mrf.mxu0 }
 0x1cb   :  { %1333 = vst.msk [vmem:[#allocation2 + $0x18] sm:$0xff] %vm1329_vm4, %v510_v30  ;;  %1342 = vst.msk [vmem:[#allocation2 + $0x60] sm:$0xff] %vm1329_vm4, %v623_v31 }
 0x1cc   :  { %v514_v35 = vpop.f32.mrf.mxu1  ;;  %v627_v36 = vpop.f32.mrf.mxu0 }
 0x1cd   :  { %v515_v37 = vadd.f32 %v514_v35, %v5127_v24  ;;  %v628_v38 = vadd.f32 %v627_v36, %v5127_v24 }
 0x1ce   :  { %v3623_v39 = vpop.f32.mrf.mxu1  ;;  %v3652_v40 = vpop.f32.mrf.mxu0 }
 0x1cf   :  { %1334 = vst.msk [vmem:[#allocation2 + $0x20] sm:$0xff] %vm1329_vm4, %v515_v37  ;;  %1343 = vst.msk [vmem:[#allocation2 + $0x68] sm:$0xff] %vm1329_vm4, %v628_v38 }
 0x1d0   :  { %v519_v41 = vpop.f32.mrf.mxu1  ;;  %v632_v42 = vpop.f32.mrf.mxu0 }
 0x1d1   :  { %v520_v43 = vadd.f32 %v519_v41, %v5117_v12  ;;  %v633_v45 = vadd.f32 %v632_v42, %v5117_v12 }
 0x1d2   :  { %v3626_v46 = vpop.f32.mrf.mxu1  ;;  %v3655_v47 = vpop.f32.mrf.mxu0 }
 0x1d3   :  { %1335 = vst.msk [vmem:[#allocation2 + $0x28] sm:$0xff] %vm1329_vm4, %v520_v43  ;;  %1344 = vst.msk [vmem:[#allocation2 + $0x70] sm:$0xff] %vm1329_vm4, %v633_v45 }
 0x1d4   :  { %v524_v48 = vpop.f32.mrf.mxu1  ;;  %v833_v50 = vpop.f32.mrf.mxu0 }
 0x1d5   :  { %v525_v51 = vadd.f32 %v524_v48, %v5143_v44  ;;  %v834_v53 = vadd.f32 %v833_v50, %v5110_v4 }
 0x1d6   :  { %v3629_v54 = vpop.f32.mrf.mxu1  ;;  %v3698_v5 = vpop.f32.mrf.mxu0 }
 0x1d7   :  { %1336 = vst.msk [vmem:[#allocation2 + $0x30] sm:$0xff] %vm1329_vm4, %v525_v51  ;;  %1357 = vst.msk [vmem:[#allocation2 + $0xd8] sm:$0xff] %vm1329_vm4, %v834_v53 }
 0x1d8   :  { %v529_v6 = vpop.f32.mrf.mxu1  ;;  %v838_v7 = vpop.f32.mrf.mxu0 }
 0x1d9   :  { %v530_v9 = vadd.f32 %v529_v6, %v5149_v52  ;;  %v839_v10 = vadd.f32 %v838_v7, %v5113_v8 }
 0x1da   :  { %v3632_v11 = vpop.f32.mrf.mxu1  ;;  %v3701_v13 = vpop.f32.mrf.mxu0 }
 0x1db   :  { %1337 = vst.msk [vmem:[#allocation2 + $0x38] sm:$0xff] %vm1329_vm4, %v530_v9  ;;  %1358 = vst.msk [vmem:[#allocation2 + $0xe0] sm:$0xff] %vm1329_vm4, %v839_v10 }
 0x1dc   :  { %v534_v14 = vpop.f32.mrf.mxu1  ;;  %v843_v16 = vpop.f32.mrf.mxu0 }
 0x1dd   :  { %v535_v17 = vadd.f32 %v534_v14, %v5135_v34  ;;  %v844_v18 = vadd.f32 %v843_v16, %v5104_v3 }
 0x1de   :  { %v3635_v19 = vpop.f32.mrf.mxu1  ;;  %v3704_v20 = vpop.f32.mrf.mxu0 }
 0x1df   :  { %1338 = vst.msk [vmem:[#allocation2 + $0x40] sm:$0xff] %vm1329_vm4, %v535_v17  ;;  %1359 = vst.msk [vmem:[#allocation2 + $0xe8] sm:$0xff] %vm1329_vm4, %v844_v18 }
 0x1e0   :  { %v637_v21 = vpop.f32.mrf.mxu1  ;;  %v848_v22 = vpop.f32.mrf.mxu0 }
 0x1e1   :  { %v638_v25 = vadd.f32 %v637_v21, %v5143_v44  ;;  %v849_v26 = vadd.f32 %v848_v22, %v5125_v23 }
 0x1e2   :  { %v3658_v27 = vpop.f32.mrf.mxu1  ;;  %v3707_v28 = vpop.f32.mrf.mxu0 }
 0x1e3   :  { %1345 = vst.msk [vmem:[#allocation2 + $0x78] sm:$0xff] %vm1329_vm4, %v638_v25  ;;  %1360 = vst.msk [vmem:[#allocation2 + $0xf0] sm:$0xff] %vm1329_vm4, %v849_v26 }
 0x1e4   :  { %v642_v29 = vpop.f32.mrf.mxu1  ;;  %v853_v30 = vpop.f32.mrf.mxu0 }
 0x1e5   :  { %v643_v31 = vadd.f32 %v642_v29, %v5149_v52  ;;  %v854_v32 = vadd.f32 %v853_v30, %v5127_v24 }
 0x1e6   :  { %v3661_v33 = vpop.f32.mrf.mxu1  ;;  %v3710_v35 = vpop.f32.mrf.mxu0 }
 0x1e7   :  { %1346 = vst.msk [vmem:[#allocation2 + $0x80] sm:$0xff] %vm1329_vm4, %v643_v31  ;;  %1361 = vst.msk [vmem:[#allocation2 + $0xf8] sm:$0xff] %vm1329_vm4, %v854_v32 }
 0x1e8   :  { %v647_v36 = vpop.f32.mrf.mxu1  ;;  %v858_v37 = vpop.f32.mrf.mxu0 }
 0x1e9   :  { %v648_v38 = vadd.f32 %v647_v36, %v5135_v34  ;;  %v859_v39 = vadd.f32 %v858_v37, %v5117_v12 }
 0x1ea   :  { %v3664_v40 = vpop.f32.mrf.mxu1  ;;  %v3713_v41 = vpop.f32.mrf.mxu0 }
 0x1eb   :  { %1347 = vst.msk [vmem:[#allocation2 + $0x88] sm:$0xff] %vm1329_vm4, %v648_v38  ;;  %1362 = vst.msk [vmem:[#allocation2 + $0x100] sm:$0xff] %vm1329_vm4, %v859_v39 }
 0x1ec   :  { %v720_v42 = vpop.f32.mrf.mxu1  ;;  %v863_v43 = vpop.f32.mrf.mxu0 }
 0x1ed   :  { %v721_v45 = vadd.f32 %v720_v42, %v5110_v4  ;;  %v864_v46 = vadd.f32 %v863_v43, %v5143_v44 }
 0x1ee   :  { %v3669_v47 = vpop.f32.mrf.mxu1  ;;  %v3716_v48 = vpop.f32.mrf.mxu0 }
 0x1ef   :  { %1348 = vst.msk [vmem:[#allocation2 + $0x90] sm:$0xff] %vm1329_vm4, %v721_v45  ;;  %1363 = vst.msk [vmem:[#allocation2 + $0x108] sm:$0xff] %vm1329_vm4, %v864_v46 }
 0x1f0   :  { %v725_v50 = vpop.f32.mrf.mxu1  ;;  %v868_v51 = vpop.f32.mrf.mxu0 }
 0x1f1   :  { %v726_v53 = vadd.f32 %v725_v50, %v5113_v8  ;;  %v869_v54 = vadd.f32 %v868_v51, %v5149_v52 }
 0x1f2   :  { %v3672_v5 = vpop.f32.mrf.mxu1  ;;  %v3719_v6 = vpop.f32.mrf.mxu0 }
 0x1f3   :  { %1349 = vst.msk [vmem:[#allocation2 + $0x98] sm:$0xff] %vm1329_vm4, %v726_v53  ;;  %1364 = vst.msk [vmem:[#allocation2 + $0x110] sm:$0xff] %vm1329_vm4, %v869_v54 }
 0x1f4   :  { %v730_v7 = vpop.f32.mrf.mxu1  ;;  %v873_v9 = vpop.f32.mrf.mxu0 }
 0x1f5   :  { %v731_v10 = vadd.f32 %v730_v7, %v5104_v3  ;;  %v874_v11 = vadd.f32 %v873_v9, %v5135_v34 }
 0x1f6   :  { %v3675_v13 = vpop.f32.mrf.mxu1  ;;  %v3722_v14 = vpop.f32.mrf.mxu0 }
 0x1f7   :  { %1350 = vst.msk [vmem:[#allocation2 + $0xa0] sm:$0xff] %vm1329_vm4, %v731_v10  ;;  %1365 = vst.msk [vmem:[#allocation2 + $0x118] sm:$0xff] %vm1329_vm4, %v874_v11 }
 0x1f8   :  { %v735_v16 = vpop.f32.mrf.mxu1  ;;  %v1059_v17 = vpop.f32.mrf.mxu0 }
 0x1f9   :  { %v736_v18 = vadd.f32 %v735_v16, %v5125_v23  ;;  %v1060_v19 = vadd.f32 %v1059_v17, %v5110_v4 }
 0x1fa   :  { %v3678_v20 = vpop.f32.mrf.mxu1  ;;  %v3756_v21 = vpop.f32.mrf.mxu0 }
 0x1fb   :  { %1351 = vst.msk [vmem:[#allocation2 + $0xa8] sm:$0xff] %vm1329_vm4, %v736_v18  ;;  %1375 = vst.msk [vmem:[#allocation2 + $0x168] sm:$0xff] %vm1329_vm4, %v1060_v19 }
 0x1fc   :  { %v740_v22 = vpop.f32.mrf.mxu1  ;;  %v1064_v25 = vpop.f32.mrf.mxu0 }
 0x1fd   :  { %v741_v26 = vadd.f32 %v740_v22, %v5127_v24  ;;  %v1065_v27 = vadd.f32 %v1064_v25, %v5113_v8 }
 0x1fe   :  { %v3681_v28 = vpop.f32.mrf.mxu1  ;;  %v3759_v29 = vpop.f32.mrf.mxu0 }
 0x1ff   :  { %1352 = vst.msk [vmem:[#allocation2 + $0xb0] sm:$0xff] %vm1329_vm4, %v741_v26  ;;  %1376 = vst.msk [vmem:[#allocation2 + $0x170] sm:$0xff] %vm1329_vm4, %v1065_v27 }
 0x200   :  { %v745_v30 = vpop.f32.mrf.mxu1  ;;  %v1069_v31 = vpop.f32.mrf.mxu0 }
 0x201   :  { %v746_v32 = vadd.f32 %v745_v30, %v5117_v12  ;;  %v1070_v33 = vadd.f32 %v1069_v31, %v5104_v3 }
 0x202   :  { %v3684_v35 = vpop.f32.mrf.mxu1  ;;  %v3762_v36 = vpop.f32.mrf.mxu0 }
 0x203   :  { %1353 = vst.msk [vmem:[#allocation2 + $0xb8] sm:$0xff] %vm1329_vm4, %v746_v32  ;;  %1377 = vst.msk [vmem:[#allocation2 + $0x178] sm:$0xff] %vm1329_vm4, %v1070_v33 }
 0x204   :  { %v750_v37 = vpop.f32.mrf.mxu1  ;;  %v1074_v38 = vpop.f32.mrf.mxu0 }
 0x205   :  { %v751_v39 = vadd.f32 %v750_v37, %v5143_v44  ;;  %v1075_v40 = vadd.f32 %v1074_v38, %v5125_v23 }
 0x206   :  { %v3687_v41 = vpop.f32.mrf.mxu1  ;;  %v3765_v42 = vpop.f32.mrf.mxu0 }
 0x207   :  { %1354 = vst.msk [vmem:[#allocation2 + $0xc0] sm:$0xff] %vm1329_vm4, %v751_v39  ;;  %1378 = vst.msk [vmem:[#allocation2 + $0x180] sm:$0xff] %vm1329_vm4, %v1075_v40 }
 0x208   :  { %v755_v43 = vpop.f32.mrf.mxu1  ;;  %v1079_v45 = vpop.f32.mrf.mxu0 }
 0x209   :  { %v756_v46 = vadd.f32 %v755_v43, %v5149_v52  ;;  %v1080_v47 = vadd.f32 %v1079_v45, %v5127_v24 }
 0x20a   :  { %v3690_v48 = vpop.f32.mrf.mxu1  ;;  %v3768_v50 = vpop.f32.mrf.mxu0 }
 0x20b   :  { %1355 = vst.msk [vmem:[#allocation2 + $0xc8] sm:$0xff] %vm1329_vm4, %v756_v46  ;;  %1379 = vst.msk [vmem:[#allocation2 + $0x188] sm:$0xff] %vm1329_vm4, %v1080_v47 }
 0x20c   :  { %v760_v51 = vpop.f32.mrf.mxu1  ;;  %v1084_v53 = vpop.f32.mrf.mxu0 }
 0x20d   :  { %v761_v54 = vadd.f32 %v760_v51, %v5135_v34  ;;  %v1085_v5 = vadd.f32 %v1084_v53, %v5117_v12 }
 0x20e   :  { %v3693_v6 = vpop.f32.mrf.mxu1  ;;  %v3771_v7 = vpop.f32.mrf.mxu0 }
 0x20f   :  { %1356 = vst.msk [vmem:[#allocation2 + $0xd0] sm:$0xff] %vm1329_vm4, %v761_v54  ;;  %1380 = vst.msk [vmem:[#allocation2 + $0x190] sm:$0xff] %vm1329_vm4, %v1085_v5 }
 0x210   :  { %v946_v9 = vpop.f32.mrf.mxu1  ;;  %v1089_v10 = vpop.f32.mrf.mxu0 }
 0x211   :  { %v947_v11 = vadd.f32 %v946_v9, %v5110_v4  ;;  %v1090_v13 = vadd.f32 %v1089_v10, %v5143_v44 }
 0x212   :  { %v3727_v14 = vpop.f32.mrf.mxu1  ;;  %v3774_v16 = vpop.f32.mrf.mxu0 }
 0x213   :  { %1366 = vst.msk [vmem:[#allocation2 + $0x120] sm:$0xff] %vm1329_vm4, %v947_v11  ;;  %1381 = vst.msk [vmem:[#allocation2 + $0x198] sm:$0xff] %vm1329_vm4, %v1090_v13 }
 0x214   :  { %v951_v17 = vpop.f32.mrf.mxu1  ;;  %v1094_v18 = vpop.f32.mrf.mxu0 }
 0x215   :  { %v952_v19 = vadd.f32 %v951_v17, %v5113_v8  ;;  %v1095_v20 = vadd.f32 %v1094_v18, %v5149_v52 }
 0x216   :  { %v3730_v21 = vpop.f32.mrf.mxu1  ;;  %v3777_v22 = vpop.f32.mrf.mxu0 }
 0x217   :  { %1367 = vst.msk [vmem:[#allocation2 + $0x128] sm:$0xff] %vm1329_vm4, %v952_v19  ;;  %1382 = vst.msk [vmem:[#allocation2 + $0x1a0] sm:$0xff] %vm1329_vm4, %v1095_v20 }
 0x218   :  { %v956_v25 = vpop.f32.mrf.mxu1  ;;  %v1099_v26 = vpop.f32.mrf.mxu0 }
 0x219   :  { %v957_v27 = vadd.f32 %v956_v25, %v5104_v3  ;;  %v1100_v28 = vadd.f32 %v1099_v26, %v5135_v34 }
 0x21a   :  { %v3733_v29 = vpop.f32.mrf.mxu1  ;;  %v3780_v30 = vpop.f32.mrf.mxu0 }
 0x21b   :  { %1368 = vst.msk [vmem:[#allocation2 + $0x130] sm:$0xff] %vm1329_vm4, %v957_v27  ;;  %1383 = vst.msk [vmem:[#allocation2 + $0x1a8] sm:$0xff] %vm1329_vm4, %v1100_v28 }
 0x21c   :  { %v961_v31 = vpop.f32.mrf.mxu1  ;;  %v1285_v32 = vpop.f32.mrf.mxu0 }
 0x21d   :  { %v962_v33 = vadd.f32 %v961_v31, %v5125_v23  ;;  %v1286_v35 = vadd.f32 %v1285_v32, %v5110_v4 }
 0x21e   :  { %v3736_v36 = vpop.f32.mrf.mxu1  ;;  %v3814_v37 = vpop.f32.mrf.mxu0 }
 0x21f   :  { %1369 = vst.msk [vmem:[#allocation2 + $0x138] sm:$0xff] %vm1329_vm4, %v962_v33  ;;  %1393 = vst.msk [vmem:[#allocation2 + $0x1f8] sm:$0xff] %vm1329_vm4, %v1286_v35 }
 0x220   :  { %v966_v38 = vpop.f32.mrf.mxu1  ;;  %v1290_v39 = vpop.f32.mrf.mxu0 }
 0x221   :  { %v967_v40 = vadd.f32 %v966_v38, %v5127_v24  ;;  %v1291_v41 = vadd.f32 %v1290_v39, %v5113_v8 }
 0x222   :  { %v3739_v42 = vpop.f32.mrf.mxu1  ;;  %v3817_v43 = vpop.f32.mrf.mxu0 }
 0x223   :  { %1370 = vst.msk [vmem:[#allocation2 + $0x140] sm:$0xff] %vm1329_vm4, %v967_v40  ;;  %1394 = vst.msk [vmem:[#allocation2 + $0x200] sm:$0xff] %vm1329_vm4, %v1291_v41 }
 0x224   :  { %v971_v45 = vpop.f32.mrf.mxu1  ;;  %v1295_v46 = vpop.f32.mrf.mxu0 }
 0x225   :  { %v972_v47 = vadd.f32 %v971_v45, %v5117_v12  ;;  %v1296_v48 = vadd.f32 %v1295_v46, %v5104_v3 }
 0x226   :  { %v3742_v50 = vpop.f32.mrf.mxu1  ;;  %v3820_v51 = vpop.f32.mrf.mxu0 }
 0x227   :  { %1371 = vst.msk [vmem:[#allocation2 + $0x148] sm:$0xff] %vm1329_vm4, %v972_v47  ;;  %1395 = vst.msk [vmem:[#allocation2 + $0x208] sm:$0xff] %vm1329_vm4, %v1296_v48 }
 0x228   :  { %v976_v53 = vpop.f32.mrf.mxu1  ;;  %v1300_v54 = vpop.f32.mrf.mxu0 }
 0x229   :  { %v977_v5 = vadd.f32 %v976_v53, %v5143_v44  ;;  %v1301_v6 = vadd.f32 %v1300_v54, %v5125_v23 }
 0x22a   :  { %v3745_v7 = vpop.f32.mrf.mxu1  ;;  %v3823_v9 = vpop.f32.mrf.mxu0 }
 0x22b   :  { %1372 = vst.msk [vmem:[#allocation2 + $0x150] sm:$0xff] %vm1329_vm4, %v977_v5  ;;  %1396 = vst.msk [vmem:[#allocation2 + $0x210] sm:$0xff] %vm1329_vm4, %v1301_v6 }
 0x22c   :  { %v981_v10 = vpop.f32.mrf.mxu1  ;;  %v1305_v11 = vpop.f32.mrf.mxu0 }
 0x22d   :  { %v982_v13 = vadd.f32 %v981_v10, %v5149_v52  ;;  %v1306_v14 = vadd.f32 %v1305_v11, %v5127_v24 }
 0x22e   :  { %v3748_v16 = vpop.f32.mrf.mxu1  ;;  %v3826_v17 = vpop.f32.mrf.mxu0 }
 0x22f   :  { %1373 = vst.msk [vmem:[#allocation2 + $0x158] sm:$0xff] %vm1329_vm4, %v982_v13  ;;  %1397 = vst.msk [vmem:[#allocation2 + $0x218] sm:$0xff] %vm1329_vm4, %v1306_v14  ;;  %v1565_v13 = vld [vmem:[#allocation2] sm:$0xff] }
 0x230   :  { %v986_v18 = vpop.f32.mrf.mxu1  ;;  %v1310_v19 = vpop.f32.mrf.mxu0 }
 0x231   :  { %v987_v20 = vadd.f32 %v986_v18, %v5135_v34  ;;  %v1311_v21 = vadd.f32 %v1310_v19, %v5117_v12  ;;  %v1566_v18 = vld [vmem:[#allocation2 + $0x8] sm:$0xff] }
 0x232   :  { %v3751_v22 = vpop.f32.mrf.mxu1  ;;  %v3829_v25 = vpop.f32.mrf.mxu0 }
 0x233   :  { %1374 = vst.msk [vmem:[#allocation2 + $0x160] sm:$0xff] %vm1329_vm4, %v987_v20  ;;  %1398 = vst.msk [vmem:[#allocation2 + $0x220] sm:$0xff] %vm1329_vm4, %v1311_v21  ;;  %v1567_v22 = vld [vmem:[#allocation2 + $0x10] sm:$0xff] }
 0x234   :  { %v1172_v26 = vpop.f32.mrf.mxu1  ;;  %v1315_v27 = vpop.f32.mrf.mxu0 }
 0x235   :  { %v1173_v28 = vadd.f32 %v1172_v26, %v5110_v4  ;;  %v1316_v29 = vadd.f32 %v1315_v27, %v5143_v44 }
 0x236   :  { %v3785_v30 = vpop.f32.mrf.mxu1  ;;  %v3832_v31 = vpop.f32.mrf.mxu0 }
 0x237   :  { %1384 = vst.msk [vmem:[#allocation2 + $0x1b0] sm:$0xff] %vm1329_vm4, %v1173_v28  ;;  %1399 = vst.msk [vmem:[#allocation2 + $0x228] sm:$0xff] %vm1329_vm4, %v1316_v29  ;;  %v1568_v28 = vld [vmem:[#allocation2 + $0x18] sm:$0xff] }
 0x238   :  { %v1177_v32 = vpop.f32.mrf.mxu1  ;;  %v1320_v33 = vpop.f32.mrf.mxu0 }
 0x239   :  { %v1178_v35 = vadd.f32 %v1177_v32, %v5113_v8  ;;  %v1321_v36 = vadd.f32 %v1320_v33, %v5149_v52  ;;  %v1569_v33 = vld [vmem:[#allocation2 + $0x20] sm:$0xff] }
 0x23a   :  { %v3788_v37 = vpop.f32.mrf.mxu1  ;;  %v3835_v38 = vpop.f32.mrf.mxu0 }
 0x23b   :  { %1385 = vst.msk [vmem:[#allocation2 + $0x1b8] sm:$0xff] %vm1329_vm4, %v1178_v35  ;;  %1400 = vst.msk [vmem:[#allocation2 + $0x230] sm:$0xff] %vm1329_vm4, %v1321_v36 }
 0x23c   :  { %v1182_v4 = vpop.f32.mrf.mxu1  ;;  %v1325_v39 = vpop.f32.mrf.mxu0 }
 0x23d   :  { %v1183_v40 = vadd.f32 %v1182_v4, %v5104_v3  ;;  %v1326_v41 = vadd.f32 %v1325_v39, %v5135_v34 }
 0x23e   :  { %v3791_v42 = vpop.f32.mrf.mxu1  ;;  %v3838_v43 = vpop.f32.mrf.mxu0 }
 0x23f   :  { %1386 = vst.msk [vmem:[#allocation2 + $0x1c0] sm:$0xff] %vm1329_vm4, %v1183_v40  ;;  %1401 = vst.msk [vmem:[#allocation2 + $0x238] sm:$0xff] %vm1329_vm4, %v1326_v41  ;;  %v1570_v40 = vld [vmem:[#allocation2 + $0x28] sm:$0xff] }
 0x240   :  { %v1187_v8 = vpop.f32.mrf.mxu1 }
 0x241   :  { %v1188_v45 = vadd.f32 %v1187_v8, %v5125_v23 }
 0x242   :  { %v3794_v46 = vpop.f32.mrf.mxu1 }
 0x243   :  { %1387 = vst.msk [vmem:[#allocation2 + $0x1c8] sm:$0xff] %vm1329_vm4, %v1188_v45 }
 0x244   :  { %v1192_v47 = vpop.f32.mrf.mxu1 }
 0x245   :  { %v1193_v48 = vadd.f32 %v1192_v47, %v5127_v24 }
 0x246   :  { %v3797_v50 = vpop.f32.mrf.mxu1 }
 0x247   :  { %1388 = vst.msk [vmem:[#allocation2 + $0x1d0] sm:$0xff] %vm1329_vm4, %v1193_v48  ;;  %v5270_v48 = vpop.permute.xlu1 %1628 }
 0x248   :  { %v1197_v3 = vpop.f32.mrf.mxu1 }
 0x249   :  { %v1198_v51 = vadd.f32 %v1197_v3, %v5117_v12 }
 0x24a   :  { %v3800_v53 = vpop.f32.mrf.mxu1 }
 0x24b   :  { %1389 = vst.msk [vmem:[#allocation2 + $0x1d8] sm:$0xff] %vm1329_vm4, %v1198_v51 }
 0x24c   :  { %v1202_v54 = vpop.f32.mrf.mxu1 }
 0x24d   :  { %v1203_v5 = vadd.f32 %v1202_v54, %v5143_v44 }
 0x24e   :  { %v3803_v6 = vpop.f32.mrf.mxu1 }
 0x24f   :  { %1390 = vst.msk [vmem:[#allocation2 + $0x1e0] sm:$0xff] %vm1329_vm4, %v1203_v5  ;;  %v5272_v6 = vpop.permute.xlu1 %1618 }
 0x250   :  { %v1207_v23 = vpop.f32.mrf.mxu1 }
 0x251   :  { %v1208_v7 = vadd.f32 %v1207_v23, %v5149_v52 }
 0x252   :  { %v3806_v9 = vpop.f32.mrf.mxu1 }
 0x253   :  { %1391 = vst.msk [vmem:[#allocation2 + $0x1e8] sm:$0xff] %vm1329_vm4, %v1208_v7 }
 0x254   :  { %v1212_v24 = vpop.f32.mrf.mxu1 }
 0x255   :  { %v1213_v10 = vadd.f32 %v1212_v24, %v5135_v34 }
 0x256   :  { %v3809_v11 = vpop.f32.mrf.mxu1 }
 0x257   :  { %1392 = vst.msk [vmem:[#allocation2 + $0x1f0] sm:$0xff] %vm1329_vm4, %v1213_v10 }
 0x258   :  { %v1521_v12 = vpop.f32.mrf.mxu1 }
 0x259   :  { %v1574_v14 = vadd.f32 %v1565_v13, %v1521_v12  ;;  %v5275_v12 = vpop.permute.xlu0 %1623 }
 0x25a   :  { %v3847_v16 = vpop.f32.mrf.mxu1 }
 0x25b   :  { %v3274_v44 = vmul.f32 -1.442695, %v1574_v14  ;;  %v1571_v14 = vld [vmem:[#allocation2 + $0x30] sm:$0xff] }
 0x25c   :  { %v1526_v17 = vpop.f32.mrf.mxu1 }
 0x25d   :  { %4129 = vpow2.f32 %v3274_v44  ;;  %v1575_v19 = vadd.f32 %v1566_v18, %v1526_v17 }
 0x25e   :  { %v3850_v20 = vpop.f32.mrf.mxu1 }
 0x25f   :  { %v3275_v52 = vmul.f32 -1.442695, %v1575_v19 }
 0x260   :  { %v1531_v21 = vpop.f32.mrf.mxu1 }
 0x261   :  { %4131 = vpow2.f32 %v3275_v52  ;;  %v1576_v25 = vadd.f32 %v1567_v22, %v1531_v21  ;;  %v1572_v52 = vld [vmem:[#allocation2 + $0x38] sm:$0xff] }
 0x262   :  { %v3853_v26 = vpop.f32.mrf.mxu1 }
 0x263   :  { %v3276_v34 = vmul.f32 -1.442695, %v1576_v25 }
 0x264   :  { %v1536_v27 = vpop.f32.mrf.mxu1 }
 0x265   :  { %4133 = vpow2.f32 %v3276_v34  ;;  %v1595_v29 = vadd.f32 %v1568_v28, %v1536_v27  ;;  %v1573_v34 = vld [vmem:[#allocation2 + $0x40] sm:$0xff] }
 0x266   :  { %v3856_v30 = vpop.f32.mrf.mxu1 }
 0x267   :  { %v3277_v31 = vmul.f32 -1.442695, %v1595_v29 }
 0x268   :  { %v1541_v32 = vpop.f32.mrf.mxu1 }
 0x269   :  { %4135 = vpow2.f32 %v3277_v31  ;;  %v1596_v35 = vadd.f32 %v1569_v33, %v1541_v32 }
 0x26a   :  { %v4130_v36 = vpop.eup %4129  ;;  %v3859_v37 = vpop.f32.mrf.mxu1 }
 0x26b   :  { %v1586_v38 = vadd.f32 1.0, %v4130_v36  ;;  %v3278_v4 = vmul.f32 -1.442695, %v1596_v35 }
 0x26c   :  { %v1546_v39 = vpop.f32.mrf.mxu1 }
 0x26d   :  { %4137 = vrcp.f32 %v1586_v38  ;;  %v1597_v41 = vadd.f32 %v1570_v40, %v1546_v39  ;;  %v5283_v40 = vpop.permute.xlu0 %1657 }
 0x26e   :  { %v4132_v42 = vpop.eup %4131  ;;  %4139 = vpow2.f32 %v3278_v4  ;;  %v3862_v43 = vpop.f32.mrf.mxu1 }
 0x26f   :  { %v1587_v8 = vadd.f32 1.0, %v4132_v42  ;;  %v3279_v45 = vmul.f32 -1.442695, %v1597_v41 }
 0x270   :  { %v1551_v46 = vpop.f32.mrf.mxu1 }
 0x271   :  { %4141 = vrcp.f32 %v1587_v8  ;;  %v1631_v7 = vadd.f32 %v5272_v6, %v1551_v46  ;;  %v5287_v8 = vpop.permute.xlu1 %1662 }
 0x272   :  { %v4134_v47 = vpop.eup %4133  ;;  %4143 = vpow2.f32 %v3279_v45  ;;  %v3865_v50 = vpop.f32.mrf.mxu1 }
 0x273   :  { %v1588_v3 = vadd.f32 1.0, %v4134_v47 }
 0x274   :  { %v1556_v51 = vpop.f32.mrf.mxu1 }
 0x275   :  { %4145 = vrcp.f32 %v1588_v3  ;;  %v1632_v44 = vadd.f32 %v5275_v12, %v1556_v51  ;;  %v5297_v3 = vpop.permute.xlu0 %1667 }
 0x276   :  { %v4136_v53 = vpop.eup %4135  ;;  %v3868_v54 = vpop.f32.mrf.mxu1 }
 0x277   :  { %v1607_v5 = vadd.f32 1.0, %v4136_v53 }
 0x278   :  { %v1561_v23 = vpop.f32.mrf.mxu1 }
 0x279   :  { %4147 = vrcp.f32 %v1607_v5  ;;  %v1633_v22 = vadd.f32 %v5270_v48, %v1561_v23 }
 0x27a   :  { %v4138_v9 = vpop.eup %4137  ;;  %v3871_v24 = vpop.f32.mrf.mxu1 }
 0x27b   :  { %v4140_v10 = vpop.eup %4139  ;;  %v1634_v11 = vmul.f32 %v4138_v9, %v1631_v7  ;;  %v1691_v24 = vsub.s32 0, %v4590_v49 }
 0x27c   :  { %v1608_v13 = vadd.f32 1.0, %v4140_v10 }
 0x27d   :  { %v1637_v16 = vadd.f32 %v1634_v11, %v1571_v14  ;;  %v1687_v11 = vpop.permute.xlu1 %1686 }
 0x27e   :  { %v4142_v17 = vpop.eup %4141  ;;  %4149 = vrcp.f32 %v1608_v13 }
 0x27f   :  { %v4144_v18 = vpop.eup %4143  ;;  %4151 = vtanh.f32 %v1637_v16  ;;  %v1635_v19 = vmul.f32 %v4142_v17, %v1632_v44 }
 0x280   :  { %v1609_v20 = vadd.f32 1.0, %v4144_v18  ;;  %v1814_v18 = vld [vmem:[#allocation2 + $0x50] sm:$0xff] }
 0x281   :  { %v1638_v21 = vadd.f32 %v1635_v19, %v1572_v52 }
 0x282   :  { %v4146_v25 = vpop.eup %4145  ;;  %4153 = vrcp.f32 %v1609_v20 }
 0x283   :  { %4155 = vtanh.f32 %v1638_v21  ;;  %v1636_v26 = vmul.f32 %v4146_v25, %v1633_v22 }
 0x285   :  { %v1639_v27 = vadd.f32 %v1636_v26, %v1573_v34 }
 0x286   :  { %v4148_v28 = vpop.eup %4147 }
 0x287   :  { %4157 = vtanh.f32 %v1639_v27  ;;  %v1643_v30 = vsub.f32 1.0, %v4148_v28  ;;  %v1649_v36 = vmul.f32 %v4148_v28, %v4990_v57  ;;  %v1816_v27 = vld [vmem:[#allocation2 + $0x60] sm:$0xff] }
 0x28b   :  { %v4150_v29 = vpop.eup %4149 }
 0x28c   :  { %v4152_v31 = vpop.eup %4151  ;;  %v1644_v35 = vsub.f32 1.0, %v4150_v29  ;;  %v1650_v4 = vmul.f32 %v4150_v29, %v4979_v56 }
 0x28d   :  { %v1646_v32 = vmul.f32 %v4152_v31, %v1643_v30 }
 0x28f   :  { %v4154_v33 = vpop.eup %4153  ;;  %v5281_v39 = vadd.f32 %v1649_v36, %v1646_v32  ;;  %v1817_v32 = vld [vmem:[#allocation2 + $0x68] sm:$0xff] }
 0x290   :  { %v4156_v37 = vpop.eup %4155  ;;  %v1645_v41 = vsub.f32 1.0, %v4154_v33  ;;  %v1651_v46 = vmul.f32 %v4154_v33, %v4967_v55 }
 0x291   :  { %v1647_v38 = vmul.f32 %v4156_v37, %v1644_v35  ;;  %v1670_v47 = vmul.f32 %v5283_v40, %v5281_v39 }
 0x293   :  { %v5285_v42 = vadd.f32 %v1650_v4, %v1647_v38  ;;  %v1673_v53 = vsel %vm1329_vm4, %v1670_v47, 0.0 }
 0x294   :  { %v4158_v43 = vpop.eup %4157 }
 0x295   :  { %v1648_v45 = vmul.f32 %v4158_v43, %v1645_v41  ;;  %v1671_v57 = vmul.f32 %v5287_v8, %v5285_v42  ;;  %v1818_v41 = vld [vmem:[#allocation2 + $0x70] sm:$0xff] }
 0x297   :  { %v5294_v56 = vadd.f32 %v1651_v46, %v1648_v45  ;;  %v1674_v50 = vsel %vm1329_vm4, %v1671_v57, 0.0 }
 0x298   :  { %v1675_v55 = vadd.f32 %v1674_v50, %v1673_v53 }
 0x299   :  { %v1672_v51 = vmul.f32 %v5297_v3, %v5294_v56  ;;  %3873 = vmatpush3.msra.mxu0 %v5294_v56 }
 0x29a   :  { %3874 = vmatprep.subr.mxu0 %v4441_v15 }
 0x29b   :  { %v1676_v54 = vsel %vm1329_vm4, %v1672_v51, 0.0  ;;  %3875 = vmatpush3.msra.mxu0 %v5285_v42 }
 0x29c   :  { %3876 = vmatprep.subr.mxu0 %v4441_v15  ;;  %v1677_v5 = vadd.f32 %v1676_v54, %v1675_v55 }
 0x29d   :  { %3877 = vmatpush3.msra.mxu0 %v5281_v39 }
 0x29e   :  { %v1678_v23 = vrot.slane %v1677_v5, 4  ;;  %3879 = vmatmul.mubr.msk.f32.vlgmr.msra.gmra.mxu0 %vm397_vm3, %v5030_v58  ;;  %3938 = vmatprep.subr.mxu0 %v4441_v15  ;;  %v5322_v58 = vrot.slane %v1687_v11, %v1691_v24 }
 0x29f   :  { %3881 = vmatprep.mubr.msk.f32.mxu0 %vm4442_vm2, %v4441_v15 }
 0x2a0   :  { %v1679_v7 = vadd.f32 %v1678_v23, %v1677_v5 }
 0x2a2   :  { %v1680_v9 = vrot.slane %v1679_v7, 2  ;;  %3882 = vmatmul.mubr.msk.f32.gmra.mxu0 %vm397_vm3, %v5039_v59 }
 0x2a3   :  { %3884 = vmatprep.mubr.msk.f32.mxu0 %vm4442_vm2, %v4441_v15 }
 0x2a4   :  { %v1681_v10 = vadd.f32 %v1680_v9, %v1679_v7 }
 0x2a6   :  { %v1682_v13 = vrot.slane %v1681_v10, 1  ;;  %3885 = vmatmul.mubr.msk.f32.gmra.mxu0 %vm397_vm3, %v5048_v60 }
 0x2a7   :  { %3887 = vmatprep.mubr.msk.f32.mxu0 %vm4442_vm2, %v4441_v15 }
 0x2a8   :  { %v1683_v14 = vadd.f32 %v1682_v13, %v1681_v10 }
 0x2aa   :  { %v1693_v16 = vadd.f32 %v5322_v58, %v1683_v14  ;;  %3888 = vmatmul.mubr.msk.f32.gmra.mxu0 %vm397_vm3, %v5057_v61 }
 0x2ab   :  { %3890 = vmatprep.mubr.msk.f32.mxu0 %vm4442_vm2, %v4441_v15 }
 0x2ac   :  { %v3280_v49 = vmul.f32 -1.442695, %v1693_v16 }
 0x2ae   :  { %4159 = vpow2.f32 %v3280_v49  ;;  %3891 = vmatmul.mubr.msk.f32.gmra.mxu0 %vm397_vm3, %v5066_v62  ;;  %v1819_v49 = vld [vmem:[#allocation2 + $0x78] sm:$0xff] }
 0x2af   :  { %3893 = vmatprep.mubr.msk.f32.mxu0 %vm4442_vm2, %v4441_v15 }
 0x2b2   :  { %3894 = vmatmul.mubr.msk.f32.gmra.mxu0 %vm397_vm3, %v5075_v63  ;;  %v1813_v63 = vld [vmem:[#allocation2 + $0x48] sm:$0xff] }
 0x2b3   :  { %3896 = vmatprep.mubr.msk.f32.mxu0 %vm4442_vm2, %v4441_v15 }
 0x2b6   :  { %3897 = vmatmul.mubr.msk.f32.gmra.mxu0 %vm397_vm3, %v5084_v0 }
 0x2b7   :  { %3899 = vmatprep.mubr.msk.f32.mxu0 %vm4442_vm2, %v4441_v15 }
 0x2ba   :  { %3900 = vmatmul.mubr.msk.f32.gmra.mxu0 %vm397_vm3, %v5093_v1 }
 0x2bb   :  { %v4160_v59 = vpop.eup %4159  ;;  %3902 = vmatprep.mubr.msk.f32.mxu0 %vm4442_vm2, %v4441_v15 }
 0x2bc   :  { %v1697_v60 = vadd.f32 1.0, %v4160_v59 }
 0x2be   :  { %4161 = vrcp.f32 %v1697_v60  ;;  %3903 = vmatmul.mubr.msk.f32.gmra.mxu0 %vm397_vm3, %v5102_v2  ;;  %v1815_v2 = vld [vmem:[#allocation2 + $0x58] sm:$0xff] }
 0x2bf   :  { %3944 = vmatprep.mubr.msk.f32.mxu0 %vm4442_vm2, %v4441_v15 }
 0x2cb   :  { %v4162_v61 = vpop.eup %4161 }
 0x2cc   :  { %1701 = vst.msk [vmem:[#allocation5] sm:$0x1] %vm1700_vm5, %v4162_v61 }
 0x35e   :  { %v1768_v62 = vpop.f32.mrf.mxu0 }
 0x35f   :  { %v1822_v0 = vadd.f32 %v1813_v63, %v1768_v62 }
 0x360   :  { %v3880_v1 = vpop.f32.mrf.mxu0 }
 0x361   :  { %v3290_v44 = vmul.f32 -1.442695, %v1822_v0  ;;  %v1820_v1 = vld [vmem:[#allocation2 + $0x80] sm:$0xff] }
 0x362   :  { %v1773_v17 = vpop.f32.mrf.mxu0 }
 0x363   :  { %4163 = vpow2.f32 %v3290_v44  ;;  %v1823_v19 = vadd.f32 %v1814_v18, %v1773_v17 }
 0x364   :  { %v3883_v20 = vpop.f32.mrf.mxu0 }
 0x365   :  { %v3291_v52 = vmul.f32 -1.442695, %v1823_v19  ;;  %v1821_v20 = vld [vmem:[#allocation2 + $0x88] sm:$0xff] }
 0x366   :  { %v1778_v21 = vpop.f32.mrf.mxu0 }
 0x367   :  { %4165 = vpow2.f32 %v3291_v52  ;;  %v1824_v22 = vadd.f32 %v1815_v2, %v1778_v21 }
 0x368   :  { %v3886_v25 = vpop.f32.mrf.mxu0 }
 0x369   :  { %v3292_v26 = vmul.f32 -1.442695, %v1824_v22 }
 0x36a   :  { %v1783_v34 = vpop.f32.mrf.mxu0 }
 0x36b   :  { %4167 = vpow2.f32 %v3292_v26  ;;  %v1843_v28 = vadd.f32 %v1816_v27, %v1783_v34 }
 0x36c   :  { %v3889_v29 = vpop.f32.mrf.mxu0 }
 0x36d   :  { %v3293_v30 = vmul.f32 -1.442695, %v1843_v28 }
 0x36e   :  { %v1788_v31 = vpop.f32.mrf.mxu0 }
 0x36f   :  { %4169 = vpow2.f32 %v3293_v30  ;;  %v1844_v33 = vadd.f32 %v1817_v32, %v1788_v31 }
 0x370   :  { %v4164_v35 = vpop.eup %4163  ;;  %v3892_v36 = vpop.f32.mrf.mxu0 }
 0x371   :  { %v1834_v37 = vadd.f32 1.0, %v4164_v35  ;;  %v3294_v38 = vmul.f32 -1.442695, %v1844_v33 }
 0x372   :  { %v1793_v4 = vpop.f32.mrf.mxu0 }
 0x373   :  { %4171 = vrcp.f32 %v1834_v37  ;;  %v1845_v43 = vadd.f32 %v1818_v41, %v1793_v4 }
 0x374   :  { %v4166_v45 = vpop.eup %4165  ;;  %4173 = vpow2.f32 %v3294_v38  ;;  %v3895_v46 = vpop.f32.mrf.mxu0 }
 0x375   :  { %v1835_v57 = vadd.f32 1.0, %v4166_v45  ;;  %v3295_v47 = vmul.f32 -1.442695, %v1845_v43 }
 0x376   :  { %v1798_v50 = vpop.f32.mrf.mxu0 }
 0x377   :  { %4175 = vrcp.f32 %v1835_v57  ;;  %v1864_v24 = vadd.f32 %v1798_v50, %v5272_v6  ;;  %v5379_v50 = vld [vmem:[%s5848_s4] sm:$0xff] }
 0x378   :  { %v4168_v51 = vpop.eup %4167  ;;  %4177 = vpow2.f32 %v3295_v47  ;;  %v3898_v53 = vpop.f32.mrf.mxu0 }
 0x379   :  { %v1836_v55 = vadd.f32 1.0, %v4168_v51 }
 0x37a   :  { %v1803_v54 = vpop.f32.mrf.mxu0 }
 0x37b   :  { %4179 = vrcp.f32 %v1836_v55  ;;  %v1865_v60 = vadd.f32 %v1803_v54, %v5275_v12  ;;  %v5389_v55 = vld [vmem:[%s5848_s4 + $0x8] sm:$0xff] }
 0x37c   :  { %v4170_v5 = vpop.eup %4169  ;;  %v3901_v23 = vpop.f32.mrf.mxu0 }
 0x37d   :  { %v1855_v7 = vadd.f32 1.0, %v4170_v5  ;;  %v5398_v23 = vld [vmem:[%s5848_s4 + $0x10] sm:$0xff] }
 0x37e   :  { %v1808_v9 = vpop.f32.mrf.mxu0 }
 0x37f   :  { %4181 = vrcp.f32 %v1855_v7  ;;  %v1866_v17 = vadd.f32 %v1808_v9, %v5270_v48 }
 0x380   :  { %v4172_v10 = vpop.eup %4171  ;;  %v3904_v11 = vpop.f32.mrf.mxu0 }
 0x381   :  { %v4174_v13 = vpop.eup %4173  ;;  %v1867_v14 = vmul.f32 %v4172_v10, %v1864_v24  ;;  %v5408_v24 = vld [vmem:[%s5848_s4 + $0x18] sm:$0xff]  ;;  %v5417_v11 = vld [vmem:[%s5848_s4 + $0x20] sm:$0xff] }
 0x382   :  { %v1856_v16 = vadd.f32 1.0, %v4174_v13  ;;  %v5426_v13 = vld [vmem:[%s5848_s4 + $0x28] sm:$0xff] }
 0x383   :  { %v1870_v59 = vadd.f32 %v1867_v14, %v1819_v49  ;;  %v5435_v14 = vld [vmem:[%s5848_s4 + $0x30] sm:$0xff] }
 0x384   :  { %v4176_v61 = vpop.eup %4175  ;;  %4183 = vrcp.f32 %v1856_v16  ;;  %v5444_v16 = vld [vmem:[%s5848_s4 + $0x38] sm:$0xff] }
 0x385   :  { %v4178_v62 = vpop.eup %4177  ;;  %4185 = vtanh.f32 %v1870_v59  ;;  %v1868_v63 = vmul.f32 %v4176_v61, %v1865_v60  ;;  %v5453_v60 = vld [vmem:[%s5848_s4 + $0x40] sm:$0xff] }
 0x386   :  { %v1857_v0 = vadd.f32 1.0, %v4178_v62 }
 0x387   :  { %v1871_v44 = vadd.f32 %v1868_v63, %v1820_v1  ;;  %v2021_v63 = vld [vmem:[#allocation2 + $0x90] sm:$0xff] }
 0x388   :  { %v4180_v18 = vpop.eup %4179  ;;  %4187 = vrcp.f32 %v1857_v0 }
 0x389   :  { %4189 = vtanh.f32 %v1871_v44  ;;  %v1869_v19 = vmul.f32 %v4180_v18, %v1866_v17  ;;  %v2022_v18 = vld [vmem:[#allocation2 + $0x98] sm:$0xff] }
 0x38b   :  { %v1872_v52 = vadd.f32 %v1869_v19, %v1821_v20 }
 0x38c   :  { %v4182_v21 = vpop.eup %4181 }
 0x38d   :  { %4191 = vtanh.f32 %v1872_v52  ;;  %v1876_v22 = vsub.f32 1.0, %v4182_v21  ;;  %v1882_v28 = vmul.f32 %v4182_v21, %v5281_v39 }
 0x391   :  { %v4184_v2 = vpop.eup %4183 }
 0x392   :  { %v4186_v25 = vpop.eup %4185  ;;  %v1877_v27 = vsub.f32 1.0, %v4184_v2  ;;  %v1883_v31 = vmul.f32 %v4184_v2, %v5285_v42  ;;  %v2023_v2 = vld [vmem:[#allocation2 + $0xa0] sm:$0xff] }
 0x393   :  { %v1879_v26 = vmul.f32 %v4186_v25, %v1876_v22 }
 0x395   :  { %v4188_v34 = vpop.eup %4187  ;;  %v5355_v32 = vadd.f32 %v1882_v28, %v1879_v26 }
 0x396   :  { %v4190_v29 = vpop.eup %4189  ;;  %v1878_v33 = vsub.f32 1.0, %v4188_v34  ;;  %v1884_v38 = vmul.f32 %v4188_v34, %v5294_v56 }
 0x397   :  { %v1880_v30 = vmul.f32 %v4190_v29, %v1877_v27  ;;  %v1888_v41 = vmul.f32 %v5355_v32, %v5283_v40  ;;  %v2024_v27 = vld [vmem:[#allocation2 + $0xa8] sm:$0xff] }
 0x399   :  { %v5357_v35 = vadd.f32 %v1883_v31, %v1880_v30  ;;  %v1891_v45 = vsel %vm1329_vm4, %v1888_v41, 0.0 }
 0x39a   :  { %v4192_v36 = vpop.eup %4191 }
 0x39b   :  { %v1881_v37 = vmul.f32 %v4192_v36, %v1878_v33  ;;  %v1889_v4 = vmul.f32 %v5357_v35, %v5287_v8  ;;  %v2025_v33 = vld [vmem:[#allocation2 + $0xb0] sm:$0xff] }
 0x39d   :  { %v5364_v39 = vadd.f32 %v1884_v38, %v1881_v37  ;;  %v1892_v43 = vsel %vm1329_vm4, %v1889_v4, 0.0 }
 0x39e   :  { %v1893_v56 = vadd.f32 %v1892_v43, %v1891_v45 }
 0x39f   :  { %v1890_v42 = vmul.f32 %v5364_v39, %v5297_v3  ;;  %3906 = vmatpush3.msra.mxu1 %v5364_v39 }
 0x3a0   :  { %3907 = vmatprep.subr.mxu1 %v4441_v15 }
 0x3a1   :  { %v1894_v46 = vsel %vm1329_vm4, %v1890_v42, 0.0  ;;  %3908 = vmatpush3.msra.mxu1 %v5357_v35  ;;  %v2026_v42 = vld [vmem:[#allocation2 + $0xb8] sm:$0xff] }
 0x3a2   :  { %3909 = vmatprep.subr.mxu1 %v4441_v15  ;;  %v1895_v57 = vadd.f32 %v1894_v46, %v1893_v56 }
 0x3a3   :  { %3910 = vmatpush3.msra.mxu1 %v5355_v32 }
 0x3a4   :  { %v1896_v47 = vrot.slane %v1895_v57, 4  ;;  %3912 = vmatmul.mubr.msk.f32.vlgmr.msra.gmra.mxu1 %vm397_vm3, %v5379_v50  ;;  %3971 = vmatprep.subr.mxu1 %v4441_v15 }
 0x3a5   :  { %3914 = vmatprep.mubr.msk.f32.mxu1 %vm4442_vm2, %v4441_v15 }
 0x3a6   :  { %v1897_v51 = vadd.f32 %v1896_v47, %v1895_v57 }
 0x3a8   :  { %v1898_v53 = vrot.slane %v1897_v51, 2  ;;  %3915 = vmatmul.mubr.msk.f32.gmra.mxu1 %vm397_vm3, %v5389_v55 }
 0x3a9   :  { %3917 = vmatprep.mubr.msk.f32.mxu1 %vm4442_vm2, %v4441_v15 }
 0x3aa   :  { %v1899_v54 = vadd.f32 %v1898_v53, %v1897_v51 }
 0x3ac   :  { %v1900_v5 = vrot.slane %v1899_v54, 1  ;;  %3918 = vmatmul.mubr.msk.f32.gmra.mxu1 %vm397_vm3, %v5398_v23 }
 0x3ad   :  { %3920 = vmatprep.mubr.msk.f32.mxu1 %vm4442_vm2, %v4441_v15 }
 0x3ae   :  { %v1901_v7 = vadd.f32 %v1900_v5, %v1899_v54 }
 0x3b0   :  { %v1902_v9 = vadd.f32 %v1901_v7, %v5322_v58  ;;  %3921 = vmatmul.mubr.msk.f32.gmra.mxu1 %vm397_vm3, %v5408_v24 }
 0x3b1   :  { %3923 = vmatprep.mubr.msk.f32.mxu1 %vm4442_vm2, %v4441_v15 }
 0x3b2   :  { %v3296_v10 = vmul.f32 -1.442695, %v1902_v9 }
 0x3b4   :  { %4193 = vpow2.f32 %v3296_v10  ;;  %3924 = vmatmul.mubr.msk.f32.gmra.mxu1 %vm397_vm3, %v5417_v11 }
 0x3b5   :  { %3926 = vmatprep.mubr.msk.f32.mxu1 %vm4442_vm2, %v4441_v15 }
 0x3b8   :  { %3927 = vmatmul.mubr.msk.f32.gmra.mxu1 %vm397_vm3, %v5426_v13 }
 0x3b9   :  { %3929 = vmatprep.mubr.msk.f32.mxu1 %vm4442_vm2, %v4441_v15 }
 0x3bc   :  { %3930 = vmatmul.mubr.msk.f32.gmra.mxu1 %vm397_vm3, %v5435_v14 }
 0x3bd   :  { %3932 = vmatprep.mubr.msk.f32.mxu1 %vm4442_vm2, %v4441_v15 }
 0x3c0   :  { %3933 = vmatmul.mubr.msk.f32.gmra.mxu1 %vm397_vm3, %v5444_v16 }
 0x3c1   :  { %v4194_v49 = vpop.eup %4193  ;;  %3935 = vmatprep.mubr.msk.f32.mxu1 %vm4442_vm2, %v4441_v15 }
 0x3c2   :  { %v1906_v59 = vadd.f32 1.0, %v4194_v49 }
 0x3c4   :  { %4195 = vrcp.f32 %v1906_v59  ;;  %3936 = vmatmul.mubr.msk.f32.gmra.mxu1 %vm397_vm3, %v5453_v60 }
 0x3c5   :  { %3977 = vmatprep.mubr.msk.f32.mxu1 %vm4442_vm2, %v4441_v15 }
 0x3d1   :  { %v4196_v61 = vpop.eup %4195 }
 0x3d2   :  { %1909 = vst.msk [vmem:[#allocation5 + $0x1] sm:$0x1] %vm1700_vm5, %v4196_v61 }
 0x464   :  { %v1976_v62 = vpop.f32.mrf.mxu1 }
 0x465   :  { %v2030_v0 = vadd.f32 %v2021_v63, %v1976_v62 }
 0x466   :  { %v3913_v1 = vpop.f32.mrf.mxu1 }
 0x467   :  { %v3306_v44 = vmul.f32 -1.442695, %v2030_v0 }
 0x468   :  { %v1981_v17 = vpop.f32.mrf.mxu1 }
 0x469   :  { %4197 = vpow2.f32 %v3306_v44  ;;  %v2031_v19 = vadd.f32 %v2022_v18, %v1981_v17  ;;  %v2027_v17 = vld [vmem:[#allocation2 + $0xc0] sm:$0xff] }
 0x46a   :  { %v3916_v20 = vpop.f32.mrf.mxu1 }
 0x46b   :  { %v3307_v52 = vmul.f32 -1.442695, %v2031_v19 }
 0x46c   :  { %v1986_v21 = vpop.f32.mrf.mxu1 }
 0x46d   :  { %4199 = vpow2.f32 %v3307_v52  ;;  %v2032_v22 = vadd.f32 %v2023_v2, %v1986_v21 }
 0x46e   :  { %v3919_v25 = vpop.f32.mrf.mxu1 }
 0x46f   :  { %v3308_v26 = vmul.f32 -1.442695, %v2032_v22  ;;  %v2028_v22 = vld [vmem:[#allocation2 + $0xc8] sm:$0xff] }
 0x470   :  { %v1991_v34 = vpop.f32.mrf.mxu1 }
 0x471   :  { %4201 = vpow2.f32 %v3308_v26  ;;  %v2051_v28 = vadd.f32 %v2024_v27, %v1991_v34 }
 0x472   :  { %v3922_v29 = vpop.f32.mrf.mxu1 }
 0x473   :  { %v3309_v30 = vmul.f32 -1.442695, %v2051_v28  ;;  %v2029_v28 = vld [vmem:[#allocation2 + $0xd0] sm:$0xff] }
 0x474   :  { %v1996_v31 = vpop.f32.mrf.mxu1 }
 0x475   :  { %4203 = vpow2.f32 %v3309_v30  ;;  %v2052_v36 = vadd.f32 %v2025_v33, %v1996_v31 }
 0x476   :  { %v4198_v37 = vpop.eup %4197  ;;  %v3925_v38 = vpop.f32.mrf.mxu1 }
 0x477   :  { %v2042_v4 = vadd.f32 1.0, %v4198_v37  ;;  %v3310_v41 = vmul.f32 -1.442695, %v2052_v36 }
 0x478   :  { %v2001_v43 = vpop.f32.mrf.mxu1 }
 0x479   :  { %4205 = vrcp.f32 %v2042_v4  ;;  %v2053_v45 = vadd.f32 %v2026_v42, %v2001_v43 }
 0x47a   :  { %v4200_v56 = vpop.eup %4199  ;;  %4207 = vpow2.f32 %v3310_v41  ;;  %v3928_v46 = vpop.f32.mrf.mxu1 }
 0x47b   :  { %v2043_v57 = vadd.f32 1.0, %v4200_v56  ;;  %v3311_v47 = vmul.f32 -1.442695, %v2053_v45 }
 0x47c   :  { %v2006_v51 = vpop.f32.mrf.mxu1 }
 0x47d   :  { %4209 = vrcp.f32 %v2043_v57  ;;  %v2072_v61 = vadd.f32 %v2006_v51, %v5272_v6 }
 0x47e   :  { %v4202_v53 = vpop.eup %4201  ;;  %4211 = vpow2.f32 %v3311_v47  ;;  %v3931_v54 = vpop.f32.mrf.mxu1 }
 0x47f   :  { %v2044_v5 = vadd.f32 1.0, %v4202_v53 }
 0x480   :  { %v2011_v7 = vpop.f32.mrf.mxu1 }
 0x481   :  { %4213 = vrcp.f32 %v2044_v5  ;;  %v2073_v19 = vadd.f32 %v2011_v7, %v5275_v12 }
 0x482   :  { %v4204_v9 = vpop.eup %4203  ;;  %v3934_v10 = vpop.f32.mrf.mxu1 }
 0x483   :  { %v2063_v49 = vadd.f32 1.0, %v4204_v9 }
 0x484   :  { %v2016_v59 = vpop.f32.mrf.mxu1 }
 0x485   :  { %4215 = vrcp.f32 %v2063_v49  ;;  %v2074_v26 = vadd.f32 %v2016_v59, %v5270_v48 }
 0x486   :  { %v4206_v62 = vpop.eup %4205  ;;  %v3937_v63 = vpop.f32.mrf.mxu1 }
 0x487   :  { %v4208_v0 = vpop.eup %4207  ;;  %v2075_v1 = vmul.f32 %v4206_v62, %v2072_v61 }
 0x488   :  { %v2064_v44 = vadd.f32 1.0, %v4208_v0 }
 0x489   :  { %v2078_v18 = vadd.f32 %v2075_v1, %v2027_v17 }
 0x48a   :  { %v4210_v20 = vpop.eup %4209  ;;  %4217 = vrcp.f32 %v2064_v44 }
 0x48b   :  { %v4212_v52 = vpop.eup %4211  ;;  %4219 = vtanh.f32 %v2078_v18  ;;  %v2076_v21 = vmul.f32 %v4210_v20, %v2073_v19 }
 0x48c   :  { %v2065_v2 = vadd.f32 1.0, %v4212_v52 }
 0x48d   :  { %v2079_v25 = vadd.f32 %v2076_v21, %v2028_v22  ;;  %v2229_v21 = vld [vmem:[#allocation2 + $0xd8] sm:$0xff] }
 0x48e   :  { %v4214_v34 = vpop.eup %4213  ;;  %4221 = vrcp.f32 %v2065_v2 }
 0x48f   :  { %4223 = vtanh.f32 %v2079_v25  ;;  %v2077_v27 = vmul.f32 %v4214_v34, %v2074_v26  ;;  %v2230_v34 = vld [vmem:[#allocation2 + $0xe0] sm:$0xff] }
 0x491   :  { %v2080_v29 = vadd.f32 %v2077_v27, %v2029_v28 }
 0x492   :  { %v4216_v30 = vpop.eup %4215 }
 0x493   :  { %4225 = vtanh.f32 %v2080_v29  ;;  %v2084_v33 = vsub.f32 1.0, %v4216_v30  ;;  %v2090_v41 = vmul.f32 %v4216_v30, %v5355_v32 }
 0x497   :  { %v4218_v31 = vpop.eup %4217 }
 0x498   :  { %v4220_v36 = vpop.eup %4219  ;;  %v2085_v4 = vsub.f32 1.0, %v4218_v31  ;;  %v2091_v45 = vmul.f32 %v4218_v31, %v5357_v35  ;;  %v2231_v31 = vld [vmem:[#allocation2 + $0xe8] sm:$0xff] }
 0x499   :  { %v2087_v37 = vmul.f32 %v4220_v36, %v2084_v33 }
 0x49b   :  { %v4222_v38 = vpop.eup %4221  ;;  %v5465_v56 = vadd.f32 %v2090_v41, %v2087_v37 }
 0x49c   :  { %v4224_v43 = vpop.eup %4223  ;;  %v2086_v46 = vsub.f32 1.0, %v4222_v38  ;;  %v2092_v53 = vmul.f32 %v4222_v38, %v5364_v39 }
 0x49d   :  { %v2088_v42 = vmul.f32 %v4224_v43, %v2085_v4  ;;  %v2096_v5 = vmul.f32 %v5465_v56, %v5283_v40  ;;  %v2232_v4 = vld [vmem:[#allocation2 + $0xf0] sm:$0xff] }
 0x49f   :  { %v5467_v57 = vadd.f32 %v2091_v45, %v2088_v42  ;;  %v2099_v9 = vsel %vm1329_vm4, %v2096_v5, 0.0 }
 0x4a0   :  { %v4226_v47 = vpop.eup %4225 }
 0x4a1   :  { %v2089_v51 = vmul.f32 %v4226_v47, %v2086_v46  ;;  %v2097_v54 = vmul.f32 %v5467_v57, %v5287_v8  ;;  %v2233_v46 = vld [vmem:[#allocation2 + $0xf8] sm:$0xff] }
 0x4a3   :  { %v5474_v32 = vadd.f32 %v2092_v53, %v2089_v51  ;;  %v2100_v7 = vsel %vm1329_vm4, %v2097_v54, 0.0 }
 0x4a4   :  { %v2101_v39 = vadd.f32 %v2100_v7, %v2099_v9 }
 0x4a5   :  { %v2098_v35 = vmul.f32 %v5474_v32, %v5297_v3  ;;  %3939 = vmatpush3.msra.mxu0 %v5474_v32 }
 0x4a6   :  { %3940 = vmatprep.subr.mxu0 %v4441_v15 }
 0x4a7   :  { %v2102_v10 = vsel %vm1329_vm4, %v2098_v35, 0.0  ;;  %3941 = vmatpush3.msra.mxu0 %v5467_v57  ;;  %v2234_v35 = vld [vmem:[#allocation2 + $0x100] sm:$0xff] }
 0x4a8   :  { %3942 = vmatprep.subr.mxu0 %v4441_v15  ;;  %v2103_v49 = vadd.f32 %v2102_v10, %v2101_v39 }
 0x4a9   :  { %3943 = vmatpush3.msra.mxu0 %v5465_v56 }
 0x4aa   :  { %v2104_v59 = vrot.slane %v2103_v49, 4  ;;  %3945 = vmatmul.mubr.msk.f32.vlgmr.msra.gmra.mxu0 %vm397_vm3, %v5379_v50  ;;  %4004 = vmatprep.subr.mxu0 %v4441_v15 }
 0x4ab   :  { %3947 = vmatprep.mubr.msk.f32.mxu0 %vm4442_vm2, %v4441_v15 }
 0x4ac   :  { %v2105_v61 = vadd.f32 %v2104_v59, %v2103_v49 }
 0x4ae   :  { %v2106_v62 = vrot.slane %v2105_v61, 2  ;;  %3948 = vmatmul.mubr.msk.f32.gmra.mxu0 %vm397_vm3, %v5389_v55 }
 0x4af   :  { %3950 = vmatprep.mubr.msk.f32.mxu0 %vm4442_vm2, %v4441_v15 }
 0x4b0   :  { %v2107_v63 = vadd.f32 %v2106_v62, %v2105_v61 }
 0x4b2   :  { %v2108_v0 = vrot.slane %v2107_v63, 1  ;;  %3951 = vmatmul.mubr.msk.f32.gmra.mxu0 %vm397_vm3, %v5398_v23 }
 0x4b3   :  { %3953 = vmatprep.mubr.msk.f32.mxu0 %vm4442_vm2, %v4441_v15 }
 0x4b4   :  { %v2109_v1 = vadd.f32 %v2108_v0, %v2107_v63 }
 0x4b6   :  { %v2110_v44 = vadd.f32 %v2109_v1, %v5322_v58  ;;  %3954 = vmatmul.mubr.msk.f32.gmra.mxu0 %vm397_vm3, %v5408_v24 }
 0x4b7   :  { %3956 = vmatprep.mubr.msk.f32.mxu0 %vm4442_vm2, %v4441_v15 }
 0x4b8   :  { %v3312_v17 = vmul.f32 -1.442695, %v2110_v44 }
 0x4ba   :  { %4227 = vpow2.f32 %v3312_v17  ;;  %3957 = vmatmul.mubr.msk.f32.gmra.mxu0 %vm397_vm3, %v5417_v11 }
 0x4bb   :  { %3959 = vmatprep.mubr.msk.f32.mxu0 %vm4442_vm2, %v4441_v15 }
 0x4be   :  { %3960 = vmatmul.mubr.msk.f32.gmra.mxu0 %vm397_vm3, %v5426_v13 }
 0x4bf   :  { %3962 = vmatprep.mubr.msk.f32.mxu0 %vm4442_vm2, %v4441_v15 }
 0x4c2   :  { %3963 = vmatmul.mubr.msk.f32.gmra.mxu0 %vm397_vm3, %v5435_v14 }
 0x4c3   :  { %3965 = vmatprep.mubr.msk.f32.mxu0 %vm4442_vm2, %v4441_v15 }
 0x4c6   :  { %3966 = vmatmul.mubr.msk.f32.gmra.mxu0 %vm397_vm3, %v5444_v16 }
 0x4c7   :  { %v4228_v18 = vpop.eup %4227  ;;  %3968 = vmatprep.mubr.msk.f32.mxu0 %vm4442_vm2, %v4441_v15 }
 0x4c8   :  { %v2114_v19 = vadd.f32 1.0, %v4228_v18 }
 0x4ca   :  { %4229 = vrcp.f32 %v2114_v19  ;;  %3969 = vmatmul.mubr.msk.f32.gmra.mxu0 %vm397_vm3, %v5453_v60 }
 0x4cb   :  { %4010 = vmatprep.mubr.msk.f32.mxu0 %vm4442_vm2, %v4441_v15 }
 0x4d7   :  { %v4230_v20 = vpop.eup %4229 }
 0x4d8   :  { %2117 = vst.msk [vmem:[#allocation5 + $0x2] sm:$0x1] %vm1700_vm5, %v4230_v20 }
 0x56a   :  { %v2184_v52 = vpop.f32.mrf.mxu0 }
 0x56b   :  { %v2238_v2 = vadd.f32 %v2229_v21, %v2184_v52 }
 0x56c   :  { %v3946_v22 = vpop.f32.mrf.mxu0 }
 0x56d   :  { %v3322_v25 = vmul.f32 -1.442695, %v2238_v2 }
 0x56e   :  { %v2189_v26 = vpop.f32.mrf.mxu0 }
 0x56f   :  { %4231 = vpow2.f32 %v3322_v25  ;;  %v2239_v27 = vadd.f32 %v2230_v34, %v2189_v26  ;;  %v2235_v26 = vld [vmem:[#allocation2 + $0x108] sm:$0xff] }
 0x570   :  { %v3949_v28 = vpop.f32.mrf.mxu0 }
 0x571   :  { %v3323_v29 = vmul.f32 -1.442695, %v2239_v27 }
 0x572   :  { %v2194_v30 = vpop.f32.mrf.mxu0 }
 0x573   :  { %4233 = vpow2.f32 %v3323_v29  ;;  %v2240_v33 = vadd.f32 %v2231_v31, %v2194_v30 }
 0x574   :  { %v3952_v36 = vpop.f32.mrf.mxu0 }
 0x575   :  { %v3324_v37 = vmul.f32 -1.442695, %v2240_v33  ;;  %v2236_v33 = vld [vmem:[#allocation2 + $0x110] sm:$0xff] }
 0x576   :  { %v2199_v38 = vpop.f32.mrf.mxu0 }
 0x577   :  { %4235 = vpow2.f32 %v3324_v37  ;;  %v2259_v41 = vadd.f32 %v2232_v4, %v2199_v38 }
 0x578   :  { %v3955_v43 = vpop.f32.mrf.mxu0 }
 0x579   :  { %v3325_v42 = vmul.f32 -1.442695, %v2259_v41  ;;  %v2237_v41 = vld [vmem:[#allocation2 + $0x118] sm:$0xff] }
 0x57a   :  { %v2204_v45 = vpop.f32.mrf.mxu0 }
 0x57b   :  { %4237 = vpow2.f32 %v3325_v42  ;;  %v2260_v47 = vadd.f32 %v2233_v46, %v2204_v45 }
 0x57c   :  { %v4232_v51 = vpop.eup %4231  ;;  %v3958_v53 = vpop.f32.mrf.mxu0 }
 0x57d   :  { %v2250_v54 = vadd.f32 1.0, %v4232_v51  ;;  %v3326_v5 = vmul.f32 -1.442695, %v2260_v47 }
 0x57e   :  { %v2209_v7 = vpop.f32.mrf.mxu0 }
 0x57f   :  { %4239 = vrcp.f32 %v2250_v54  ;;  %v2261_v9 = vadd.f32 %v2234_v35, %v2209_v7 }
 0x580   :  { %v4234_v39 = vpop.eup %4233  ;;  %4241 = vpow2.f32 %v3326_v5  ;;  %v3961_v10 = vpop.f32.mrf.mxu0 }
 0x581   :  { %v2251_v49 = vadd.f32 1.0, %v4234_v39  ;;  %v3327_v59 = vmul.f32 -1.442695, %v2261_v9 }
 0x582   :  { %v2214_v61 = vpop.f32.mrf.mxu0 }
 0x583   :  { %4243 = vrcp.f32 %v2251_v49  ;;  %v2280_v20 = vadd.f32 %v2214_v61, %v5272_v6 }
 0x584   :  { %v4236_v62 = vpop.eup %4235  ;;  %4245 = vpow2.f32 %v3327_v59  ;;  %v3964_v63 = vpop.f32.mrf.mxu0 }
 0x585   :  { %v2252_v0 = vadd.f32 1.0, %v4236_v62 }
 0x586   :  { %v2219_v1 = vpop.f32.mrf.mxu0 }
 0x587   :  { %4247 = vrcp.f32 %v2252_v0  ;;  %v2281_v27 = vadd.f32 %v2219_v1, %v5275_v12 }
 0x588   :  { %v4238_v44 = vpop.eup %4237  ;;  %v3967_v17 = vpop.f32.mrf.mxu0 }
 0x589   :  { %v2271_v18 = vadd.f32 1.0, %v4238_v44 }
 0x58a   :  { %v2224_v19 = vpop.f32.mrf.mxu0 }
 0x58b   :  { %4249 = vrcp.f32 %v2271_v18  ;;  %v2282_v37 = vadd.f32 %v2224_v19, %v5270_v48 }
 0x58c   :  { %v4240_v52 = vpop.eup %4239  ;;  %v3970_v21 = vpop.f32.mrf.mxu0 }
 0x58d   :  { %v4242_v2 = vpop.eup %4241  ;;  %v2283_v22 = vmul.f32 %v4240_v52, %v2280_v20 }
 0x58e   :  { %v2272_v25 = vadd.f32 1.0, %v4242_v2 }
 0x58f   :  { %v2286_v34 = vadd.f32 %v2283_v22, %v2235_v26 }
 0x590   :  { %v4244_v28 = vpop.eup %4243  ;;  %4251 = vrcp.f32 %v2272_v25 }
 0x591   :  { %v4246_v29 = vpop.eup %4245  ;;  %4253 = vtanh.f32 %v2286_v34  ;;  %v2284_v30 = vmul.f32 %v4244_v28, %v2281_v27 }
 0x592   :  { %v2273_v31 = vadd.f32 1.0, %v4246_v29 }
 0x593   :  { %v2287_v36 = vadd.f32 %v2284_v30, %v2236_v33  ;;  %v2437_v30 = vld [vmem:[#allocation2 + $0x120] sm:$0xff] }
 0x594   :  { %v4248_v38 = vpop.eup %4247  ;;  %4255 = vrcp.f32 %v2273_v31 }
 0x595   :  { %4257 = vtanh.f32 %v2287_v36  ;;  %v2285_v4 = vmul.f32 %v4248_v38, %v2282_v37  ;;  %v2438_v38 = vld [vmem:[#allocation2 + $0x128] sm:$0xff] }
 0x597   :  { %v2288_v43 = vadd.f32 %v2285_v4, %v2237_v41 }
 0x598   :  { %v4250_v42 = vpop.eup %4249 }
 0x599   :  { %4259 = vtanh.f32 %v2288_v43  ;;  %v2292_v46 = vsub.f32 1.0, %v4250_v42  ;;  %v2298_v5 = vmul.f32 %v4250_v42, %v5465_v56 }
 0x59d   :  { %v4252_v45 = vpop.eup %4251 }
 0x59e   :  { %v4254_v47 = vpop.eup %4253  ;;  %v2293_v54 = vsub.f32 1.0, %v4252_v45  ;;  %v2299_v9 = vmul.f32 %v4252_v45, %v5467_v57  ;;  %v2439_v45 = vld [vmem:[#allocation2 + $0x130] sm:$0xff] }
 0x59f   :  { %v2295_v51 = vmul.f32 %v4254_v47, %v2292_v46 }
 0x5a1   :  { %v4256_v53 = vpop.eup %4255  ;;  %v5530_v39 = vadd.f32 %v2298_v5, %v2295_v51 }
 0x5a2   :  { %v4258_v7 = vpop.eup %4257  ;;  %v2294_v10 = vsub.f32 1.0, %v4256_v53  ;;  %v2300_v62 = vmul.f32 %v4256_v53, %v5474_v32 }
 0x5a3   :  { %v2296_v35 = vmul.f32 %v4258_v7, %v2293_v54  ;;  %v2304_v0 = vmul.f32 %v5530_v39, %v5283_v40  ;;  %v2440_v54 = vld [vmem:[#allocation2 + $0x138] sm:$0xff] }
 0x5a5   :  { %v5532_v49 = vadd.f32 %v2299_v9, %v2296_v35  ;;  %v2307_v44 = vsel %vm1329_vm4, %v2304_v0, 0.0 }
 0x5a6   :  { %v4260_v59 = vpop.eup %4259 }
 0x5a7   :  { %v2297_v61 = vmul.f32 %v4260_v59, %v2294_v10  ;;  %v2305_v63 = vmul.f32 %v5532_v49, %v5287_v8  ;;  %v2441_v10 = vld [vmem:[#allocation2 + $0x140] sm:$0xff] }
 0x5a9   :  { %v5539_v56 = vadd.f32 %v2300_v62, %v2297_v61  ;;  %v2308_v1 = vsel %vm1329_vm4, %v2305_v63, 0.0 }
 0x5aa   :  { %v2309_v32 = vadd.f32 %v2308_v1, %v2307_v44 }
 0x5ab   :  { %v2306_v57 = vmul.f32 %v5539_v56, %v5297_v3  ;;  %3972 = vmatpush3.msra.mxu1 %v5539_v56 }
 0x5ac   :  { %3973 = vmatprep.subr.mxu1 %v4441_v15 }
 0x5ad   :  { %v2310_v17 = vsel %vm1329_vm4, %v2306_v57, 0.0  ;;  %3974 = vmatpush3.msra.mxu1 %v5532_v49  ;;  %v2442_v57 = vld [vmem:[#allocation2 + $0x148] sm:$0xff] }
 0x5ae   :  { %3975 = vmatprep.subr.mxu1 %v4441_v15  ;;  %v2311_v18 = vadd.f32 %v2310_v17, %v2309_v32 }
 0x5af   :  { %3976 = vmatpush3.msra.mxu1 %v5530_v39 }
 0x5b0   :  { %v2312_v19 = vrot.slane %v2311_v18, 4  ;;  %3978 = vmatmul.mubr.msk.f32.vlgmr.msra.gmra.mxu1 %vm397_vm3, %v5379_v50  ;;  %4037 = vmatprep.subr.mxu1 %v4441_v15 }
 0x5b1   :  { %3980 = vmatprep.mubr.msk.f32.mxu1 %vm4442_vm2, %v4441_v15 }
 0x5b2   :  { %v2313_v20 = vadd.f32 %v2312_v19, %v2311_v18 }
 0x5b4   :  { %v2314_v52 = vrot.slane %v2313_v20, 2  ;;  %3981 = vmatmul.mubr.msk.f32.gmra.mxu1 %vm397_vm3, %v5389_v55 }
 0x5b5   :  { %3983 = vmatprep.mubr.msk.f32.mxu1 %vm4442_vm2, %v4441_v15 }
 0x5b6   :  { %v2315_v21 = vadd.f32 %v2314_v52, %v2313_v20 }
 0x5b8   :  { %v2316_v2 = vrot.slane %v2315_v21, 1  ;;  %3984 = vmatmul.mubr.msk.f32.gmra.mxu1 %vm397_vm3, %v5398_v23 }
 0x5b9   :  { %3986 = vmatprep.mubr.msk.f32.mxu1 %vm4442_vm2, %v4441_v15 }
 0x5ba   :  { %v2317_v22 = vadd.f32 %v2316_v2, %v2315_v21 }
 0x5bc   :  { %v2318_v25 = vadd.f32 %v2317_v22, %v5322_v58  ;;  %3987 = vmatmul.mubr.msk.f32.gmra.mxu1 %vm397_vm3, %v5408_v24 }
 0x5bd   :  { %3989 = vmatprep.mubr.msk.f32.mxu1 %vm4442_vm2, %v4441_v15 }
 0x5be   :  { %v3328_v26 = vmul.f32 -1.442695, %v2318_v25 }
 0x5c0   :  { %4261 = vpow2.f32 %v3328_v26  ;;  %3990 = vmatmul.mubr.msk.f32.gmra.mxu1 %vm397_vm3, %v5417_v11 }
 0x5c1   :  { %3992 = vmatprep.mubr.msk.f32.mxu1 %vm4442_vm2, %v4441_v15 }
 0x5c4   :  { %3993 = vmatmul.mubr.msk.f32.gmra.mxu1 %vm397_vm3, %v5426_v13 }
 0x5c5   :  { %3995 = vmatprep.mubr.msk.f32.mxu1 %vm4442_vm2, %v4441_v15 }
 0x5c8   :  { %3996 = vmatmul.mubr.msk.f32.gmra.mxu1 %vm397_vm3, %v5435_v14 }
 0x5c9   :  { %3998 = vmatprep.mubr.msk.f32.mxu1 %vm4442_vm2, %v4441_v15 }
 0x5cc   :  { %3999 = vmatmul.mubr.msk.f32.gmra.mxu1 %vm397_vm3, %v5444_v16 }
 0x5cd   :  { %v4262_v34 = vpop.eup %4261  ;;  %4001 = vmatprep.mubr.msk.f32.mxu1 %vm4442_vm2, %v4441_v15 }
 0x5ce   :  { %v2322_v27 = vadd.f32 1.0, %v4262_v34 }
 0x5d0   :  { %4263 = vrcp.f32 %v2322_v27  ;;  %4002 = vmatmul.mubr.msk.f32.gmra.mxu1 %vm397_vm3, %v5453_v60 }
 0x5d1   :  { %4043 = vmatprep.mubr.msk.f32.mxu1 %vm4442_vm2, %v4441_v15 }
 0x5dd   :  { %v4264_v28 = vpop.eup %4263 }
 0x5de   :  { %2325 = vst.msk [vmem:[#allocation5 + $0x3] sm:$0x1] %vm1700_vm5, %v4264_v28 }
 0x670   :  { %v2392_v29 = vpop.f32.mrf.mxu1 }
 0x671   :  { %v2446_v31 = vadd.f32 %v2437_v30, %v2392_v29 }
 0x672   :  { %v3979_v33 = vpop.f32.mrf.mxu1 }
 0x673   :  { %v3338_v36 = vmul.f32 -1.442695, %v2446_v31 }
 0x674   :  { %v2397_v37 = vpop.f32.mrf.mxu1 }
 0x675   :  { %4265 = vpow2.f32 %v3338_v36  ;;  %v2447_v4 = vadd.f32 %v2438_v38, %v2397_v37  ;;  %v2443_v37 = vld [vmem:[#allocation2 + $0x150] sm:$0xff] }
 0x676   :  { %v3982_v41 = vpop.f32.mrf.mxu1 }
 0x677   :  { %v3339_v43 = vmul.f32 -1.442695, %v2447_v4 }
 0x678   :  { %v2402_v42 = vpop.f32.mrf.mxu1 }
 0x679   :  { %4267 = vpow2.f32 %v3339_v43  ;;  %v2448_v46 = vadd.f32 %v2439_v45, %v2402_v42 }
 0x67a   :  { %v3985_v47 = vpop.f32.mrf.mxu1 }
 0x67b   :  { %v3340_v51 = vmul.f32 -1.442695, %v2448_v46  ;;  %v2444_v46 = vld [vmem:[#allocation2 + $0x158] sm:$0xff] }
 0x67c   :  { %v2407_v53 = vpop.f32.mrf.mxu1 }
 0x67d   :  { %4269 = vpow2.f32 %v3340_v51  ;;  %v2467_v5 = vadd.f32 %v2440_v54, %v2407_v53 }
 0x67e   :  { %v3988_v7 = vpop.f32.mrf.mxu1 }
 0x67f   :  { %v3341_v35 = vmul.f32 -1.442695, %v2467_v5  ;;  %v2445_v5 = vld [vmem:[#allocation2 + $0x160] sm:$0xff] }
 0x680   :  { %v2412_v9 = vpop.f32.mrf.mxu1 }
 0x681   :  { %4271 = vpow2.f32 %v3341_v35  ;;  %v2468_v59 = vadd.f32 %v2441_v10, %v2412_v9 }
 0x682   :  { %v4266_v61 = vpop.eup %4265  ;;  %v3991_v62 = vpop.f32.mrf.mxu1 }
 0x683   :  { %v2458_v63 = vadd.f32 1.0, %v4266_v61  ;;  %v3342_v0 = vmul.f32 -1.442695, %v2468_v59 }
 0x684   :  { %v2417_v1 = vpop.f32.mrf.mxu1 }
 0x685   :  { %4273 = vrcp.f32 %v2458_v63  ;;  %v2469_v44 = vadd.f32 %v2442_v57, %v2417_v1 }
 0x686   :  { %v4268_v32 = vpop.eup %4267  ;;  %4275 = vpow2.f32 %v3342_v0  ;;  %v3994_v17 = vpop.f32.mrf.mxu1 }
 0x687   :  { %v2459_v18 = vadd.f32 1.0, %v4268_v32  ;;  %v3343_v19 = vmul.f32 -1.442695, %v2469_v44 }
 0x688   :  { %v2422_v20 = vpop.f32.mrf.mxu1 }
 0x689   :  { %4277 = vrcp.f32 %v2459_v18  ;;  %v2488_v28 = vadd.f32 %v2422_v20, %v5272_v6 }
 0x68a   :  { %v4270_v52 = vpop.eup %4269  ;;  %4279 = vpow2.f32 %v3343_v19  ;;  %v3997_v21 = vpop.f32.mrf.mxu1 }
 0x68b   :  { %v2460_v2 = vadd.f32 1.0, %v4270_v52 }
 0x68c   :  { %v2427_v22 = vpop.f32.mrf.mxu1 }
 0x68d   :  { %4281 = vrcp.f32 %v2460_v2  ;;  %v2489_v4 = vadd.f32 %v2427_v22, %v5275_v12 }
 0x68e   :  { %v4272_v25 = vpop.eup %4271  ;;  %v4000_v26 = vpop.f32.mrf.mxu1 }
 0x68f   :  { %v2479_v34 = vadd.f32 1.0, %v4272_v25 }
 0x690   :  { %v2432_v27 = vpop.f32.mrf.mxu1 }
 0x691   :  { %4283 = vrcp.f32 %v2479_v34  ;;  %v2490_v51 = vadd.f32 %v2432_v27, %v5270_v48 }
 0x692   :  { %v4274_v29 = vpop.eup %4273  ;;  %v4003_v30 = vpop.f32.mrf.mxu1 }
 0x693   :  { %v4276_v31 = vpop.eup %4275  ;;  %v2491_v33 = vmul.f32 %v4274_v29, %v2488_v28 }
 0x694   :  { %v2480_v36 = vadd.f32 1.0, %v4276_v31 }
 0x695   :  { %v2494_v38 = vadd.f32 %v2491_v33, %v2443_v37 }
 0x696   :  { %v4278_v41 = vpop.eup %4277  ;;  %4285 = vrcp.f32 %v2480_v36 }
 0x697   :  { %v4280_v43 = vpop.eup %4279  ;;  %4287 = vtanh.f32 %v2494_v38  ;;  %v2492_v42 = vmul.f32 %v4278_v41, %v2489_v4  ;;  %v2646_v4 = vld [vmem:[#allocation2 + $0x170] sm:$0xff] }
 0x698   :  { %v2481_v45 = vadd.f32 1.0, %v4280_v43 }
 0x699   :  { %v2495_v47 = vadd.f32 %v2492_v42, %v2444_v46  ;;  %v2647_v46 = vld [vmem:[#allocation2 + $0x178] sm:$0xff] }
 0x69a   :  { %v4282_v53 = vpop.eup %4281  ;;  %4289 = vrcp.f32 %v2481_v45 }
 0x69b   :  { %4291 = vtanh.f32 %v2495_v47  ;;  %v2493_v54 = vmul.f32 %v4282_v53, %v2490_v51 }
 0x69d   :  { %v2496_v7 = vadd.f32 %v2493_v54, %v2445_v5  ;;  %v2648_v54 = vld [vmem:[#allocation2 + $0x180] sm:$0xff] }
 0x69e   :  { %v4284_v35 = vpop.eup %4283 }
 0x69f   :  { %4293 = vtanh.f32 %v2496_v7  ;;  %v2500_v10 = vsub.f32 1.0, %v4284_v35  ;;  %v2506_v0 = vmul.f32 %v4284_v35, %v5530_v39 }
 0x6a3   :  { %v4286_v9 = vpop.eup %4285 }
 0x6a4   :  { %v4288_v59 = vpop.eup %4287  ;;  %v2501_v63 = vsub.f32 1.0, %v4286_v9  ;;  %v2507_v44 = vmul.f32 %v4286_v9, %v5532_v49 }
 0x6a5   :  { %v2503_v61 = vmul.f32 %v4288_v59, %v2500_v10  ;;  %v2649_v10 = vld [vmem:[#allocation2 + $0x188] sm:$0xff] }
 0x6a7   :  { %v4290_v62 = vpop.eup %4289  ;;  %v5595_v32 = vadd.f32 %v2506_v0, %v2503_v61 }
 0x6a8   :  { %v4292_v1 = vpop.eup %4291  ;;  %v2502_v17 = vsub.f32 1.0, %v4290_v62  ;;  %v2508_v52 = vmul.f32 %v4290_v62, %v5539_v56 }
 0x6a9   :  { %v2504_v57 = vmul.f32 %v4292_v1, %v2501_v63  ;;  %v2512_v2 = vmul.f32 %v5595_v32, %v5283_v40 }
 0x6ab   :  { %v5597_v18 = vadd.f32 %v2507_v44, %v2504_v57  ;;  %v2515_v25 = vsel %vm1329_vm4, %v2512_v2, 0.0  ;;  %v2650_v57 = vld [vmem:[#allocation2 + $0x190] sm:$0xff] }
 0x6ac   :  { %v4294_v19 = vpop.eup %4293 }
 0x6ad   :  { %v2505_v20 = vmul.f32 %v4294_v19, %v2502_v17  ;;  %v2513_v21 = vmul.f32 %v5597_v18, %v5287_v8 }
 0x6af   :  { %v5604_v39 = vadd.f32 %v2508_v52, %v2505_v20  ;;  %v2516_v22 = vsel %vm1329_vm4, %v2513_v21, 0.0 }
 0x6b0   :  { %v2517_v56 = vadd.f32 %v2516_v22, %v2515_v25 }
 0x6b1   :  { %v2514_v49 = vmul.f32 %v5604_v39, %v5297_v3  ;;  %4005 = vmatpush3.msra.mxu0 %v5604_v39 }
 0x6b2   :  { %4006 = vmatprep.subr.mxu0 %v4441_v15 }
 0x6b3   :  { %v2518_v26 = vsel %vm1329_vm4, %v2514_v49, 0.0  ;;  %4007 = vmatpush3.msra.mxu0 %v5597_v18 }
 0x6b4   :  { %4008 = vmatprep.subr.mxu0 %v4441_v15  ;;  %v2519_v34 = vadd.f32 %v2518_v26, %v2517_v56 }
 0x6b5   :  { %4009 = vmatpush3.msra.mxu0 %v5595_v32 }
 0x6b6   :  { %v2520_v27 = vrot.slane %v2519_v34, 4  ;;  %4011 = vmatmul.mubr.msk.f32.vlgmr.msra.gmra.mxu0 %vm397_vm3, %v5379_v50  ;;  %4070 = vmatprep.subr.mxu0 %v4441_v15 }
 0x6b7   :  { %4013 = vmatprep.mubr.msk.f32.mxu0 %vm4442_vm2, %v4441_v15 }
 0x6b8   :  { %v2521_v28 = vadd.f32 %v2520_v27, %v2519_v34 }
 0x6ba   :  { %v2522_v29 = vrot.slane %v2521_v28, 2  ;;  %4014 = vmatmul.mubr.msk.f32.gmra.mxu0 %vm397_vm3, %v5389_v55 }
 0x6bb   :  { %4016 = vmatprep.mubr.msk.f32.mxu0 %vm4442_vm2, %v4441_v15 }
 0x6bc   :  { %v2523_v30 = vadd.f32 %v2522_v29, %v2521_v28 }
 0x6be   :  { %v2524_v31 = vrot.slane %v2523_v30, 1  ;;  %4017 = vmatmul.mubr.msk.f32.gmra.mxu0 %vm397_vm3, %v5398_v23 }
 0x6bf   :  { %4019 = vmatprep.mubr.msk.f32.mxu0 %vm4442_vm2, %v4441_v15 }
 0x6c0   :  { %v2525_v50 = vadd.f32 %v2524_v31, %v2523_v30 }
 0x6c2   :  { %v2526_v33 = vadd.f32 %v2525_v50, %v5322_v58  ;;  %4020 = vmatmul.mubr.msk.f32.gmra.mxu0 %vm397_vm3, %v5408_v24 }
 0x6c3   :  { %4022 = vmatprep.mubr.msk.f32.mxu0 %vm4442_vm2, %v4441_v15 }
 0x6c4   :  { %v3344_v55 = vmul.f32 -1.442695, %v2526_v33 }
 0x6c6   :  { %4295 = vpow2.f32 %v3344_v55  ;;  %4023 = vmatmul.mubr.msk.f32.gmra.mxu0 %vm397_vm3, %v5417_v11  ;;  %v2651_v55 = vld [vmem:[#allocation2 + $0x198] sm:$0xff] }
 0x6c7   :  { %4025 = vmatprep.mubr.msk.f32.mxu0 %vm4442_vm2, %v4441_v15 }
 0x6ca   :  { %4026 = vmatmul.mubr.msk.f32.gmra.mxu0 %vm397_vm3, %v5426_v13 }
 0x6cb   :  { %4028 = vmatprep.mubr.msk.f32.mxu0 %vm4442_vm2, %v4441_v15 }
 0x6ce   :  { %4029 = vmatmul.mubr.msk.f32.gmra.mxu0 %vm397_vm3, %v5435_v14  ;;  %v2645_v14 = vld [vmem:[#allocation2 + $0x168] sm:$0xff] }
 0x6cf   :  { %4031 = vmatprep.mubr.msk.f32.mxu0 %vm4442_vm2, %v4441_v15 }
 0x6d2   :  { %4032 = vmatmul.mubr.msk.f32.gmra.mxu0 %vm397_vm3, %v5444_v16 }
 0x6d3   :  { %v4296_v23 = vpop.eup %4295  ;;  %4034 = vmatprep.mubr.msk.f32.mxu0 %vm4442_vm2, %v4441_v15 }
 0x6d4   :  { %v2530_v24 = vadd.f32 1.0, %v4296_v23 }
 0x6d6   :  { %4297 = vrcp.f32 %v2530_v24  ;;  %4035 = vmatmul.mubr.msk.f32.gmra.mxu0 %vm397_vm3, %v5453_v60 }
 0x6d7   :  { %4076 = vmatprep.mubr.msk.f32.mxu0 %vm4442_vm2, %v4441_v15 }
 0x6e3   :  { %v4298_v11 = vpop.eup %4297 }
 0x6e4   :  { %2533 = vst.msk [vmem:[#allocation5 + $0x4] sm:$0x1] %vm1700_vm5, %v4298_v11 }
 0x776   :  { %v2600_v13 = vpop.f32.mrf.mxu0 }
 0x777   :  { %v2654_v36 = vadd.f32 %v2645_v14, %v2600_v13 }
 0x778   :  { %v4012_v37 = vpop.f32.mrf.mxu0 }
 0x779   :  { %v3354_v16 = vmul.f32 -1.442695, %v2654_v36  ;;  %v2652_v37 = vld [vmem:[#allocation2 + $0x1a0] sm:$0xff] }
 0x77a   :  { %v2605_v38 = vpop.f32.mrf.mxu0 }
 0x77b   :  { %4299 = vpow2.f32 %v3354_v16  ;;  %v2655_v41 = vadd.f32 %v2646_v4, %v2605_v38 }
 0x77c   :  { %v4015_v43 = vpop.f32.mrf.mxu0 }
 0x77d   :  { %v3355_v42 = vmul.f32 -1.442695, %v2655_v41  ;;  %v2653_v43 = vld [vmem:[#allocation2 + $0x1a8] sm:$0xff] }
 0x77e   :  { %v2610_v45 = vpop.f32.mrf.mxu0 }
 0x77f   :  { %4301 = vpow2.f32 %v3355_v42  ;;  %v2656_v60 = vadd.f32 %v2647_v46, %v2610_v45 }
 0x780   :  { %v4018_v47 = vpop.f32.mrf.mxu0 }
 0x781   :  { %v3356_v51 = vmul.f32 -1.442695, %v2656_v60 }
 0x782   :  { %v2615_v53 = vpop.f32.mrf.mxu0 }
 0x783   :  { %4303 = vpow2.f32 %v3356_v51  ;;  %v2675_v5 = vadd.f32 %v2648_v54, %v2615_v53 }
 0x784   :  { %v4021_v7 = vpop.f32.mrf.mxu0 }
 0x785   :  { %v3357_v35 = vmul.f32 -1.442695, %v2675_v5 }
 0x786   :  { %v2620_v9 = vpop.f32.mrf.mxu0 }
 0x787   :  { %4305 = vpow2.f32 %v3357_v35  ;;  %v2676_v59 = vadd.f32 %v2649_v10, %v2620_v9 }
 0x788   :  { %v4300_v61 = vpop.eup %4299  ;;  %v4024_v62 = vpop.f32.mrf.mxu0 }
 0x789   :  { %v2666_v63 = vadd.f32 1.0, %v4300_v61  ;;  %v3358_v0 = vmul.f32 -1.442695, %v2676_v59 }
 0x78a   :  { %v2625_v1 = vpop.f32.mrf.mxu0 }
 0x78b   :  { %4307 = vrcp.f32 %v2666_v63  ;;  %v2677_v44 = vadd.f32 %v2650_v57, %v2625_v1 }
 0x78c   :  { %v4302_v17 = vpop.eup %4301  ;;  %4309 = vpow2.f32 %v3358_v0  ;;  %v4027_v19 = vpop.f32.mrf.mxu0 }
 0x78d   :  { %v2667_v20 = vadd.f32 1.0, %v4302_v17  ;;  %v3359_v52 = vmul.f32 -1.442695, %v2677_v44 }
 0x78e   :  { %v2630_v21 = vpop.f32.mrf.mxu0 }
 0x78f   :  { %4311 = vrcp.f32 %v2667_v20  ;;  %v2696_v28 = vadd.f32 %v2630_v21, %v5272_v6  ;;  %v5684_v21 = vld [vmem:[%s5848_s4] sm:$0xff] }
 0x790   :  { %v4304_v2 = vpop.eup %4303  ;;  %4313 = vpow2.f32 %v3359_v52  ;;  %v4030_v22 = vpop.f32.mrf.mxu0 }
 0x791   :  { %v2668_v49 = vadd.f32 1.0, %v4304_v2 }
 0x792   :  { %v2635_v25 = vpop.f32.mrf.mxu0 }
 0x793   :  { %4315 = vrcp.f32 %v2668_v49  ;;  %v2697_v24 = vadd.f32 %v2635_v25, %v5275_v12  ;;  %v5693_v49 = vld [vmem:[%s5848_s4 + $0x8] sm:$0xff] }
 0x794   :  { %v4306_v56 = vpop.eup %4305  ;;  %v4033_v26 = vpop.f32.mrf.mxu0 }
 0x795   :  { %v2687_v34 = vadd.f32 1.0, %v4306_v56  ;;  %v5702_v26 = vld [vmem:[%s5848_s4 + $0x10] sm:$0xff] }
 0x796   :  { %v2640_v27 = vpop.f32.mrf.mxu0 }
 0x797   :  { %4317 = vrcp.f32 %v2687_v34  ;;  %v2698_v38 = vadd.f32 %v2640_v27, %v5270_v48 }
 0x798   :  { %v4308_v29 = vpop.eup %4307  ;;  %v4036_v30 = vpop.f32.mrf.mxu0 }
 0x799   :  { %v4310_v31 = vpop.eup %4309  ;;  %v2699_v50 = vmul.f32 %v4308_v29, %v2696_v28  ;;  %v5712_v28 = vld [vmem:[%s5848_s4 + $0x18] sm:$0xff]  ;;  %v5721_v30 = vld [vmem:[%s5848_s4 + $0x20] sm:$0xff] }
 0x79a   :  { %v2688_v33 = vadd.f32 1.0, %v4310_v31  ;;  %v5730_v31 = vld [vmem:[%s5848_s4 + $0x28] sm:$0xff] }
 0x79b   :  { %v2702_v23 = vadd.f32 %v2699_v50, %v2651_v55  ;;  %v5739_v50 = vld [vmem:[%s5848_s4 + $0x30] sm:$0xff] }
 0x79c   :  { %v4312_v11 = vpop.eup %4311  ;;  %4319 = vrcp.f32 %v2688_v33  ;;  %v5748_v33 = vld [vmem:[%s5848_s4 + $0x38] sm:$0xff] }
 0x79d   :  { %v4314_v13 = vpop.eup %4313  ;;  %4321 = vtanh.f32 %v2702_v23  ;;  %v2700_v14 = vmul.f32 %v4312_v11, %v2697_v24  ;;  %v5757_v24 = vld [vmem:[%s5848_s4 + $0x40] sm:$0xff]  ;;  %s4446_s4 = smov [#allocation5]  }
 0x79e   :  { %v2689_v36 = vadd.f32 1.0, %v4314_v13  ;;  %s3167_s10 = sshll.u32 %s4446_s4, 4  ;;  %s3168_s10 = int_to_ptr.vmem [resolvable:$true] %s3167_s10 }
 0x79f   :  { %v2703_v16 = vadd.f32 %v2700_v14, %v2652_v37  ;;  %v2853_v14 = vld [vmem:[#allocation2 + $0x1b0] sm:$0xff]  ;;  %s4419_s5 = scalar_lea.vmem %s3168_s10, 128  ;;  %p4424_p1 = scmp.lt.s32.totalorder %s3168_s10, %s3168_s10 }
 0x7a0   :  { %v4316_v4 = vpop.eup %4315  ;;  %4323 = vrcp.f32 %v2689_v36  ;;  %p4420_p0 = scmp.ne.s32.totalorder %s3168_s10, %s4419_s5  ;;  %p4425_p2 = scmp.lt.s32.totalorder %s4419_s5, %s4419_s5 }
 0x7a1   :  { %4325 = vtanh.f32 %v2703_v16  ;;  %v2701_v41 = vmul.f32 %v4316_v4, %v2698_v38  ;;  %v2854_v4 = vld [vmem:[#allocation2 + $0x1b8] sm:$0xff] }
 0x7a2   :  { %p4426_p3 = por %p4425_p2, %p4424_p1 }
 0x7a3   :  { %v2704_v42 = vadd.f32 %v2701_v41, %v2653_v43 }
 0x7a4   :  { %v4318_v45 = vpop.eup %4317  ;;  %p4427_p4 = pnand %p4426_p3, %p4420_p0 }
 0x7a5   :  { %4327 = vtanh.f32 %v2704_v42  ;;  %v2708_v60 = vsub.f32 1.0, %v4318_v45  ;;  %v2714_v5 = vmul.f32 %v4318_v45, %v5595_v32 }
 0x7a9   :  { %v4320_v46 = vpop.eup %4319 }
 0x7aa   :  { %v4322_v47 = vpop.eup %4321  ;;  %v2709_v54 = vsub.f32 1.0, %v4320_v46  ;;  %v2715_v9 = vmul.f32 %v4320_v46, %v5597_v18  ;;  %v2855_v46 = vld [vmem:[#allocation2 + $0x1c0] sm:$0xff] }
 0x7ab   :  { %v2711_v51 = vmul.f32 %v4322_v47, %v2708_v60 }
 0x7ad   :  { %v4324_v53 = vpop.eup %4323  ;;  %v5660_v10 = vadd.f32 %v2714_v5, %v2711_v51 }
 0x7ae   :  { %v4326_v7 = vpop.eup %4325  ;;  %v2710_v59 = vsub.f32 1.0, %v4324_v53  ;;  %v2716_v0 = vmul.f32 %v4324_v53, %v5604_v39 }
 0x7af   :  { %v2712_v35 = vmul.f32 %v4326_v7, %v2709_v54  ;;  %v2720_v57 = vmul.f32 %v5660_v10, %v5283_v40  ;;  %v2856_v54 = vld [vmem:[#allocation2 + $0x1c8] sm:$0xff] }
 0x7b1   :  { %v5662_v61 = vadd.f32 %v2715_v9, %v2712_v35  ;;  %v2723_v17 = vsel %vm1329_vm4, %v2720_v57, 0.0 }
 0x7b2   :  { %v4328_v62 = vpop.eup %4327 }
 0x7b3   :  { %v2713_v63 = vmul.f32 %v4328_v62, %v2710_v59  ;;  %v2721_v1 = vmul.f32 %v5662_v61, %v5287_v8  ;;  %v2857_v59 = vld [vmem:[#allocation2 + $0x1d0] sm:$0xff] }
 0x7b5   :  { %v5669_v32 = vadd.f32 %v2716_v0, %v2713_v63  ;;  %v2724_v44 = vsel %vm1329_vm4, %v2721_v1, 0.0 }
 0x7b6   :  { %v2725_v39 = vadd.f32 %v2724_v44, %v2723_v17 }
 0x7b7   :  { %v2722_v18 = vmul.f32 %v5669_v32, %v5297_v3  ;;  %4038 = vmatpush3.msra.mxu1 %v5669_v32 }
 0x7b8   :  { %4039 = vmatprep.subr.mxu1 %v4441_v15 }
 0x7b9   :  { %v2726_v19 = vsel %vm1329_vm4, %v2722_v18, 0.0  ;;  %4040 = vmatpush3.msra.mxu1 %v5662_v61  ;;  %v2858_v18 = vld [vmem:[#allocation2 + $0x1d8] sm:$0xff] }
 0x7ba   :  { %4041 = vmatprep.subr.mxu1 %v4441_v15  ;;  %v2727_v20 = vadd.f32 %v2726_v19, %v2725_v39 }
 0x7bb   :  { %4042 = vmatpush3.msra.mxu1 %v5660_v10 }
 0x7bc   :  { %v2728_v52 = vrot.slane %v2727_v20, 4  ;;  %4044 = vmatmul.mubr.msk.f32.vlgmr.msra.gmra.mxu1 %vm397_vm3, %v5684_v21 }
 0x7bd   :  { %4046 = vmatprep.mubr.msk.f32.mxu1 %vm4442_vm2, %v4441_v15 }
 0x7be   :  { %v2729_v2 = vadd.f32 %v2728_v52, %v2727_v20 }
 0x7c0   :  { %v2730_v22 = vrot.slane %v2729_v2, 2  ;;  %4047 = vmatmul.mubr.msk.f32.gmra.mxu1 %vm397_vm3, %v5693_v49 }
 0x7c1   :  { %4049 = vmatprep.mubr.msk.f32.mxu1 %vm4442_vm2, %v4441_v15 }
 0x7c2   :  { %v2731_v25 = vadd.f32 %v2730_v22, %v2729_v2 }
 0x7c4   :  { %v2732_v56 = vrot.slane %v2731_v25, 1  ;;  %4050 = vmatmul.mubr.msk.f32.gmra.mxu1 %vm397_vm3, %v5702_v26 }
 0x7c5   :  { %4052 = vmatprep.mubr.msk.f32.mxu1 %vm4442_vm2, %v4441_v15 }
 0x7c6   :  { %v2733_v34 = vadd.f32 %v2732_v56, %v2731_v25 }
 0x7c8   :  { %v2734_v27 = vadd.f32 %v2733_v34, %v5322_v58  ;;  %4053 = vmatmul.mubr.msk.f32.gmra.mxu1 %vm397_vm3, %v5712_v28 }
 0x7c9   :  { %4055 = vmatprep.mubr.msk.f32.mxu1 %vm4442_vm2, %v4441_v15 }
 0x7ca   :  { %v3360_v29 = vmul.f32 -1.442695, %v2734_v27 }
 0x7cc   :  { %4329 = vpow2.f32 %v3360_v29  ;;  %4056 = vmatmul.mubr.msk.f32.gmra.mxu1 %vm397_vm3, %v5721_v30 }
 0x7cd   :  { %4058 = vmatprep.mubr.msk.f32.mxu1 %vm4442_vm2, %v4441_v15 }
 0x7d0   :  { %4059 = vmatmul.mubr.msk.f32.gmra.mxu1 %vm397_vm3, %v5730_v31 }
 0x7d1   :  { %4061 = vmatprep.mubr.msk.f32.mxu1 %vm4442_vm2, %v4441_v15 }
 0x7d4   :  { %4062 = vmatmul.mubr.msk.f32.gmra.mxu1 %vm397_vm3, %v5739_v50 }
 0x7d5   :  { %4064 = vmatprep.mubr.msk.f32.mxu1 %vm4442_vm2, %v4441_v15 }
 0x7d8   :  { %4065 = vmatmul.mubr.msk.f32.gmra.mxu1 %vm397_vm3, %v5748_v33 }
 0x7d9   :  { %v4330_v55 = vpop.eup %4329  ;;  %4067 = vmatprep.mubr.msk.f32.mxu1 %vm4442_vm2, %v4441_v15 }
 0x7da   :  { %v2738_v23 = vadd.f32 1.0, %v4330_v55 }
 0x7dc   :  { %4331 = vrcp.f32 %v2738_v23  ;;  %4068 = vmatmul.mubr.msk.f32.gmra.mxu1 %vm397_vm3, %v5757_v24 }
 0x7e9   :  { %v4332_v11 = vpop.eup %4331 }
 0x7ea   :  { %2741 = vst.msk [vmem:[#allocation5 + $0x5] sm:$0x1] %vm1700_vm5, %v4332_v11 }
 0x87c   :  { %v2808_v13 = vpop.f32.mrf.mxu1 }
 0x87d   :  { %v2862_v36 = vadd.f32 %v2853_v14, %v2808_v13 }
 0x87e   :  { %v4045_v37 = vpop.f32.mrf.mxu1 }
 0x87f   :  { %v3370_v16 = vmul.f32 -1.442695, %v2862_v36 }
 0x880   :  { %v2813_v38 = vpop.f32.mrf.mxu1 }
 0x881   :  { %4333 = vpow2.f32 %v3370_v16  ;;  %v2863_v41 = vadd.f32 %v2854_v4, %v2813_v38  ;;  %v2859_v38 = vld [vmem:[#allocation2 + $0x1e0] sm:$0xff] }
 0x882   :  { %v4048_v43 = vpop.f32.mrf.mxu1 }
 0x883   :  { %v3371_v42 = vmul.f32 -1.442695, %v2863_v41 }
 0x884   :  { %v2818_v45 = vpop.f32.mrf.mxu1 }
 0x885   :  { %4335 = vpow2.f32 %v3371_v42  ;;  %v2864_v60 = vadd.f32 %v2855_v46, %v2818_v45 }
 0x886   :  { %v4051_v47 = vpop.f32.mrf.mxu1 }
 0x887   :  { %v3372_v51 = vmul.f32 -1.442695, %v2864_v60  ;;  %v2860_v60 = vld [vmem:[#allocation2 + $0x1e8] sm:$0xff] }
 0x888   :  { %v2823_v53 = vpop.f32.mrf.mxu1 }
 0x889   :  { %4337 = vpow2.f32 %v3372_v51  ;;  %v2883_v5 = vadd.f32 %v2856_v54, %v2823_v53 }
 0x88a   :  { %v4054_v7 = vpop.f32.mrf.mxu1 }
 0x88b   :  { %v3373_v35 = vmul.f32 -1.442695, %v2883_v5  ;;  %v2861_v5 = vld [vmem:[#allocation2 + $0x1f0] sm:$0xff] }
 0x88c   :  { %v2828_v9 = vpop.f32.mrf.mxu1 }
 0x88d   :  { %4339 = vpow2.f32 %v3373_v35  ;;  %v2884_v62 = vadd.f32 %v2857_v59, %v2828_v9 }
 0x88e   :  { %v4334_v63 = vpop.eup %4333  ;;  %v4057_v0 = vpop.f32.mrf.mxu1 }
 0x88f   :  { %v2874_v1 = vadd.f32 1.0, %v4334_v63  ;;  %v3374_v57 = vmul.f32 -1.442695, %v2884_v62 }
 0x890   :  { %v2833_v44 = vpop.f32.mrf.mxu1 }
 0x891   :  { %4341 = vrcp.f32 %v2874_v1  ;;  %v2885_v17 = vadd.f32 %v2858_v18, %v2833_v44 }
 0x892   :  { %v4336_v39 = vpop.eup %4335  ;;  %4343 = vpow2.f32 %v3374_v57  ;;  %v4060_v19 = vpop.f32.mrf.mxu1 }
 0x893   :  { %v2875_v20 = vadd.f32 1.0, %v4336_v39  ;;  %v3375_v52 = vmul.f32 -1.442695, %v2885_v17 }
 0x894   :  { %v2838_v2 = vpop.f32.mrf.mxu1 }
 0x895   :  { %4345 = vrcp.f32 %v2875_v20  ;;  %v2904_v11 = vadd.f32 %v2838_v2, %v5272_v6 }
 0x896   :  { %v4338_v22 = vpop.eup %4337  ;;  %4347 = vpow2.f32 %v3375_v52  ;;  %v4063_v25 = vpop.f32.mrf.mxu1 }
 0x897   :  { %v2876_v56 = vadd.f32 1.0, %v4338_v22 }
 0x898   :  { %v2843_v34 = vpop.f32.mrf.mxu1 }
 0x899   :  { %4349 = vrcp.f32 %v2876_v56  ;;  %v2905_v41 = vadd.f32 %v2843_v34, %v5275_v12 }
 0x89a   :  { %v4340_v27 = vpop.eup %4339  ;;  %v4066_v29 = vpop.f32.mrf.mxu1 }
 0x89b   :  { %v2895_v55 = vadd.f32 1.0, %v4340_v27 }
 0x89c   :  { %v2848_v23 = vpop.f32.mrf.mxu1 }
 0x89d   :  { %4351 = vrcp.f32 %v2895_v55  ;;  %v2906_v51 = vadd.f32 %v2848_v23, %v5270_v48 }
 0x89e   :  { %v4342_v13 = vpop.eup %4341  ;;  %v4069_v14 = vpop.f32.mrf.mxu1 }
 0x89f   :  { %v4344_v36 = vpop.eup %4343  ;;  %v2907_v37 = vmul.f32 %v4342_v13, %v2904_v11 }
 0x8a0   :  { %v2896_v16 = vadd.f32 1.0, %v4344_v36 }
 0x8a1   :  { %v2910_v4 = vadd.f32 %v2907_v37, %v2859_v38 }
 0x8a2   :  { %v4346_v43 = vpop.eup %4345  ;;  %4353 = vrcp.f32 %v2896_v16 }
 0x8a3   :  { %v4348_v42 = vpop.eup %4347  ;;  %4355 = vtanh.f32 %v2910_v4  ;;  %v2908_v45 = vmul.f32 %v4346_v43, %v2905_v41  ;;  %v3062_v43 = vld [vmem:[#allocation2 + $0x200] sm:$0xff] }
 0x8a4   :  { %v2897_v46 = vadd.f32 1.0, %v4348_v42 }
 0x8a5   :  { %v2911_v47 = vadd.f32 %v2908_v45, %v2860_v60 }
 0x8a6   :  { %v4350_v53 = vpop.eup %4349  ;;  %4357 = vrcp.f32 %v2897_v46  ;;  %v3063_v46 = vld [vmem:[#allocation2 + $0x208] sm:$0xff] }
 0x8a7   :  { %4359 = vtanh.f32 %v2911_v47  ;;  %v2909_v54 = vmul.f32 %v4350_v53, %v2906_v51  ;;  %v3064_v53 = vld [vmem:[#allocation2 + $0x210] sm:$0xff] }
 0x8a9   :  { %v2912_v7 = vadd.f32 %v2909_v54, %v2861_v5 }
 0x8aa   :  { %v4352_v35 = vpop.eup %4351 }
 0x8ab   :  { %4361 = vtanh.f32 %v2912_v7  ;;  %v2916_v59 = vsub.f32 1.0, %v4352_v35  ;;  %v2922_v57 = vmul.f32 %v4352_v35, %v5660_v10 }
 0x8af   :  { %v4354_v9 = vpop.eup %4353 }
 0x8b0   :  { %v4356_v62 = vpop.eup %4355  ;;  %v2917_v1 = vsub.f32 1.0, %v4354_v9  ;;  %v2923_v17 = vmul.f32 %v4354_v9, %v5662_v61  ;;  %v3065_v9 = vld [vmem:[#allocation2 + $0x218] sm:$0xff] }
 0x8b1   :  { %v2919_v63 = vmul.f32 %v4356_v62, %v2916_v59 }
 0x8b3   :  { %v4358_v0 = vpop.eup %4357  ;;  %v5767_v39 = vadd.f32 %v2922_v57, %v2919_v63 }
 0x8b4   :  { %v4360_v44 = vpop.eup %4359  ;;  %v2918_v19 = vsub.f32 1.0, %v4358_v0  ;;  %v2924_v22 = vmul.f32 %v4358_v0, %v5669_v32 }
 0x8b5   :  { %v2920_v18 = vmul.f32 %v4360_v44, %v2917_v1  ;;  %v2928_v56 = vmul.f32 %v5767_v39, %v5283_v40  ;;  %v3066_v44 = vld [vmem:[#allocation2 + $0x220] sm:$0xff] }
 0x8b7   :  { %v5769_v20 = vadd.f32 %v2923_v17, %v2920_v18  ;;  %v2931_v27 = vsel %vm1329_vm4, %v2928_v56, 0.0 }
 0x8b8   :  { %v4362_v52 = vpop.eup %4361 }
 0x8b9   :  { %v2921_v2 = vmul.f32 %v4362_v52, %v2918_v19  ;;  %v2929_v25 = vmul.f32 %v5769_v20, %v5287_v8 }
 0x8bb   :  { %v5776_v10 = vadd.f32 %v2924_v22, %v2921_v2  ;;  %v2932_v34 = vsel %vm1329_vm4, %v2929_v25, 0.0 }
 0x8bc   :  { %v2933_v32 = vadd.f32 %v2932_v34, %v2931_v27 }
 0x8bd   :  { %v2930_v61 = vmul.f32 %v5776_v10, %v5297_v3  ;;  %4071 = vmatpush3.msra.mxu0 %v5776_v10 }
 0x8be   :  { %4072 = vmatprep.subr.mxu0 %v4441_v15 }
 0x8bf   :  { %v2934_v29 = vsel %vm1329_vm4, %v2930_v61, 0.0  ;;  %4073 = vmatpush3.msra.mxu0 %v5769_v20 }
 0x8c0   :  { %4074 = vmatprep.subr.mxu0 %v4441_v15  ;;  %v2935_v55 = vadd.f32 %v2934_v29, %v2933_v32 }
 0x8c1   :  { %4075 = vmatpush3.msra.mxu0 %v5767_v39 }
 0x8c2   :  { %v2936_v23 = vrot.slane %v2935_v55, 4  ;;  %4077 = vmatmul.mubr.msk.f32.vlgmr.msra.gmra.mxu0 %vm397_vm3, %v5684_v21 }
 0x8c3   :  { %4079 = vmatprep.mubr.msk.f32.mxu0 %vm4442_vm2, %v4441_v15 }
 0x8c4   :  { %v2937_v11 = vadd.f32 %v2936_v23, %v2935_v55 }
 0x8c6   :  { %v2938_v13 = vrot.slane %v2937_v11, 2  ;;  %4080 = vmatmul.mubr.msk.f32.gmra.mxu0 %vm397_vm3, %v5693_v49 }
 0x8c7   :  { %4082 = vmatprep.mubr.msk.f32.mxu0 %vm4442_vm2, %v4441_v15 }
 0x8c8   :  { %v2939_v14 = vadd.f32 %v2938_v13, %v2937_v11 }
 0x8ca   :  { %v2940_v36 = vrot.slane %v2939_v14, 1  ;;  %4083 = vmatmul.mubr.msk.f32.gmra.mxu0 %vm397_vm3, %v5702_v26 }
 0x8cb   :  { %4085 = vmatprep.mubr.msk.f32.mxu0 %vm4442_vm2, %v4441_v15 }
 0x8cc   :  { %v2941_v21 = vadd.f32 %v2940_v36, %v2939_v14 }
 0x8ce   :  { %v2942_v37 = vadd.f32 %v2941_v21, %v5322_v58  ;;  %4086 = vmatmul.mubr.msk.f32.gmra.mxu0 %vm397_vm3, %v5712_v28 }
 0x8cf   :  { %4088 = vmatprep.mubr.msk.f32.mxu0 %vm4442_vm2, %v4441_v15 }
 0x8d0   :  { %v3376_v49 = vmul.f32 -1.442695, %v2942_v37  ;;  %v3067_v37 = vld [vmem:[#allocation2 + $0x228] sm:$0xff] }
 0x8d2   :  { %4363 = vpow2.f32 %v3376_v49  ;;  %4089 = vmatmul.mubr.msk.f32.gmra.mxu0 %vm397_vm3, %v5721_v30 }
 0x8d3   :  { %4091 = vmatprep.mubr.msk.f32.mxu0 %vm4442_vm2, %v4441_v15 }
 0x8d6   :  { %4092 = vmatmul.mubr.msk.f32.gmra.mxu0 %vm397_vm3, %v5730_v31 }
 0x8d7   :  { %4094 = vmatprep.mubr.msk.f32.mxu0 %vm4442_vm2, %v4441_v15 }
 0x8da   :  { %4095 = vmatmul.mubr.msk.f32.gmra.mxu0 %vm397_vm3, %v5739_v50  ;;  %v3061_v50 = vld [vmem:[#allocation2 + $0x1f8] sm:$0xff] }
 0x8db   :  { %4097 = vmatprep.mubr.msk.f32.mxu0 %vm4442_vm2, %v4441_v15 }
 0x8de   :  { %4098 = vmatmul.mubr.msk.f32.gmra.mxu0 %vm397_vm3, %v5748_v33 }
 0x8df   :  { %v4364_v26 = vpop.eup %4363  ;;  %4100 = vmatprep.mubr.msk.f32.mxu0 %vm4442_vm2, %v4441_v15 }
 0x8e0   :  { %v2946_v28 = vadd.f32 1.0, %v4364_v26 }
 0x8e2   :  { %4365 = vrcp.f32 %v2946_v28  ;;  %4101 = vmatmul.mubr.msk.f32.gmra.mxu0 %vm397_vm3, %v5757_v24 }
 0x8ef   :  { %v4366_v30 = vpop.eup %4365 }
 0x8f0   :  { %2949 = vst.msk [vmem:[#allocation5 + $0x6] sm:$0x1] %vm1700_vm5, %v4366_v30 }
 0x982   :  { %v3016_v31 = vpop.f32.mrf.mxu0 }
 0x983   :  { %v3070_v16 = vadd.f32 %v3061_v50, %v3016_v31 }
 0x984   :  { %v4078_v38 = vpop.f32.mrf.mxu0 }
 0x985   :  { %v3386_v4 = vmul.f32 -1.442695, %v3070_v16  ;;  %v3068_v16 = vld [vmem:[#allocation2 + $0x230] sm:$0xff] }
 0x986   :  { %v3021_v41 = vpop.f32.mrf.mxu0 }
 0x987   :  { %4367 = vpow2.f32 %v3386_v4  ;;  %v3071_v33 = vadd.f32 %v3062_v43, %v3021_v41  ;;  %v3069_v43 = vld [vmem:[#allocation2 + $0x238] sm:$0xff] }
 0x988   :  { %v4081_v42 = vpop.f32.mrf.mxu0 }
 0x989   :  { %v3387_v45 = vmul.f32 -1.442695, %v3071_v33 }
 0x98a   :  { %v3026_v15 = vpop.f32.mrf.mxu0 }
 0x98b   :  { %4369 = vpow2.f32 %v3387_v45  ;;  %v3072_v60 = vadd.f32 %v3063_v46, %v3026_v15 }
 0x98c   :  { %v4084_v47 = vpop.f32.mrf.mxu0 }
 0x98d   :  { %v3388_v24 = vmul.f32 -1.442695, %v3072_v60 }
 0x98e   :  { %v3031_v51 = vpop.f32.mrf.mxu0 }
 0x98f   :  { %4371 = vpow2.f32 %v3388_v24  ;;  %v3091_v54 = vadd.f32 %v3064_v53, %v3031_v51 }
 0x990   :  { %v4087_v5 = vpop.f32.mrf.mxu0 }
 0x991   :  { %v3389_v7 = vmul.f32 -1.442695, %v3091_v54 }
 0x992   :  { %v3036_v35 = vpop.f32.mrf.mxu0 }
 0x993   :  { %4373 = vpow2.f32 %v3389_v7  ;;  %v3092_v59 = vadd.f32 %v3065_v9, %v3036_v35 }
 0x994   :  { %v4368_v62 = vpop.eup %4367  ;;  %v4090_v63 = vpop.f32.mrf.mxu0 }
 0x995   :  { %v3082_v0 = vadd.f32 1.0, %v4368_v62  ;;  %v3390_v1 = vmul.f32 -1.442695, %v3092_v59 }
 0x996   :  { %v3041_v57 = vpop.f32.mrf.mxu0 }
 0x997   :  { %4375 = vrcp.f32 %v3082_v0  ;;  %v3093_v18 = vadd.f32 %v3066_v44, %v3041_v57 }
 0x998   :  { %v4370_v17 = vpop.eup %4369  ;;  %4377 = vpow2.f32 %v3390_v1  ;;  %v4093_v19 = vpop.f32.mrf.mxu0 }
 0x999   :  { %v3083_v52 = vadd.f32 1.0, %v4370_v17  ;;  %v3391_v2 = vmul.f32 -1.442695, %v3093_v18 }
 0x99a   :  { %v3046_v22 = vpop.f32.mrf.mxu0 }
 0x99b   :  { %4379 = vrcp.f32 %v3083_v52  ;;  %v3112_v23 = vadd.f32 %v3046_v22, %v5272_v6 }
 0x99c   :  { %v4372_v25 = vpop.eup %4371  ;;  %4381 = vpow2.f32 %v3391_v2  ;;  %v4096_v56 = vpop.f32.mrf.mxu0 }
 0x99d   :  { %v3084_v34 = vadd.f32 1.0, %v4372_v25 }
 0x99e   :  { %v3051_v61 = vpop.f32.mrf.mxu0 }
 0x99f   :  { %4383 = vrcp.f32 %v3084_v34  ;;  %v3113_v26 = vadd.f32 %v3051_v61, %v5275_v12 }
 0x9a0   :  { %v4374_v27 = vpop.eup %4373  ;;  %v4099_v32 = vpop.f32.mrf.mxu0 }
 0x9a1   :  { %v3103_v29 = vadd.f32 1.0, %v4374_v27 }
 0x9a2   :  { %v3056_v55 = vpop.f32.mrf.mxu0 }
 0x9a3   :  { %4385 = vrcp.f32 %v3103_v29  ;;  %v3114_v6 = vadd.f32 %v3056_v55, %v5270_v48 }
 0x9a4   :  { %v4376_v11 = vpop.eup %4375  ;;  %v4102_v13 = vpop.f32.mrf.mxu0 }
 0x9a5   :  { %v4378_v14 = vpop.eup %4377  ;;  %v3115_v36 = vmul.f32 %v4376_v11, %v3112_v23 }
 0x9a6   :  { %v3104_v21 = vadd.f32 1.0, %v4378_v14 }
 0x9a7   :  { %v3118_v49 = vadd.f32 %v3115_v36, %v3067_v37 }
 0x9a8   :  { %v4380_v28 = vpop.eup %4379  ;;  %4387 = vrcp.f32 %v3104_v21 }
 0x9a9   :  { %v4382_v30 = vpop.eup %4381  ;;  %4389 = vtanh.f32 %v3118_v49  ;;  %v3116_v31 = vmul.f32 %v4380_v28, %v3113_v26 }
 0x9aa   :  { %v3105_v50 = vadd.f32 1.0, %v4382_v30 }
 0x9ab   :  { %v3119_v38 = vadd.f32 %v3116_v31, %v3068_v16 }
 0x9ac   :  { %v4384_v4 = vpop.eup %4383  ;;  %4391 = vrcp.f32 %v3105_v50 }
 0x9ad   :  { %4393 = vtanh.f32 %v3119_v38  ;;  %v3117_v41 = vmul.f32 %v4384_v4, %v3114_v6 }
 0x9af   :  { %v3120_v33 = vadd.f32 %v3117_v41, %v3069_v43 }
 0x9b0   :  { %v4386_v42 = vpop.eup %4385 }
 0x9b1   :  { %4395 = vtanh.f32 %v3120_v33  ;;  %v3124_v12 = vsub.f32 1.0, %v4386_v42  ;;  %v3130_v46 = vmul.f32 %v4386_v42, %v5767_v39 }
 0x9b5   :  { %v4388_v45 = vpop.eup %4387 }
 0x9b6   :  { %v4390_v15 = vpop.eup %4389  ;;  %v3125_v24 = vsub.f32 1.0, %v4388_v45  ;;  %v3131_v48 = vmul.f32 %v4388_v45, %v5769_v20 }
 0x9b7   :  { %v3127_v60 = vmul.f32 %v4390_v15, %v3124_v12 }
 0x9b9   :  { %v4392_v47 = vpop.eup %4391  ;;  %v3133_v51 = vadd.f32 %v3130_v46, %v3127_v60 }
 0x9ba   :  { %v4394_v53 = vpop.eup %4393  ;;  %v3126_v5 = vsub.f32 1.0, %v4392_v47  ;;  %v3132_v9 = vmul.f32 %v4392_v47, %v5776_v10 }
 0x9bb   :  { %3158 = vst.msk [vmem:[#allocation3] sm:$0xff] %vm1329_vm4, %v3133_v51  ;;  %v3128_v54 = vmul.f32 %v4394_v53, %v3125_v24  ;;  %v3136_v59 = vmul.f32 %v3133_v51, %v5283_v40 }
 0x9bd   :  { %v3134_v7 = vadd.f32 %v3131_v48, %v3128_v54  ;;  %v3139_v20 = vsel %vm1329_vm4, %v3136_v59, 0.0 }
 0x9be   :  { %v4396_v35 = vpop.eup %4395 }
 0x9bf   :  { %v3137_v62 = vmul.f32 %v3134_v7, %v5287_v8  ;;  %3159 = vst.msk [vmem:[#allocation3 + $0x8] sm:$0xff] %vm1329_vm4, %v3134_v7  ;;  %v3129_v39 = vmul.f32 %v4396_v35, %v3126_v5 }
 0x9c1   :  { %v3140_v63 = vsel %vm1329_vm4, %v3137_v62, 0.0  ;;  %v3135_v0 = vadd.f32 %v3132_v9, %v3129_v39 }
 0x9c2   :  { %v3141_v57 = vadd.f32 %v3140_v63, %v3139_v20 }
 0x9c3   :  { %v3138_v1 = vmul.f32 %v3135_v0, %v5297_v3  ;;  %3160 = vst.msk [vmem:[#allocation3 + $0x10] sm:$0xff] %vm1329_vm4, %v3135_v0 }
 0x9c5   :  { %v3142_v44 = vsel %vm1329_vm4, %v3138_v1, 0.0 }
 0x9c6   :  { %v3143_v10 = vadd.f32 %v3142_v44, %v3141_v57 }
 0x9c8   :  { %v3144_v18 = vrot.slane %v3143_v10, 4 }
 0x9ca   :  { %v3145_v40 = vadd.f32 %v3144_v18, %v3143_v10 }
 0x9cc   :  { %v3146_v17 = vrot.slane %v3145_v40, 2 }
 0x9ce   :  { %v3147_v8 = vadd.f32 %v3146_v17, %v3145_v40 }
 0x9d0   :  { %v3148_v19 = vrot.slane %v3147_v8, 1 }
 0x9d2   :  { %v3149_v52 = vadd.f32 %v3148_v19, %v3147_v8 }
 0x9d4   :  { %v3150_v2 = vadd.f32 %v3149_v52, %v5322_v58 }
 0x9d6   :  { %v3392_v22 = vmul.f32 -1.442695, %v3150_v2 }
 0x9d8   :  { %4397 = vpow2.f32 %v3392_v22 }
 0x9e5   :  { %v4398_v25 = vpop.eup %4397 }
 0x9e6   :  { %v3154_v56 = vadd.f32 1.0, %v4398_v25 }
 0x9e8   :  { %4399 = vrcp.f32 %v3154_v56 }
 0x9f5   :  { %v4400_v3 = vpop.eup %4399 }
 0x9f6   :  { %3157 = vst.msk [vmem:[#allocation5 + $0x7] sm:$0x1] %vm1700_vm5, %v4400_v3 }
 0x9f7   :  { %4430 = shalt.err (!%p4427_p4)
}
 0x9f8   :  { %3170 = dma.vmem_to_hbm [thread:$0]  %s3168_s10, 128, %s5853_s9, [#allocation6]  }
 0x9f9   :  { %4439 = dma.done.wait [#allocation6], 128  }
 0x9fa   :  { %4440 = vsyncadd [#allocation6], 4294967168 }
 0x9fb   :  { %3174 = vsyncpa [#allocation6], 1 }

</bundles_post_ra>
